<compile_context>
chip_gen: v7x
topology: tpu7x:2x2x1
jax: 0.10.0
libtpu: 0.0.40
codegen_flags: <defaults>
</compile_context>

<pallas_src>
import functools
import math

import jax
import jax.numpy as jnp
from jax import lax
from jax.experimental import pallas as pl
from jax.experimental.pallas import tpu as pltpu


def _decoder_kernel(
    enc_ref,       # (bb, T, Hp)  encoder outputs (weight dtype), H zero-padded
    emb_w_ref,     # (Vp, Hp)     embedding table (weight dtype)
    wa_h_ref,      # (Hp, Hp)     attn Linear weight, hidden half, transposed
    wa_e_ref,      # (Hp, Hp)     attn Linear weight, encoder half, transposed
    ba_ref,        # (1, Hp)      attn Linear bias (f32)
    v_ref,         # (1, Hp)      attention vector v (f32)
    w_ih_x_ref,    # (3, Hp, Hp)  GRU W_ih (embedding half), per-gate [r,z,n], T
    w_ih_c_ref,    # (3, Hp, Hp)  GRU W_ih (context half),   per-gate, T
    b_ih_ref,      # (3, 1, Hp)   f32
    w_hh_ref,      # (3, Hp, Hp)  GRU W_hh, per-gate, T
    b_hh_ref,      # (3, 1, Hp)   f32
    w_out_ref,     # (Hp, Vp)     output Linear weight, transposed
    b_out_ref,     # (1, Vp)      f32 (padded vocab columns = -1e30)
    logits_ref,    # out (chunk_len, bb, Vp) f32 : per-step log-probs (streamed)
    hidden_ref,    # out (bb, Hp) f32            : final GRU hidden state
    enc_proj_ref,  # scratch (bb, T, Hp)         : enc @ W_attn_enc + b_attn
    h_ref,         # scratch (bb, Hp) f32        : GRU hidden, carried across chunks
    embx_ref,      # scratch (bb, Hp) f32        : fed-back embedding, carried
    *,
    sos_id: int,
):
    bb, T, Hp = enc_ref.shape
    Vp = emb_w_ref.shape[0]
    chunk_len = logits_ref.shape[0]
    wdt = emb_w_ref.dtype          # MXU operand dtype (bf16 or f32)
    edt = enc_proj_ref.dtype       # attention-energy dtype
    f32 = jnp.float32

    c = pl.program_id(1)           # decode-step chunk index ("arbitrary" axis)

    # ---- once per batch tile: encoder projection + decoder state init -----
    @pl.when(c == 0)
    def _init():
        enc0 = enc_ref[...]
        ep = jnp.dot(enc0.reshape(bb * T, Hp), wa_e_ref[...],
                     preferred_element_type=f32).reshape(bb, T, Hp)
        enc_proj_ref[...] = (ep + ba_ref[...]).astype(edt)
        h_ref[...] = jnp.zeros((bb, Hp), f32)
        sos_emb = emb_w_ref[pl.ds(sos_id, 1), :].astype(f32)        # (1, Hp)
        embx_ref[...] = jnp.broadcast_to(sos_emb, (bb, Hp))

    # ---- small step-invariant values, hoisted out of the decode loop ------
    v_f32 = v_ref[...].astype(f32)                                  # (1, Hp)
    b_ih = b_ih_ref[...]                                            # (3, 1, Hp)
    b_hh = b_hh_ref[...]
    b_out = b_out_ref[...]                                          # (1, Vp)

    def step_fn(s, carry):
        h, embx = carry                                             # (bb, Hp) f32

        # ---------------- additive attention ----------------
        h_part = jnp.dot(h.astype(wdt), wa_h_ref[...],
                         preferred_element_type=f32)                # (bb, Hp)
        energy = jnp.tanh(enc_proj_ref[...]
                          + h_part.astype(edt)[:, None, :])         # (bb, T, Hp)
        scores = jnp.sum(energy * v_f32, axis=2)                    # (bb, T) f32
        scores = scores - jnp.max(scores, axis=1, keepdims=True)
        expv = jnp.exp(scores)
        attn = expv * pl.reciprocal(
            jnp.sum(expv, axis=1, keepdims=True), approx=True)      # (bb, T)

        # context = attn.bmm(encoder_outputs).  The q=1 batched matmul wastes
        # MXU rows, so use the VPU/XLU weighted reduce (benchmark vs einsum).
        context = jnp.sum(attn[:, :, None] * enc_ref[...], axis=1)  # (bb, Hp) f32

        # ---------------- GRU cell (n_layers=1), per-gate weights ----------
        embx_w = embx.astype(wdt)
        ctx_w = context.astype(wdt)
        h_w = h.astype(wdt)

        def gate(g):
            gi = (jnp.dot(embx_w, w_ih_x_ref[g], preferred_element_type=f32)
                  + jnp.dot(ctx_w, w_ih_c_ref[g], preferred_element_type=f32)
                  + b_ih[g])
            gh = jnp.dot(h_w, w_hh_ref[g], preferred_element_type=f32) + b_hh[g]
            return gi, gh

        gi_r, gh_r = gate(0)
        gi_z, gh_z = gate(1)
        gi_n, gh_n = gate(2)
        r = jax.nn.sigmoid(gi_r + gh_r)
        z = jax.nn.sigmoid(gi_z + gh_z)
        n = jnp.tanh(gi_n + r * gh_n)
        h_new = (1.0 - z) * n + z * h                               # (bb, Hp)

        # ---------------- output projection + log_softmax -------------------
        logits = jnp.dot(h_new.astype(wdt), w_out_ref[...],
                         preferred_element_type=f32) + b_out        # (bb, Vp)
        m = jnp.max(logits, axis=1, keepdims=True)
        lse = jnp.log(jnp.sum(jnp.exp(logits - m), axis=1, keepdims=True)) + m
        logp = logits - lse
        logits_ref[s, :, :] = logp        # streamed to HBM with this chunk

        # -------- greedy feedback: argmax -> one-hot -> embedding row -------
        # TODO(synk): for production vocab sizes replace the one-hot matmul
        # with a per-row dynamic/DMA gather from an HBM-resident embedding.
        iota = lax.broadcasted_iota(jnp.int32, (bb, Vp), 1)
        mx = m - lse                                    # == max(logp), exact
        cand = jnp.where(logp == mx, iota, Vp)          # first max on ties
        idx = jnp.min(cand, axis=1, keepdims=True)
        onehot = (iota == idx).astype(wdt)
        embx_new = jnp.dot(onehot, emb_w_ref[...],
                           preferred_element_type=f32)              # (bb, Hp)
        return h_new, embx_new

    h_fin, embx_fin = lax.fori_loop(0, chunk_len, step_fn,
                                    (h_ref[...], embx_ref[...]))

    # carry decoder state to the next chunk; the resident hidden block is
    # written back to HBM once per batch tile.
    h_ref[...] = h_fin
    embx_ref[...] = embx_fin
    hidden_ref[...] = h_fin


# ----------------------------- host-side wrapper -----------------------------

def _round_up(x, m):
    return ((x + m - 1) // m) * m


def _pad2d(x, rows, cols, value=0.0):
    return jnp.pad(x, ((0, rows - x.shape[0]), (0, cols - x.shape[1])),
                   constant_values=value)


def _vmem_limit_bytes(default=32 * 1024 * 1024):
    """Generation-aware VMEM budget (64 MiB/TC on v7x vs 128 MiB on v5e/v6e)."""
    try:
        cap = getattr(pltpu.get_tpu_info(), "vmem_capacity_bytes", None)
        if cap:
            return min(int(cap * 0.8), 112 * 1024 * 1024)
    except Exception:
        pass
    return default


def decoder_forward(params, encoder_outputs, *, max_len, sos_id,
                    weight_dtype=jnp.bfloat16, energy_dtype=None,
                    batch_block=None, chunk_len=None, lane_multiple=128):
    """Greedy decode (inputs=None, teacher_forcing_ratio=0 path of Decoder.forward).

    params:       torch-layout parameters (see init_params).
    weight_dtype: MXU operand dtype (bf16 on v6e/v7x; pass f32 on v5e).
    energy_dtype: dtype of the attention add+tanh (defaults to weight_dtype).
    batch_block:  rows per grid tile.  On v7x pass <= B/2 (a multiple of 8) so
                  both TensorCores get a batch tile; on v5e/v6e the default
                  (whole batch) is best.
    chunk_len:    decode steps per streamed output chunk (must divide max_len).
    """
    B, T, H = encoder_outputs.shape
    V = params["emb_w"].shape[0]
    Hp = _round_up(H, lane_multiple)
    Vp = _round_up(V, lane_multiple)

    bb = B if batch_block is None else batch_block
    assert B % bb == 0, "batch_block must divide the batch size"
    if bb != B:
        assert bb % 8 == 0, "partial batch tiles must be sublane-aligned"

    if chunk_len is None:
        # largest divisor of max_len whose streamed slab stays <= ~4 MiB
        budget = 4 * 1024 * 1024
        chunk_len = 1
        for d in range(1, max_len + 1):
            if max_len % d == 0 and d * bb * Vp * 4 <= budget:
                chunk_len = d
    assert max_len % chunk_len == 0, "chunk_len must divide max_len"
    num_chunks = max_len // chunk_len

    wdt = jnp.dtype(weight_dtype)
    edt = wdt if energy_dtype is None else jnp.dtype(energy_dtype)
    f32 = jnp.float32

    # ---- torch-layout params -> transposed / per-gate / lane-padded --------
    emb_w = _pad2d(params["emb_w"], Vp, Hp).astype(wdt)             # (Vp, Hp)

    wa_t = params["attn_w"].T                                       # (2H, H)
    wa_h = _pad2d(wa_t[:H], Hp, Hp).astype(wdt)
    wa_e = _pad2d(wa_t[H:], Hp, Hp).astype(wdt)
    ba = _pad2d(params["attn_b"][None, :], 1, Hp).astype(f32)
    v_vec = _pad2d(params["v"][None, :], 1, Hp).astype(f32)

    def per_gate_w(w, lo, hi):          # torch (3H, in), gate rows = [r, z, n]
        return jnp.stack(
            [_pad2d(w[g * H:(g + 1) * H, lo:hi].T, Hp, Hp) for g in range(3)],
            axis=0).astype(wdt)                                     # (3, Hp, Hp)

    w_ih_x = per_gate_w(params["w_ih"], 0, H)       # multiplies the embedding
    w_ih_c = per_gate_w(params["w_ih"], H, 2 * H)   # multiplies the context
    w_hh = per_gate_w(params["w_hh"], 0, H)

    def per_gate_b(b):
        return jnp.stack(
            [_pad2d(b[g * H:(g + 1) * H][None, :], 1, Hp) for g in range(3)],
            axis=0).astype(f32)                                     # (3, 1, Hp)

    b_ih = per_gate_b(params["b_ih"])
    b_hh = per_gate_b(params["b_hh"])

    w_out = _pad2d(params["out_w"].T, Hp, Vp).astype(wdt)           # (Hp, Vp)
    # padded vocab columns get a very negative bias: never win the argmax and
    # contribute ~0 to the softmax normalizer.
    b_out = jnp.concatenate(
        [params["out_b"].astype(f32),
         jnp.full((Vp - V,), -1e30, f32)])[None, :]                 # (1, Vp)

    enc = jnp.pad(encoder_outputs,
                  ((0, 0), (0, 0), (0, Hp - H))).astype(wdt)        # (B, T, Hp)

    kernel = functools.partial(_decoder_kernel, sos_id=sos_id)

    def run(single_buffer):
        def const_spec(shape):
            nd = len(shape)
            idx = lambda i, c, _nd=nd: (0,) * _nd
            if single_buffer:
                # weight-stationary inputs: one VMEM copy instead of two
                return pl.BlockSpec(shape, idx, pipeline_mode=pl.Buffered(1))
            return pl.BlockSpec(shape, idx)

        in_specs = [
            pl.BlockSpec((bb, T, Hp), lambda i, c: (i, 0, 0)),  # enc (batch tiled)
            const_spec((Vp, Hp)),          # emb_w
            const_spec((Hp, Hp)),          # wa_h
            const_spec((Hp, Hp)),          # wa_e
            const_spec((1, Hp)),           # ba
            const_spec((1, Hp)),           # v
            const_spec((3, Hp, Hp)),       # w_ih_x
            const_spec((3, Hp, Hp)),       # w_ih_c
            const_spec((3, 1, Hp)),        # b_ih
            const_spec((3, Hp, Hp)),       # w_hh
            const_spec((3, 1, Hp)),        # b_hh
            const_spec((Hp, Vp)),          # w_out
            const_spec((1, Vp)),           # b_out
        ]
        out_specs = [
            pl.BlockSpec((chunk_len, bb, Vp), lambda i, c: (c, i, 0)),  # log-probs
            pl.BlockSpec((bb, Hp), lambda i, c: (i, 0)),                # hidden
        ]
        out_shape = [
            jax.ShapeDtypeStruct((max_len, B, Vp), f32),
            jax.ShapeDtypeStruct((B, Hp), f32),
        ]
        scratch_shapes = [
            pltpu.VMEM((bb, T, Hp), edt),  # hoisted encoder projection
            pltpu.VMEM((bb, Hp), f32),     # GRU hidden (carried across chunks)
            pltpu.VMEM((bb, Hp), f32),     # fed-back embedding
        ]
        return pl.pallas_call(
            kernel,
            out_shape=out_shape,
            grid_spec=pltpu.PrefetchScalarGridSpec(
                num_scalar_prefetch=0,
                grid=(B // bb, num_chunks),
                in_specs=in_specs,
                out_specs=out_specs,
                scratch_shapes=scratch_shapes,
            ),
            compiler_params=pltpu.CompilerParams(
                dimension_semantics=("parallel", "arbitrary"),
                vmem_limit_bytes=_vmem_limit_bytes(),
            ),
        )(enc, emb_w, wa_h, wa_e, ba, v_vec,
          w_ih_x, w_ih_c, b_ih, w_hh, b_hh, w_out, b_out)

    try:
        logits_pad, hidden_pad = run(single_buffer=True)
    except Exception:
        # this jax build rejects pipeline_mode=pl.Buffered(1); fall back to
        # default double buffering of the weight-stationary inputs.
        logits_pad, hidden_pad = run(single_buffer=False)

    outputs = jnp.transpose(logits_pad, (1, 0, 2))[:, :, :V]    # (B, max_len, V)
    decoder_hidden = hidden_pad[:, :H][None, :, :]              # (1, B, H)
    return outputs, decoder_hidden


def init_params(key, vocab_size, hidden_size):
    """torch-layout parameters matching Decoder.__init__ initializers."""
    H, V = hidden_size, vocab_size
    ks = jax.random.split(key, 10)

    def unif(k, shape, bound):
        return jax.random.uniform(k, shape, jnp.float32, -bound, bound)

    emb_w = jax.random.normal(ks[0], (V, H), jnp.float32)        # nn.Embedding
    b_lin = 1.0 / math.sqrt(2 * H)
    attn_w = unif(ks[1], (H, 2 * H), b_lin)                      # Linear(2H -> H)
    attn_b = unif(ks[2], (H,), b_lin)
    v = unif(ks[3], (H,), 1.0 / math.sqrt(H))                    # Attention.v
    b_g = 1.0 / math.sqrt(H)
    w_ih = unif(ks[4], (3 * H, 2 * H), b_g)                      # GRU(2H -> H)
    w_hh = unif(ks[5], (3 * H, H), b_g)
    b_ih = unif(ks[6], (3 * H,), b_g)
    b_hh = unif(ks[7], (3 * H,), b_g)
    b_o = 1.0 / math.sqrt(H)
    out_w = unif(ks[8], (V, H), b_o)                             # Linear(H -> V)
    out_b = unif(ks[9], (V,), b_o)
    return dict(emb_w=emb_w, attn_w=attn_w, attn_b=attn_b, v=v,
                w_ih=w_ih, w_hh=w_hh, b_ih=b_ih, b_hh=b_hh,
                out_w=out_w, out_b=out_b)


if __name__ == "__main__":
    # small, module-consistent shapes
    B, T, H = 2, 8, 32          # batch, encoder time steps, hidden_size
    V = 16                      # vocab_size
    MAX_LEN = 6                 # max_len
    SOS_ID, EOS_ID = 1, 2       # eos_id unused in this forward path

    key = jax.random.PRNGKey(0)
    k_par, k_enc = jax.random.split(key)
    params = init_params(k_par, V, H)
    encoder_outputs = jax.random.normal(k_enc, (B, T, H), jnp.float32)

    outputs, decoder_hidden = decoder_forward(
        params, encoder_outputs, max_len=MAX_LEN, sos_id=SOS_ID,
        chunk_len=2)   # 3 streamed output chunks -> exercises the carry path
    jax.block_until_ready((outputs, decoder_hidden))

    assert outputs.shape == (B, MAX_LEN, V)
    assert decoder_hidden.shape == (1, B, H)
    # rows of log-probs must (approximately) sum to 1 after exp
    row_sums = jnp.exp(outputs).sum(-1)
    assert bool(jnp.all(jnp.abs(row_sums - 1.0) < 1e-3))
    print("KERNEL_OK")
</pallas_src>

<mosaic_0001>
module attributes {stable_mosaic.version = 11 : i64} {
  func.func @_decoder_kernel(%arg0: i32, %arg1: i32, %arg2: memref<2x8x128xbf16, #tpu.memory_space<vmem>>, %arg3: memref<128x128xbf16, #tpu.memory_space<vmem>>, %arg4: memref<128x128xbf16, #tpu.memory_space<vmem>>, %arg5: memref<128x128xbf16, #tpu.memory_space<vmem>>, %arg6: memref<1x128xf32, #tpu.memory_space<vmem>>, %arg7: memref<1x128xf32, #tpu.memory_space<vmem>>, %arg8: memref<3x128x128xbf16, #tpu.memory_space<vmem>>, %arg9: memref<3x128x128xbf16, #tpu.memory_space<vmem>>, %arg10: memref<3x1x128xf32, #tpu.memory_space<vmem>>, %arg11: memref<3x128x128xbf16, #tpu.memory_space<vmem>>, %arg12: memref<3x1x128xf32, #tpu.memory_space<vmem>>, %arg13: memref<128x128xbf16, #tpu.memory_space<vmem>>, %arg14: memref<1x128xf32, #tpu.memory_space<vmem>>, %arg15: memref<2x2x128xf32, #tpu.memory_space<vmem>>, %arg16: memref<2x128xf32, #tpu.memory_space<vmem>>, %arg17: memref<2x8x128xbf16, #tpu.memory_space<vmem>>, %arg18: memref<2x128xf32, #tpu.memory_space<vmem>>, %arg19: memref<2x128xf32, #tpu.memory_space<vmem>>) attributes {dimension_semantics = [#tpu.dimension_semantics<parallel>, #tpu.dimension_semantics<arbitrary>], iteration_bounds = array<i64: 1, 3>, scalar_prefetch = 0 : i64, scratch_operands = 3 : i64, tpu.core_type = #tpu.core_type<tc>, window_params = [{transform_indices = @transform_0, window_bounds = array<i64: 2, 8, 128>}, {pipeline_mode = #tpu.pipeline_mode<synchronous>, transform_indices = @transform_1, window_bounds = array<i64: 128, 128>}, {pipeline_mode = #tpu.pipeline_mode<synchronous>, transform_indices = @transform_2, window_bounds = array<i64: 128, 128>}, {pipeline_mode = #tpu.pipeline_mode<synchronous>, transform_indices = @transform_3, window_bounds = array<i64: 128, 128>}, {pipeline_mode = #tpu.pipeline_mode<synchronous>, transform_indices = @transform_4, window_bounds = array<i64: 1, 128>}, {pipeline_mode = #tpu.pipeline_mode<synchronous>, transform_indices = @transform_5, window_bounds = array<i64: 1, 128>}, {pipeline_mode = #tpu.pipeline_mode<synchronous>, transform_indices = @transform_6, window_bounds = array<i64: 3, 128, 128>}, {pipeline_mode = #tpu.pipeline_mode<synchronous>, transform_indices = @transform_7, window_bounds = array<i64: 3, 128, 128>}, {pipeline_mode = #tpu.pipeline_mode<synchronous>, transform_indices = @transform_8, window_bounds = array<i64: 3, 1, 128>}, {pipeline_mode = #tpu.pipeline_mode<synchronous>, transform_indices = @transform_9, window_bounds = array<i64: 3, 128, 128>}, {pipeline_mode = #tpu.pipeline_mode<synchronous>, transform_indices = @transform_10, window_bounds = array<i64: 3, 1, 128>}, {pipeline_mode = #tpu.pipeline_mode<synchronous>, transform_indices = @transform_11, window_bounds = array<i64: 128, 128>}, {pipeline_mode = #tpu.pipeline_mode<synchronous>, transform_indices = @transform_12, window_bounds = array<i64: 1, 128>}, {transform_indices = @transform_13, window_bounds = array<i64: 2, 2, 128>}, {transform_indices = @transform_14, window_bounds = array<i64: 2, 128>}]} {
    %c0_i32 = arith.constant 0 : i32
    %0 = arith.cmpi eq, %arg1, %c0_i32 : i32
    %1 = arith.extui %0 : i1 to i32
    %c0_i32_0 = arith.constant 0 : i32
    %2 = arith.cmpi ne, %1, %c0_i32_0 : i32
    scf.if %2 {
      %c0_22 = arith.constant 0 : index
      %c0_23 = arith.constant 0 : index
      %c0_24 = arith.constant 0 : index
      %14 = vector.load %arg2[%c0_22, %c0_23, %c0_24] : memref<2x8x128xbf16, #tpu.memory_space<vmem>>, vector<2x8x128xbf16>
      %15 = vector.shape_cast %14 : vector<2x8x128xbf16> to vector<16x128xbf16>
      %c0_25 = arith.constant 0 : index
      %c0_26 = arith.constant 0 : index
      %16 = vector.load %arg5[%c0_25, %c0_26] : memref<128x128xbf16, #tpu.memory_space<vmem>>, vector<128x128xbf16>
      %cst = arith.constant dense<0.000000e+00> : vector<16x128xf32>
      %17 = tpu.matmul %15, %16, %cst {dimension_numbers = #tpu.dot_dimension_numbers<[1], [0], [0], [1], [0, 0, 1, 1], [], []>} : vector<16x128xbf16>, vector<128x128xbf16>, vector<16x128xf32> -> vector<16x128xf32>
      %18 = vector.shape_cast %17 : vector<16x128xf32> to vector<2x8x128xf32>
      %c0_27 = arith.constant 0 : index
      %c0_28 = arith.constant 0 : index
      %19 = vector.load %arg6[%c0_27, %c0_28] : memref<1x128xf32, #tpu.memory_space<vmem>>, vector<1x128xf32>
      %20 = vector.shape_cast %19 : vector<1x128xf32> to vector<1x1x128xf32>
      %21 = vector.broadcast %20 : vector<1x1x128xf32> to vector<2x8x128xf32>
      %22 = arith.addf %18, %21 : vector<2x8x128xf32>
      %23 = arith.truncf %22 : vector<2x8x128xf32> to vector<2x8x128xbf16>
      %c0_29 = arith.constant 0 : index
      %c0_30 = arith.constant 0 : index
      %c0_31 = arith.constant 0 : index
      %24 = vector.load %arg17[%c0_29, %c0_30, %c0_31] : memref<2x8x128xbf16, #tpu.memory_space<vmem>>, vector<2x8x128xbf16>
      tpu.vector_store %arg17[%c0_29, %c0_30, %c0_31], %23 {strides = array<i32>} : memref<2x8x128xbf16, #tpu.memory_space<vmem>>, vector<2x8x128xbf16>,
      %cst_32 = arith.constant 0.000000e+00 : f32
      %25 = vector.broadcast %cst_32 : f32 to vector<2x128xf32>
      %c0_33 = arith.constant 0 : index
      %c0_34 = arith.constant 0 : index
      %26 = vector.load %arg18[%c0_33, %c0_34] : memref<2x128xf32, #tpu.memory_space<vmem>>, vector<2x128xf32>
      tpu.vector_store %arg18[%c0_33, %c0_34], %25 {strides = array<i32>} : memref<2x128xf32, #tpu.memory_space<vmem>>, vector<2x128xf32>,
      %c1 = arith.constant 1 : index
      %c0_35 = arith.constant 0 : index
      %27 = vector.load %arg3[%c1, %c0_35] : memref<128x128xbf16, #tpu.memory_space<vmem>>, vector<1x128xbf16>
      %28 = arith.extf %27 : vector<1x128xbf16> to vector<1x128xf32>
      %29 = vector.shape_cast %28 : vector<1x128xf32> to vector<1x128xf32>
      %30 = vector.broadcast %29 : vector<1x128xf32> to vector<2x128xf32>
      %c0_36 = arith.constant 0 : index
      %c0_37 = arith.constant 0 : index
      %31 = vector.load %arg19[%c0_36, %c0_37] : memref<2x128xf32, #tpu.memory_space<vmem>>, vector<2x128xf32>
      tpu.vector_store %arg19[%c0_36, %c0_37], %30 {strides = array<i32>} : memref<2x128xf32, #tpu.memory_space<vmem>>, vector<2x128xf32>,
    } else {
    }
    %c0 = arith.constant 0 : index
    %c0_1 = arith.constant 0 : index
    %3 = vector.load %arg7[%c0, %c0_1] : memref<1x128xf32, #tpu.memory_space<vmem>>, vector<1x128xf32>
    %c0_2 = arith.constant 0 : index
    %c0_3 = arith.constant 0 : index
    %c0_4 = arith.constant 0 : index
    %4 = vector.load %arg10[%c0_2, %c0_3, %c0_4] : memref<3x1x128xf32, #tpu.memory_space<vmem>>, vector<3x1x128xf32>
    %c0_5 = arith.constant 0 : index
    %c0_6 = arith.constant 0 : index
    %c0_7 = arith.constant 0 : index
    %5 = vector.load %arg12[%c0_5, %c0_6, %c0_7] : memref<3x1x128xf32, #tpu.memory_space<vmem>>, vector<3x1x128xf32>
    %c0_8 = arith.constant 0 : index
    %c0_9 = arith.constant 0 : index
    %6 = vector.load %arg14[%c0_8, %c0_9] : memref<1x128xf32, #tpu.memory_space<vmem>>, vector<1x128xf32>
    %c0_10 = arith.constant 0 : index
    %c0_11 = arith.constant 0 : index
    %7 = vector.load %arg18[%c0_10, %c0_11] : memref<2x128xf32, #tpu.memory_space<vmem>>, vector<2x128xf32>
    %c0_12 = arith.constant 0 : index
    %c0_13 = arith.constant 0 : index
    %8 = vector.load %arg19[%c0_12, %c0_13] : memref<2x128xf32, #tpu.memory_space<vmem>>, vector<2x128xf32>
    %c0_i32_14 = arith.constant 0 : i32
    %c2_i32 = arith.constant 2 : i32
    %9 = arith.addi %c0_i32_14, %c2_i32 : i32
    %c1_i32 = arith.constant 1 : i32
    %10:2 = scf.for %arg20 = %c0_i32_14 to %9 step %c1_i32 iter_args(%arg21 = %7, %arg22 = %8) -> (vector<2x128xf32>, vector<2x128xf32>)  : i32 {
      %14 = arith.truncf %arg21 : vector<2x128xf32> to vector<2x128xbf16>
      %c0_22 = arith.constant 0 : index
      %c0_23 = arith.constant 0 : index
      %15 = vector.load %arg4[%c0_22, %c0_23] : memref<128x128xbf16, #tpu.memory_space<vmem>>, vector<128x128xbf16>
      %cst = arith.constant dense<0.000000e+00> : vector<2x128xf32>
      %16 = tpu.matmul %14, %15, %cst {dimension_numbers = #tpu.dot_dimension_numbers<[1], [0], [0], [1], [0, 0, 1, 1], [], []>} : vector<2x128xbf16>, vector<128x128xbf16>, vector<2x128xf32> -> vector<2x128xf32>
      %c0_24 = arith.constant 0 : index
      %c0_25 = arith.constant 0 : index
      %c0_26 = arith.constant 0 : index
      %17 = vector.load %arg17[%c0_24, %c0_25, %c0_26] : memref<2x8x128xbf16, #tpu.memory_space<vmem>>, vector<2x8x128xbf16>
      %18 = arith.truncf %16 : vector<2x128xf32> to vector<2x128xbf16>
      %19 = vector.shape_cast %18 : vector<2x128xbf16> to vector<2x1x128xbf16>
      %20 = vector.broadcast %19 : vector<2x1x128xbf16> to vector<2x8x128xbf16>
      %21 = arith.addf %17, %20 : vector<2x8x128xbf16>
      %22 = math.tanh %21 : vector<2x8x128xbf16>
      %23 = arith.extf %22 : vector<2x8x128xbf16> to vector<2x8x128xf32>
      %24 = vector.shape_cast %3 : vector<1x128xf32> to vector<1x1x128xf32>
      %25 = vector.broadcast %24 : vector<1x1x128xf32> to vector<2x8x128xf32>
      %26 = arith.mulf %23, %25 : vector<2x8x128xf32>
      %cst_27 = arith.constant dense<0.000000e+00> : vector<2x8xf32>
      %27 = vector.multi_reduction <add>, %26, %cst_27 [2] : vector<2x8x128xf32> to vector<2x8xf32>
      %cst_28 = arith.constant dense<0xFF800000> : vector<2xf32>
      %28 = vector.multi_reduction <maximumf>, %27, %cst_28 [1] : vector<2x8xf32> to vector<2xf32>
      %29 = vector.shape_cast %28 : vector<2xf32> to vector<2x1xf32>
      %30 = vector.broadcast %29 : vector<2x1xf32> to vector<2x8xf32>
      %31 = arith.subf %27, %30 : vector<2x8xf32>
      %32 = math.exp %31 : vector<2x8xf32>
      %cst_29 = arith.constant dense<0.000000e+00> : vector<2xf32>
      %33 = vector.multi_reduction <add>, %32, %cst_29 [1] : vector<2x8xf32> to vector<2xf32>
      %34 = vector.shape_cast %33 : vector<2xf32> to vector<2x1xf32>
      %35 = tpu.reciprocal %34 {approx = true} : vector<2x1xf32> -> vector<2x1xf32>
      %36 = vector.broadcast %35 : vector<2x1xf32> to vector<2x8xf32>
      %37 = arith.mulf %32, %36 : vector<2x8xf32>
      %38 = vector.shape_cast %37 : vector<2x8xf32> to vector<2x8x1xf32>
      %c0_30 = arith.constant 0 : index
      %c0_31 = arith.constant 0 : index
      %c0_32 = arith.constant 0 : index
      %39 = vector.load %arg2[%c0_30, %c0_31, %c0_32] : memref<2x8x128xbf16, #tpu.memory_space<vmem>>, vector<2x8x128xbf16>
      %40 = arith.extf %39 : vector<2x8x128xbf16> to vector<2x8x128xf32>
      %41 = vector.broadcast %38 : vector<2x8x1xf32> to vector<2x8x128xf32>
      %42 = arith.mulf %41, %40 : vector<2x8x128xf32>
      %cst_33 = arith.constant dense<0.000000e+00> : vector<2x128xf32>
      %43 = vector.multi_reduction <add>, %42, %cst_33 [1] : vector<2x8x128xf32> to vector<2x128xf32>
      %44 = arith.truncf %arg22 : vector<2x128xf32> to vector<2x128xbf16>
      %45 = arith.truncf %43 : vector<2x128xf32> to vector<2x128xbf16>
      %46 = arith.truncf %arg21 : vector<2x128xf32> to vector<2x128xbf16>
      %c0_34 = arith.constant 0 : index
      %c0_35 = arith.constant 0 : index
      %c0_36 = arith.constant 0 : index
      %47 = vector.load %arg8[%c0_34, %c0_35, %c0_36] : memref<3x128x128xbf16, #tpu.memory_space<vmem>>, vector<1x128x128xbf16>
      %48 = vector.shape_cast %47 : vector<1x128x128xbf16> to vector<128x128xbf16>
      %cst_37 = arith.constant dense<0.000000e+00> : vector<2x128xf32>
      %49 = tpu.matmul %44, %48, %cst_37 {dimension_numbers = #tpu.dot_dimension_numbers<[1], [0], [0], [1], [0, 0, 1, 1], [], []>} : vector<2x128xbf16>, vector<128x128xbf16>, vector<2x128xf32> -> vector<2x128xf32>
      %c0_38 = arith.constant 0 : index
      %c0_39 = arith.constant 0 : index
      %c0_40 = arith.constant 0 : index
      %50 = vector.load %arg9[%c0_38, %c0_39, %c0_40] : memref<3x128x128xbf16, #tpu.memory_space<vmem>>, vector<1x128x128xbf16>
      %51 = vector.shape_cast %50 : vector<1x128x128xbf16> to vector<128x128xbf16>
      %cst_41 = arith.constant dense<0.000000e+00> : vector<2x128xf32>
      %52 = tpu.matmul %45, %51, %cst_41 {dimension_numbers = #tpu.dot_dimension_numbers<[1], [0], [0], [1], [0, 0, 1, 1], [], []>} : vector<2x128xbf16>, vector<128x128xbf16>, vector<2x128xf32> -> vector<2x128xf32>
      %53 = arith.addf %49, %52 : vector<2x128xf32>
      %54 = vector.extract_strided_slice %4 {offsets = [0, 0, 0], sizes = [1, 1, 128], strides = [1, 1, 1]} : vector<3x1x128xf32> to vector<1x1x128xf32>
      %55 = vector.shape_cast %54 : vector<1x1x128xf32> to vector<1x128xf32>
      %56 = vector.broadcast %55 : vector<1x128xf32> to vector<2x128xf32>
      %57 = arith.addf %53, %56 : vector<2x128xf32>
      %c0_42 = arith.constant 0 : index
      %c0_43 = arith.constant 0 : index
      %c0_44 = arith.constant 0 : index
      %58 = vector.load %arg11[%c0_42, %c0_43, %c0_44] : memref<3x128x128xbf16, #tpu.memory_space<vmem>>, vector<1x128x128xbf16>
      %59 = vector.shape_cast %58 : vector<1x128x128xbf16> to vector<128x128xbf16>
      %cst_45 = arith.constant dense<0.000000e+00> : vector<2x128xf32>
      %60 = tpu.matmul %46, %59, %cst_45 {dimension_numbers = #tpu.dot_dimension_numbers<[1], [0], [0], [1], [0, 0, 1, 1], [], []>} : vector<2x128xbf16>, vector<128x128xbf16>, vector<2x128xf32> -> vector<2x128xf32>
      %61 = vector.extract_strided_slice %5 {offsets = [0, 0, 0], sizes = [1, 1, 128], strides = [1, 1, 1]} : vector<3x1x128xf32> to vector<1x1x128xf32>
      %62 = vector.shape_cast %61 : vector<1x1x128xf32> to vector<1x128xf32>
      %63 = vector.broadcast %62 : vector<1x128xf32> to vector<2x128xf32>
      %64 = arith.addf %60, %63 : vector<2x128xf32>
      %c1 = arith.constant 1 : index
      %c0_46 = arith.constant 0 : index
      %c0_47 = arith.constant 0 : index
      %65 = vector.load %arg8[%c1, %c0_46, %c0_47] : memref<3x128x128xbf16, #tpu.memory_space<vmem>>, vector<1x128x128xbf16>
      %66 = vector.shape_cast %65 : vector<1x128x128xbf16> to vector<128x128xbf16>
      %cst_48 = arith.constant dense<0.000000e+00> : vector<2x128xf32>
      %67 = tpu.matmul %44, %66, %cst_48 {dimension_numbers = #tpu.dot_dimension_numbers<[1], [0], [0], [1], [0, 0, 1, 1], [], []>} : vector<2x128xbf16>, vector<128x128xbf16>, vector<2x128xf32> -> vector<2x128xf32>
      %c1_49 = arith.constant 1 : index
      %c0_50 = arith.constant 0 : index
      %c0_51 = arith.constant 0 : index
      %68 = vector.load %arg9[%c1_49, %c0_50, %c0_51] : memref<3x128x128xbf16, #tpu.memory_space<vmem>>, vector<1x128x128xbf16>
      %69 = vector.shape_cast %68 : vector<1x128x128xbf16> to vector<128x128xbf16>
      %cst_52 = arith.constant dense<0.000000e+00> : vector<2x128xf32>
      %70 = tpu.matmul %45, %69, %cst_52 {dimension_numbers = #tpu.dot_dimension_numbers<[1], [0], [0], [1], [0, 0, 1, 1], [], []>} : vector<2x128xbf16>, vector<128x128xbf16>, vector<2x128xf32> -> vector<2x128xf32>
      %71 = arith.addf %67, %70 : vector<2x128xf32>
      %72 = vector.extract_strided_slice %4 {offsets = [1, 0, 0], sizes = [1, 1, 128], strides = [1, 1, 1]} : vector<3x1x128xf32> to vector<1x1x128xf32>
      %73 = vector.shape_cast %72 : vector<1x1x128xf32> to vector<1x128xf32>
      %74 = vector.broadcast %73 : vector<1x128xf32> to vector<2x128xf32>
      %75 = arith.addf %71, %74 : vector<2x128xf32>
      %c1_53 = arith.constant 1 : index
      %c0_54 = arith.constant 0 : index
      %c0_55 = arith.constant 0 : index
      %76 = vector.load %arg11[%c1_53, %c0_54, %c0_55] : memref<3x128x128xbf16, #tpu.memory_space<vmem>>, vector<1x128x128xbf16>
      %77 = vector.shape_cast %76 : vector<1x128x128xbf16> to vector<128x128xbf16>
      %cst_56 = arith.constant dense<0.000000e+00> : vector<2x128xf32>
      %78 = tpu.matmul %46, %77, %cst_56 {dimension_numbers = #tpu.dot_dimension_numbers<[1], [0], [0], [1], [0, 0, 1, 1], [], []>} : vector<2x128xbf16>, vector<128x128xbf16>, vector<2x128xf32> -> vector<2x128xf32>
      %79 = vector.extract_strided_slice %5 {offsets = [1, 0, 0], sizes = [1, 1, 128], strides = [1, 1, 1]} : vector<3x1x128xf32> to vector<1x1x128xf32>
      %80 = vector.shape_cast %79 : vector<1x1x128xf32> to vector<1x128xf32>
      %81 = vector.broadcast %80 : vector<1x128xf32> to vector<2x128xf32>
      %82 = arith.addf %78, %81 : vector<2x128xf32>
      %c2 = arith.constant 2 : index
      %c0_57 = arith.constant 0 : index
      %c0_58 = arith.constant 0 : index
      %83 = vector.load %arg8[%c2, %c0_57, %c0_58] : memref<3x128x128xbf16, #tpu.memory_space<vmem>>, vector<1x128x128xbf16>
      %84 = vector.shape_cast %83 : vector<1x128x128xbf16> to vector<128x128xbf16>
      %cst_59 = arith.constant dense<0.000000e+00> : vector<2x128xf32>
      %85 = tpu.matmul %44, %84, %cst_59 {dimension_numbers = #tpu.dot_dimension_numbers<[1], [0], [0], [1], [0, 0, 1, 1], [], []>} : vector<2x128xbf16>, vector<128x128xbf16>, vector<2x128xf32> -> vector<2x128xf32>
      %c2_60 = arith.constant 2 : index
      %c0_61 = arith.constant 0 : index
      %c0_62 = arith.constant 0 : index
      %86 = vector.load %arg9[%c2_60, %c0_61, %c0_62] : memref<3x128x128xbf16, #tpu.memory_space<vmem>>, vector<1x128x128xbf16>
      %87 = vector.shape_cast %86 : vector<1x128x128xbf16> to vector<128x128xbf16>
      %cst_63 = arith.constant dense<0.000000e+00> : vector<2x128xf32>
      %88 = tpu.matmul %45, %87, %cst_63 {dimension_numbers = #tpu.dot_dimension_numbers<[1], [0], [0], [1], [0, 0, 1, 1], [], []>} : vector<2x128xbf16>, vector<128x128xbf16>, vector<2x128xf32> -> vector<2x128xf32>
      %89 = arith.addf %85, %88 : vector<2x128xf32>
      %90 = vector.extract_strided_slice %4 {offsets = [2, 0, 0], sizes = [1, 1, 128], strides = [1, 1, 1]} : vector<3x1x128xf32> to vector<1x1x128xf32>
      %91 = vector.shape_cast %90 : vector<1x1x128xf32> to vector<1x128xf32>
      %92 = vector.broadcast %91 : vector<1x128xf32> to vector<2x128xf32>
      %93 = arith.addf %89, %92 : vector<2x128xf32>
      %c2_64 = arith.constant 2 : index
      %c0_65 = arith.constant 0 : index
      %c0_66 = arith.constant 0 : index
      %94 = vector.load %arg11[%c2_64, %c0_65, %c0_66] : memref<3x128x128xbf16, #tpu.memory_space<vmem>>, vector<1x128x128xbf16>
      %95 = vector.shape_cast %94 : vector<1x128x128xbf16> to vector<128x128xbf16>
      %cst_67 = arith.constant dense<0.000000e+00> : vector<2x128xf32>
      %96 = tpu.matmul %46, %95, %cst_67 {dimension_numbers = #tpu.dot_dimension_numbers<[1], [0], [0], [1], [0, 0, 1, 1], [], []>} : vector<2x128xbf16>, vector<128x128xbf16>, vector<2x128xf32> -> vector<2x128xf32>
      %97 = vector.extract_strided_slice %5 {offsets = [2, 0, 0], sizes = [1, 1, 128], strides = [1, 1, 1]} : vector<3x1x128xf32> to vector<1x1x128xf32>
      %98 = vector.shape_cast %97 : vector<1x1x128xf32> to vector<1x128xf32>
      %99 = vector.broadcast %98 : vector<1x128xf32> to vector<2x128xf32>
      %100 = arith.addf %96, %99 : vector<2x128xf32>
      %101 = arith.addf %57, %64 : vector<2x128xf32>
      %102 = arith.negf %101 : vector<2x128xf32>
      %103 = math.exp %102 : vector<2x128xf32>
      %cst_68 = arith.constant 1.000000e+00 : f32
      %104 = vector.broadcast %cst_68 : f32 to vector<2x128xf32>
      %105 = arith.addf %104, %103 : vector<2x128xf32>
      %106 = arith.divf %104, %105 : vector<2x128xf32>
      %107 = arith.addf %75, %82 : vector<2x128xf32>
      %108 = arith.negf %107 : vector<2x128xf32>
      %109 = math.exp %108 : vector<2x128xf32>
      %cst_69 = arith.constant 1.000000e+00 : f32
      %110 = vector.broadcast %cst_69 : f32 to vector<2x128xf32>
      %111 = arith.addf %110, %109 : vector<2x128xf32>
      %112 = arith.divf %110, %111 : vector<2x128xf32>
      %113 = arith.mulf %106, %100 : vector<2x128xf32>
      %114 = arith.addf %93, %113 : vector<2x128xf32>
      %115 = math.tanh %114 : vector<2x128xf32>
      %cst_70 = arith.constant 1.000000e+00 : f32
      %116 = vector.broadcast %cst_70 : f32 to vector<2x128xf32>
      %117 = arith.subf %116, %112 : vector<2x128xf32>
      %118 = arith.mulf %117, %115 : vector<2x128xf32>
      %119 = arith.mulf %112, %arg21 : vector<2x128xf32>
      %120 = arith.addf %118, %119 : vector<2x128xf32>
      %121 = arith.truncf %120 : vector<2x128xf32> to vector<2x128xbf16>
      %c0_71 = arith.constant 0 : index
      %c0_72 = arith.constant 0 : index
      %122 = vector.load %arg13[%c0_71, %c0_72] : memref<128x128xbf16, #tpu.memory_space<vmem>>, vector<128x128xbf16>
      %cst_73 = arith.constant dense<0.000000e+00> : vector<2x128xf32>
      %123 = tpu.matmul %121, %122, %cst_73 {dimension_numbers = #tpu.dot_dimension_numbers<[1], [0], [0], [1], [0, 0, 1, 1], [], []>} : vector<2x128xbf16>, vector<128x128xbf16>, vector<2x128xf32> -> vector<2x128xf32>
      %124 = vector.broadcast %6 : vector<1x128xf32> to vector<2x128xf32>
      %125 = arith.addf %123, %124 : vector<2x128xf32>
      %cst_74 = arith.constant dense<0xFF800000> : vector<2xf32>
      %126 = vector.multi_reduction <maximumf>, %125, %cst_74 [1] : vector<2x128xf32> to vector<2xf32>
      %127 = vector.shape_cast %126 : vector<2xf32> to vector<2x1xf32>
      %128 = vector.broadcast %127 : vector<2x1xf32> to vector<2x128xf32>
      %129 = arith.subf %125, %128 : vector<2x128xf32>
      %130 = math.exp %129 : vector<2x128xf32>
      %cst_75 = arith.constant dense<0.000000e+00> : vector<2xf32>
      %131 = vector.multi_reduction <add>, %130, %cst_75 [1] : vector<2x128xf32> to vector<2xf32>
      %132 = vector.shape_cast %131 : vector<2xf32> to vector<2x1xf32>
      %133 = math.log %132 : vector<2x1xf32>
      %134 = arith.addf %133, %127 : vector<2x1xf32>
      %135 = vector.broadcast %134 : vector<2x1xf32> to vector<2x128xf32>
      %136 = arith.subf %125, %135 : vector<2x128xf32>
      %137 = arith.index_cast %arg20 : i32 to index
      %c0_76 = arith.constant 0 : index
      %c0_77 = arith.constant 0 : index
      %138 = vector.load %arg15[%137, %c0_76, %c0_77] : memref<2x2x128xf32, #tpu.memory_space<vmem>>, vector<1x2x128xf32>
      %139 = vector.shape_cast %138 : vector<1x2x128xf32> to vector<2x128xf32>
      %140 = vector.shape_cast %136 : vector<2x128xf32> to vector<1x2x128xf32>
      tpu.vector_store %arg15[%137, %c0_76, %c0_77], %140 {strides = array<i32>} : memref<2x2x128xf32, #tpu.memory_space<vmem>>, vector<1x2x128xf32>,
      %141 = tpu.iota {dimensions = array<i32: 1>} : vector<2x128xi32>
      %142 = arith.subf %127, %134 : vector<2x1xf32>
      %143 = vector.broadcast %142 : vector<2x1xf32> to vector<2x128xf32>
      %144 = arith.cmpf oeq, %136, %143 : vector<2x128xf32>
      %c128_i32 = arith.constant 128 : i32
      %145 = vector.broadcast %c128_i32 : i32 to vector<2x128xi32>
      %146 = arith.select %144, %141, %145 : vector<2x128xi1>, vector<2x128xi32>
      %cst_78 = arith.constant dense<2147483647> : vector<2xi32>
      %147 = vector.multi_reduction <minsi>, %146, %cst_78 [1] : vector<2x128xi32> to vector<2xi32>
      %148 = vector.shape_cast %147 : vector<2xi32> to vector<2x1xi32>
      %149 = vector.broadcast %148 : vector<2x1xi32> to vector<2x128xi32>
      %150 = arith.cmpi eq, %141, %149 : vector<2x128xi32>
      %151 = arith.extui %150 : vector<2x128xi1> to vector<2x128xi32>
      %152 = arith.sitofp %151 : vector<2x128xi32> to vector<2x128xf32>
      %153 = arith.truncf %152 : vector<2x128xf32> to vector<2x128xbf16>
      %c0_79 = arith.constant 0 : index
      %c0_80 = arith.constant 0 : index
      %154 = vector.load %arg3[%c0_79, %c0_80] : memref<128x128xbf16, #tpu.memory_space<vmem>>, vector<128x128xbf16>
      %cst_81 = arith.constant dense<0.000000e+00> : vector<2x128xf32>
      %155 = tpu.matmul %153, %154, %cst_81 {dimension_numbers = #tpu.dot_dimension_numbers<[1], [0], [0], [1], [0, 0, 1, 1], [], []>} : vector<2x128xbf16>, vector<128x128xbf16>, vector<2x128xf32> -> vector<2x128xf32>
      scf.yield %120, %155 : vector<2x128xf32>, vector<2x128xf32>
    }
    %c2_i32_15 = arith.constant 2 : i32
    %c0_16 = arith.constant 0 : index
    %c0_17 = arith.constant 0 : index
    %11 = vector.load %arg18[%c0_16, %c0_17] : memref<2x128xf32, #tpu.memory_space<vmem>>, vector<2x128xf32>
    tpu.vector_store %arg18[%c0_16, %c0_17], %10#0 {strides = array<i32>} : memref<2x128xf32, #tpu.memory_space<vmem>>, vector<2x128xf32>,
    %c0_18 = arith.constant 0 : index
    %c0_19 = arith.constant 0 : index
    %12 = vector.load %arg19[%c0_18, %c0_19] : memref<2x128xf32, #tpu.memory_space<vmem>>, vector<2x128xf32>
    tpu.vector_store %arg19[%c0_18, %c0_19], %10#1 {strides = array<i32>} : memref<2x128xf32, #tpu.memory_space<vmem>>, vector<2x128xf32>,
    %c0_20 = arith.constant 0 : index
    %c0_21 = arith.constant 0 : index
    %13 = vector.load %arg16[%c0_20, %c0_21] : memref<2x128xf32, #tpu.memory_space<vmem>>, vector<2x128xf32>
    tpu.vector_store %arg16[%c0_20, %c0_21], %10#0 {strides = array<i32>} : memref<2x128xf32, #tpu.memory_space<vmem>>, vector<2x128xf32>,
    return
  }
  func.func @transform_0(%arg0: i32, %arg1: i32) -> (i32, i32, i32) {
    %c0_i32 = arith.constant 0 : i32
    %c0_i32_0 = arith.constant 0 : i32
    %c0_i32_1 = arith.constant 0 : i32
    return %arg0, %c0_i32, %c0_i32_0 : i32, i32, i32
  }
  func.func @transform_1(%arg0: i32, %arg1: i32) -> (i32, i32) {
    %c0_i32 = arith.constant 0 : i32
    %c0_i32_0 = arith.constant 0 : i32
    %c0_i32_1 = arith.constant 0 : i32
    return %c0_i32, %c0_i32_0 : i32, i32
  }
  func.func @transform_2(%arg0: i32, %arg1: i32) -> (i32, i32) {
    %c0_i32 = arith.constant 0 : i32
    %c0_i32_0 = arith.constant 0 : i32
    %c0_i32_1 = arith.constant 0 : i32
    return %c0_i32, %c0_i32_0 : i32, i32
  }
  func.func @transform_3(%arg0: i32, %arg1: i32) -> (i32, i32) {
    %c0_i32 = arith.constant 0 : i32
    %c0_i32_0 = arith.constant 0 : i32
    %c0_i32_1 = arith.constant 0 : i32
    return %c0_i32, %c0_i32_0 : i32, i32
  }
  func.func @transform_4(%arg0: i32, %arg1: i32) -> (i32, i32) {
    %c0_i32 = arith.constant 0 : i32
    %c0_i32_0 = arith.constant 0 : i32
    %c0_i32_1 = arith.constant 0 : i32
    return %c0_i32, %c0_i32_0 : i32, i32
  }
  func.func @transform_5(%arg0: i32, %arg1: i32) -> (i32, i32) {
    %c0_i32 = arith.constant 0 : i32
    %c0_i32_0 = arith.constant 0 : i32
    %c0_i32_1 = arith.constant 0 : i32
    return %c0_i32, %c0_i32_0 : i32, i32
  }
  func.func @transform_6(%arg0: i32, %arg1: i32) -> (i32, i32, i32) {
    %c0_i32 = arith.constant 0 : i32
    %c0_i32_0 = arith.constant 0 : i32
    %c0_i32_1 = arith.constant 0 : i32
    %c0_i32_2 = arith.constant 0 : i32
    return %c0_i32, %c0_i32_0, %c0_i32_1 : i32, i32, i32
  }
  func.func @transform_7(%arg0: i32, %arg1: i32) -> (i32, i32, i32) {
    %c0_i32 = arith.constant 0 : i32
    %c0_i32_0 = arith.constant 0 : i32
    %c0_i32_1 = arith.constant 0 : i32
    %c0_i32_2 = arith.constant 0 : i32
    return %c0_i32, %c0_i32_0, %c0_i32_1 : i32, i32, i32
  }
  func.func @transform_8(%arg0: i32, %arg1: i32) -> (i32, i32, i32) {
    %c0_i32 = arith.constant 0 : i32
    %c0_i32_0 = arith.constant 0 : i32
    %c0_i32_1 = arith.constant 0 : i32
    %c0_i32_2 = arith.constant 0 : i32
    return %c0_i32, %c0_i32_0, %c0_i32_1 : i32, i32, i32
  }
  func.func @transform_9(%arg0: i32, %arg1: i32) -> (i32, i32, i32) {
    %c0_i32 = arith.constant 0 : i32
    %c0_i32_0 = arith.constant 0 : i32
    %c0_i32_1 = arith.constant 0 : i32
    %c0_i32_2 = arith.constant 0 : i32
    return %c0_i32, %c0_i32_0, %c0_i32_1 : i32, i32, i32
  }
  func.func @transform_10(%arg0: i32, %arg1: i32) -> (i32, i32, i32) {
    %c0_i32 = arith.constant 0 : i32
    %c0_i32_0 = arith.constant 0 : i32
    %c0_i32_1 = arith.constant 0 : i32
    %c0_i32_2 = arith.constant 0 : i32
    return %c0_i32, %c0_i32_0, %c0_i32_1 : i32, i32, i32
  }
  func.func @transform_11(%arg0: i32, %arg1: i32) -> (i32, i32) {
    %c0_i32 = arith.constant 0 : i32
    %c0_i32_0 = arith.constant 0 : i32
    %c0_i32_1 = arith.constant 0 : i32
    return %c0_i32, %c0_i32_0 : i32, i32
  }
  func.func @transform_12(%arg0: i32, %arg1: i32) -> (i32, i32) {
    %c0_i32 = arith.constant 0 : i32
    %c0_i32_0 = arith.constant 0 : i32
    %c0_i32_1 = arith.constant 0 : i32
    return %c0_i32, %c0_i32_0 : i32, i32
  }
  func.func @transform_13(%arg0: i32, %arg1: i32) -> (i32, i32, i32) {
    %c0_i32 = arith.constant 0 : i32
    %c0_i32_0 = arith.constant 0 : i32
    return %arg1, %arg0, %c0_i32 : i32, i32, i32
  }
  func.func @transform_14(%arg0: i32, %arg1: i32) -> (i32, i32) {
    %c0_i32 = arith.constant 0 : i32
    %c0_i32_0 = arith.constant 0 : i32
    return %arg0, %c0_i32 : i32, i32
  }
}

module attributes {stable_mosaic.version = 11 : i64} {
  func.func @_decoder_kernel(%arg0: i32, %arg1: i32, %arg2: memref<2x8x128xbf16, #tpu.memory_space<vmem>>, %arg3: memref<128x128xbf16, #tpu.memory_space<vmem>>, %arg4: memref<128x128xbf16, #tpu.memory_space<vmem>>, %arg5: memref<128x128xbf16, #tpu.memory_space<vmem>>, %arg6: memref<1x128xf32, #tpu.memory_space<vmem>>, %arg7: memref<1x128xf32, #tpu.memory_space<vmem>>, %arg8: memref<3x128x128xbf16, #tpu.memory_space<vmem>>, %arg9: memref<3x128x128xbf16, #tpu.memory_space<vmem>>, %arg10: memref<3x1x128xf32, #tpu.memory_space<vmem>>, %arg11: memref<3x128x128xbf16, #tpu.memory_space<vmem>>, %arg12: memref<3x1x128xf32, #tpu.memory_space<vmem>>, %arg13: memref<128x128xbf16, #tpu.memory_space<vmem>>, %arg14: memref<1x128xf32, #tpu.memory_space<vmem>>, %arg15: memref<2x2x128xf32, #tpu.memory_space<vmem>>, %arg16: memref<2x128xf32, #tpu.memory_space<vmem>>, %arg17: memref<2x8x128xbf16, #tpu.memory_space<vmem>>, %arg18: memref<2x128xf32, #tpu.memory_space<vmem>>, %arg19: memref<2x128xf32, #tpu.memory_space<vmem>>) attributes {dimension_semantics = [#tpu.dimension_semantics<parallel>, #tpu.dimension_semantics<arbitrary>], iteration_bounds = array<i64: 1, 3>, scalar_prefetch = 0 : i64, scratch_operands = 3 : i64, tpu.core_type = #tpu.core_type<tc>, window_params = [{transform_indices = @transform_0, window_bounds = array<i64: 2, 8, 128>}, {pipeline_mode = #tpu.pipeline_mode<synchronous>, transform_indices = @transform_1, window_bounds = array<i64: 128, 128>}, {pipeline_mode = #tpu.pipeline_mode<synchronous>, transform_indices = @transform_2, window_bounds = array<i64: 128, 128>}, {pipeline_mode = #tpu.pipeline_mode<synchronous>, transform_indices = @transform_3, window_bounds = array<i64: 128, 128>}, {pipeline_mode = #tpu.pipeline_mode<synchronous>, transform_indices = @transform_4, window_bounds = array<i64: 1, 128>}, {pipeline_mode = #tpu.pipeline_mode<synchronous>, transform_indices = @transform_5, window_bounds = array<i64: 1, 128>}, {pipeline_mode = #tpu.pipeline_mode<synchronous>, transform_indices = @transform_6, window_bounds = array<i64: 3, 128, 128>}, {pipeline_mode = #tpu.pipeline_mode<synchronous>, transform_indices = @transform_7, window_bounds = array<i64: 3, 128, 128>}, {pipeline_mode = #tpu.pipeline_mode<synchronous>, transform_indices = @transform_8, window_bounds = array<i64: 3, 1, 128>}, {pipeline_mode = #tpu.pipeline_mode<synchronous>, transform_indices = @transform_9, window_bounds = array<i64: 3, 128, 128>}, {pipeline_mode = #tpu.pipeline_mode<synchronous>, transform_indices = @transform_10, window_bounds = array<i64: 3, 1, 128>}, {pipeline_mode = #tpu.pipeline_mode<synchronous>, transform_indices = @transform_11, window_bounds = array<i64: 128, 128>}, {pipeline_mode = #tpu.pipeline_mode<synchronous>, transform_indices = @transform_12, window_bounds = array<i64: 1, 128>}, {transform_indices = @transform_13, window_bounds = array<i64: 2, 2, 128>}, {transform_indices = @transform_14, window_bounds = array<i64: 2, 128>}]} {
    %c0_i32 = arith.constant 0 : i32
    %0 = arith.cmpi eq, %arg1, %c0_i32 : i32
    %1 = arith.extui %0 : i1 to i32
    %c0_i32_0 = arith.constant 0 : i32
    %2 = arith.cmpi ne, %1, %c0_i32_0 : i32
    scf.if %2 {
      %c0_22 = arith.constant 0 : index
      %c0_23 = arith.constant 0 : index
      %c0_24 = arith.constant 0 : index
      %14 = vector.load %arg2[%c0_22, %c0_23, %c0_24] : memref<2x8x128xbf16, #tpu.memory_space<vmem>>, vector<2x8x128xbf16>
      %15 = vector.shape_cast %14 : vector<2x8x128xbf16> to vector<16x128xbf16>
      %c0_25 = arith.constant 0 : index
      %c0_26 = arith.constant 0 : index
      %16 = vector.load %arg5[%c0_25, %c0_26] : memref<128x128xbf16, #tpu.memory_space<vmem>>, vector<128x128xbf16>
      %cst = arith.constant dense<0.000000e+00> : vector<16x128xf32>
      %17 = tpu.matmul %15, %16, %cst {dimension_numbers = #tpu.dot_dimension_numbers<[1], [0], [0], [1], [0, 0, 1, 1], [], []>} : vector<16x128xbf16>, vector<128x128xbf16>, vector<16x128xf32> -> vector<16x128xf32>
      %18 = vector.shape_cast %17 : vector<16x128xf32> to vector<2x8x128xf32>
      %c0_27 = arith.constant 0 : index
      %c0_28 = arith.constant 0 : index
      %19 = vector.load %arg6[%c0_27, %c0_28] : memref<1x128xf32, #tpu.memory_space<vmem>>, vector<1x128xf32>
      %20 = vector.shape_cast %19 : vector<1x128xf32> to vector<1x1x128xf32>
      %21 = vector.broadcast %20 : vector<1x1x128xf32> to vector<2x8x128xf32>
      %22 = arith.addf %18, %21 : vector<2x8x128xf32>
      %23 = arith.truncf %22 : vector<2x8x128xf32> to vector<2x8x128xbf16>
      %c0_29 = arith.constant 0 : index
      %c0_30 = arith.constant 0 : index
      %c0_31 = arith.constant 0 : index
      %24 = vector.load %arg17[%c0_29, %c0_30, %c0_31] : memref<2x8x128xbf16, #tpu.memory_space<vmem>>, vector<2x8x128xbf16>
      tpu.vector_store %arg17[%c0_29, %c0_30, %c0_31], %23 {strides = array<i32>} : memref<2x8x128xbf16, #tpu.memory_space<vmem>>, vector<2x8x128xbf16>,
      %cst_32 = arith.constant 0.000000e+00 : f32
      %25 = vector.broadcast %cst_32 : f32 to vector<2x128xf32>
      %c0_33 = arith.constant 0 : index
      %c0_34 = arith.constant 0 : index
      %26 = vector.load %arg18[%c0_33, %c0_34] : memref<2x128xf32, #tpu.memory_space<vmem>>, vector<2x128xf32>
      tpu.vector_store %arg18[%c0_33, %c0_34], %25 {strides = array<i32>} : memref<2x128xf32, #tpu.memory_space<vmem>>, vector<2x128xf32>,
      %c1 = arith.constant 1 : index
      %c0_35 = arith.constant 0 : index
      %27 = vector.load %arg3[%c1, %c0_35] : memref<128x128xbf16, #tpu.memory_space<vmem>>, vector<1x128xbf16>
      %28 = arith.extf %27 : vector<1x128xbf16> to vector<1x128xf32>
      %29 = vector.shape_cast %28 : vector<1x128xf32> to vector<1x128xf32>
      %30 = vector.broadcast %29 : vector<1x128xf32> to vector<2x128xf32>
      %c0_36 = arith.constant 0 : index
      %c0_37 = arith.constant 0 : index
      %31 = vector.load %arg19[%c0_36, %c0_37] : memref<2x128xf32, #tpu.memory_space<vmem>>, vector<2x128xf32>
      tpu.vector_store %arg19[%c0_36, %c0_37], %30 {strides = array<i32>} : memref<2x128xf32, #tpu.memory_space<vmem>>, vector<2x128xf32>,
    } else {
    }
    %c0 = arith.constant 0 : index
    %c0_1 = arith.constant 0 : index
    %3 = vector.load %arg7[%c0, %c0_1] : memref<1x128xf32, #tpu.memory_space<vmem>>, vector<1x128xf32>
    %c0_2 = arith.constant 0 : index
    %c0_3 = arith.constant 0 : index
    %c0_4 = arith.constant 0 : index
    %4 = vector.load %arg10[%c0_2, %c0_3, %c0_4] : memref<3x1x128xf32, #tpu.memory_space<vmem>>, vector<3x1x128xf32>
    %c0_5 = arith.constant 0 : index
    %c0_6 = arith.constant 0 : index
    %c0_7 = arith.constant 0 : index
    %5 = vector.load %arg12[%c0_5, %c0_6, %c0_7] : memref<3x1x128xf32, #tpu.memory_space<vmem>>, vector<3x1x128xf32>
    %c0_8 = arith.constant 0 : index
    %c0_9 = arith.constant 0 : index
    %6 = vector.load %arg14[%c0_8, %c0_9] : memref<1x128xf32, #tpu.memory_space<vmem>>, vector<1x128xf32>
    %c0_10 = arith.constant 0 : index
    %c0_11 = arith.constant 0 : index
    %7 = vector.load %arg18[%c0_10, %c0_11] : memref<2x128xf32, #tpu.memory_space<vmem>>, vector<2x128xf32>
    %c0_12 = arith.constant 0 : index
    %c0_13 = arith.constant 0 : index
    %8 = vector.load %arg19[%c0_12, %c0_13] : memref<2x128xf32, #tpu.memory_space<vmem>>, vector<2x128xf32>
    %c0_i32_14 = arith.constant 0 : i32
    %c2_i32 = arith.constant 2 : i32
    %9 = arith.addi %c0_i32_14, %c2_i32 : i32
    %c1_i32 = arith.constant 1 : i32
    %10:2 = scf.for %arg20 = %c0_i32_14 to %9 step %c1_i32 iter_args(%arg21 = %7, %arg22 = %8) -> (vector<2x128xf32>, vector<2x128xf32>)  : i32 {
      %14 = arith.truncf %arg21 : vector<2x128xf32> to vector<2x128xbf16>
      %c0_22 = arith.constant 0 : index
      %c0_23 = arith.constant 0 : index
      %15 = vector.load %arg4[%c0_22, %c0_23] : memref<128x128xbf16, #tpu.memory_space<vmem>>, vector<128x128xbf16>
      %cst = arith.constant dense<0.000000e+00> : vector<2x128xf32>
      %16 = tpu.matmul %14, %15, %cst {dimension_numbers = #tpu.dot_dimension_numbers<[1], [0], [0], [1], [0, 0, 1, 1], [], []>} : vector<2x128xbf16>, vector<128x128xbf16>, vector<2x128xf32> -> vector<2x128xf32>
      %c0_24 = arith.constant 0 : index
      %c0_25 = arith.constant 0 : index
      %c0_26 = arith.constant 0 : index
      %17 = vector.load %arg17[%c0_24, %c0_25, %c0_26] : memref<2x8x128xbf16, #tpu.memory_space<vmem>>, vector<2x8x128xbf16>
      %18 = arith.truncf %16 : vector<2x128xf32> to vector<2x128xbf16>
      %19 = vector.shape_cast %18 : vector<2x128xbf16> to vector<2x1x128xbf16>
      %20 = vector.broadcast %19 : vector<2x1x128xbf16> to vector<2x8x128xbf16>
      %21 = arith.addf %17, %20 : vector<2x8x128xbf16>
      %22 = math.tanh %21 : vector<2x8x128xbf16>
      %23 = arith.extf %22 : vector<2x8x128xbf16> to vector<2x8x128xf32>
      %24 = vector.shape_cast %3 : vector<1x128xf32> to vector<1x1x128xf32>
      %25 = vector.broadcast %24 : vector<1x1x128xf32> to vector<2x8x128xf32>
      %26 = arith.mulf %23, %25 : vector<2x8x128xf32>
      %cst_27 = arith.constant dense<0.000000e+00> : vector<2x8xf32>
      %27 = vector.multi_reduction <add>, %26, %cst_27 [2] : vector<2x8x128xf32> to vector<2x8xf32>
      %cst_28 = arith.constant dense<0xFF800000> : vector<2xf32>
      %28 = vector.multi_reduction <maximumf>, %27, %cst_28 [1] : vector<2x8xf32> to vector<2xf32>
      %29 = vector.shape_cast %28 : vector<2xf32> to vector<2x1xf32>
      %30 = vector.broadcast %29 : vector<2x1xf32> to vector<2x8xf32>
      %31 = arith.subf %27, %30 : vector<2x8xf32>
      %32 = math.exp %31 : vector<2x8xf32>
      %cst_29 = arith.constant dense<0.000000e+00> : vector<2xf32>
      %33 = vector.multi_reduction <add>, %32, %cst_29 [1] : vector<2x8xf32> to vector<2xf32>
      %34 = vector.shape_cast %33 : vector<2xf32> to vector<2x1xf32>
      %35 = tpu.reciprocal %34 {approx = true} : vector<2x1xf32> -> vector<2x1xf32>
      %36 = vector.broadcast %35 : vector<2x1xf32> to vector<2x8xf32>
      %37 = arith.mulf %32, %36 : vector<2x8xf32>
      %38 = vector.shape_cast %37 : vector<2x8xf32> to vector<2x8x1xf32>
      %c0_30 = arith.constant 0 : index
      %c0_31 = arith.constant 0 : index
      %c0_32 = arith.constant 0 : index
      %39 = vector.load %arg2[%c0_30, %c0_31, %c0_32] : memref<2x8x128xbf16, #tpu.memory_space<vmem>>, vector<2x8x128xbf16>
      %40 = arith.extf %39 : vector<2x8x128xbf16> to vector<2x8x128xf32>
      %41 = vector.broadcast %38 : vector<2x8x1xf32> to vector<2x8x128xf32>
      %42 = arith.mulf %41, %40 : vector<2x8x128xf32>
      %cst_33 = arith.constant dense<0.000000e+00> : vector<2x128xf32>
      %43 = vector.multi_reduction <add>, %42, %cst_33 [1] : vector<2x8x128xf32> to vector<2x128xf32>
      %44 = arith.truncf %arg22 : vector<2x128xf32> to vector<2x128xbf16>
      %45 = arith.truncf %43 : vector<2x128xf32> to vector<2x128xbf16>
      %46 = arith.truncf %arg21 : vector<2x128xf32> to vector<2x128xbf16>
      %c0_34 = arith.constant 0 : index
      %c0_35 = arith.constant 0 : index
      %c0_36 = arith.constant 0 : index
      %47 = vector.load %arg8[%c0_34, %c0_35, %c0_36] : memref<3x128x128xbf16, #tpu.memory_space<vmem>>, vector<1x128x128xbf16>
      %48 = vector.shape_cast %47 : vector<1x128x128xbf16> to vector<128x128xbf16>
      %cst_37 = arith.constant dense<0.000000e+00> : vector<2x128xf32>
      %49 = tpu.matmul %44, %48, %cst_37 {dimension_numbers = #tpu.dot_dimension_numbers<[1], [0], [0], [1], [0, 0, 1, 1], [], []>} : vector<2x128xbf16>, vector<128x128xbf16>, vector<2x128xf32> -> vector<2x128xf32>
      %c0_38 = arith.constant 0 : index
      %c0_39 = arith.constant 0 : index
      %c0_40 = arith.constant 0 : index
      %50 = vector.load %arg9[%c0_38, %c0_39, %c0_40] : memref<3x128x128xbf16, #tpu.memory_space<vmem>>, vector<1x128x128xbf16>
      %51 = vector.shape_cast %50 : vector<1x128x128xbf16> to vector<128x128xbf16>
      %cst_41 = arith.constant dense<0.000000e+00> : vector<2x128xf32>
      %52 = tpu.matmul %45, %51, %cst_41 {dimension_numbers = #tpu.dot_dimension_numbers<[1], [0], [0], [1], [0, 0, 1, 1], [], []>} : vector<2x128xbf16>, vector<128x128xbf16>, vector<2x128xf32> -> vector<2x128xf32>
      %53 = arith.addf %49, %52 : vector<2x128xf32>
      %54 = vector.extract_strided_slice %4 {offsets = [0, 0, 0], sizes = [1, 1, 128], strides = [1, 1, 1]} : vector<3x1x128xf32> to vector<1x1x128xf32>
      %55 = vector.shape_cast %54 : vector<1x1x128xf32> to vector<1x128xf32>
      %56 = vector.broadcast %55 : vector<1x128xf32> to vector<2x128xf32>
      %57 = arith.addf %53, %56 : vector<2x128xf32>
      %c0_42 = arith.constant 0 : index
      %c0_43 = arith.constant 0 : index
      %c0_44 = arith.constant 0 : index
      %58 = vector.load %arg11[%c0_42, %c0_43, %c0_44] : memref<3x128x128xbf16, #tpu.memory_space<vmem>>, vector<1x128x128xbf16>
      %59 = vector.shape_cast %58 : vector<1x128x128xbf16> to vector<128x128xbf16>
      %cst_45 = arith.constant dense<0.000000e+00> : vector<2x128xf32>
      %60 = tpu.matmul %46, %59, %cst_45 {dimension_numbers = #tpu.dot_dimension_numbers<[1], [0], [0], [1], [0, 0, 1, 1], [], []>} : vector<2x128xbf16>, vector<128x128xbf16>, vector<2x128xf32> -> vector<2x128xf32>
      %61 = vector.extract_strided_slice %5 {offsets = [0, 0, 0], sizes = [1, 1, 128], strides = [1, 1, 1]} : vector<3x1x128xf32> to vector<1x1x128xf32>
      %62 = vector.shape_cast %61 : vector<1x1x128xf32> to vector<1x128xf32>
      %63 = vector.broadcast %62 : vector<1x128xf32> to vector<2x128xf32>
      %64 = arith.addf %60, %63 : vector<2x128xf32>
      %c1 = arith.constant 1 : index
      %c0_46 = arith.constant 0 : index
      %c0_47 = arith.constant 0 : index
      %65 = vector.load %arg8[%c1, %c0_46, %c0_47] : memref<3x128x128xbf16, #tpu.memory_space<vmem>>, vector<1x128x128xbf16>
      %66 = vector.shape_cast %65 : vector<1x128x128xbf16> to vector<128x128xbf16>
      %cst_48 = arith.constant dense<0.000000e+00> : vector<2x128xf32>
      %67 = tpu.matmul %44, %66, %cst_48 {dimension_numbers = #tpu.dot_dimension_numbers<[1], [0], [0], [1], [0, 0, 1, 1], [], []>} : vector<2x128xbf16>, vector<128x128xbf16>, vector<2x128xf32> -> vector<2x128xf32>
      %c1_49 = arith.constant 1 : index
      %c0_50 = arith.constant 0 : index
      %c0_51 = arith.constant 0 : index
      %68 = vector.load %arg9[%c1_49, %c0_50, %c0_51] : memref<3x128x128xbf16, #tpu.memory_space<vmem>>, vector<1x128x128xbf16>
      %69 = vector.shape_cast %68 : vector<1x128x128xbf16> to vector<128x128xbf16>
      %cst_52 = arith.constant dense<0.000000e+00> : vector<2x128xf32>
      %70 = tpu.matmul %45, %69, %cst_52 {dimension_numbers = #tpu.dot_dimension_numbers<[1], [0], [0], [1], [0, 0, 1, 1], [], []>} : vector<2x128xbf16>, vector<128x128xbf16>, vector<2x128xf32> -> vector<2x128xf32>
      %71 = arith.addf %67, %70 : vector<2x128xf32>
      %72 = vector.extract_strided_slice %4 {offsets = [1, 0, 0], sizes = [1, 1, 128], strides = [1, 1, 1]} : vector<3x1x128xf32> to vector<1x1x128xf32>
      %73 = vector.shape_cast %72 : vector<1x1x128xf32> to vector<1x128xf32>
      %74 = vector.broadcast %73 : vector<1x128xf32> to vector<2x128xf32>
      %75 = arith.addf %71, %74 : vector<2x128xf32>
      %c1_53 = arith.constant 1 : index
      %c0_54 = arith.constant 0 : index
      %c0_55 = arith.constant 0 : index
      %76 = vector.load %arg11[%c1_53, %c0_54, %c0_55] : memref<3x128x128xbf16, #tpu.memory_space<vmem>>, vector<1x128x128xbf16>
      %77 = vector.shape_cast %76 : vector<1x128x128xbf16> to vector<128x128xbf16>
      %cst_56 = arith.constant dense<0.000000e+00> : vector<2x128xf32>
      %78 = tpu.matmul %46, %77, %cst_56 {dimension_numbers = #tpu.dot_dimension_numbers<[1], [0], [0], [1], [0, 0, 1, 1], [], []>} : vector<2x128xbf16>, vector<128x128xbf16>, vector<2x128xf32> -> vector<2x128xf32>
      %79 = vector.extract_strided_slice %5 {offsets = [1, 0, 0], sizes = [1, 1, 128], strides = [1, 1, 1]} : vector<3x1x128xf32> to vector<1x1x128xf32>
      %80 = vector.shape_cast %79 : vector<1x1x128xf32> to vector<1x128xf32>
      %81 = vector.broadcast %80 : vector<1x128xf32> to vector<2x128xf32>
      %82 = arith.addf %78, %81 : vector<2x128xf32>
      %c2 = arith.constant 2 : index
      %c0_57 = arith.constant 0 : index
      %c0_58 = arith.constant 0 : index
      %83 = vector.load %arg8[%c2, %c0_57, %c0_58] : memref<3x128x128xbf16, #tpu.memory_space<vmem>>, vector<1x128x128xbf16>
      %84 = vector.shape_cast %83 : vector<1x128x128xbf16> to vector<128x128xbf16>
      %cst_59 = arith.constant dense<0.000000e+00> : vector<2x128xf32>
      %85 = tpu.matmul %44, %84, %cst_59 {dimension_numbers = #tpu.dot_dimension_numbers<[1], [0], [0], [1], [0, 0, 1, 1], [], []>} : vector<2x128xbf16>, vector<128x128xbf16>, vector<2x128xf32> -> vector<2x128xf32>
      %c2_60 = arith.constant 2 : index
      %c0_61 = arith.constant 0 : index
      %c0_62 = arith.constant 0 : index
      %86 = vector.load %arg9[%c2_60, %c0_61, %c0_62] : memref<3x128x128xbf16, #tpu.memory_space<vmem>>, vector<1x128x128xbf16>
      %87 = vector.shape_cast %86 : vector<1x128x128xbf16> to vector<128x128xbf16>
      %cst_63 = arith.constant dense<0.000000e+00> : vector<2x128xf32>
      %88 = tpu.matmul %45, %87, %cst_63 {dimension_numbers = #tpu.dot_dimension_numbers<[1], [0], [0], [1], [0, 0, 1, 1], [], []>} : vector<2x128xbf16>, vector<128x128xbf16>, vector<2x128xf32> -> vector<2x128xf32>
      %89 = arith.addf %85, %88 : vector<2x128xf32>
      %90 = vector.extract_strided_slice %4 {offsets = [2, 0, 0], sizes = [1, 1, 128], strides = [1, 1, 1]} : vector<3x1x128xf32> to vector<1x1x128xf32>
      %91 = vector.shape_cast %90 : vector<1x1x128xf32> to vector<1x128xf32>
      %92 = vector.broadcast %91 : vector<1x128xf32> to vector<2x128xf32>
      %93 = arith.addf %89, %92 : vector<2x128xf32>
      %c2_64 = arith.constant 2 : index
      %c0_65 = arith.constant 0 : index
      %c0_66 = arith.constant 0 : index
      %94 = vector.load %arg11[%c2_64, %c0_65, %c0_66] : memref<3x128x128xbf16, #tpu.memory_space<vmem>>, vector<1x128x128xbf16>
      %95 = vector.shape_cast %94 : vector<1x128x128xbf16> to vector<128x128xbf16>
      %cst_67 = arith.constant dense<0.000000e+00> : vector<2x128xf32>
      %96 = tpu.matmul %46, %95, %cst_67 {dimension_numbers = #tpu.dot_dimension_numbers<[1], [0], [0], [1], [0, 0, 1, 1], [], []>} : vector<2x128xbf16>, vector<128x128xbf16>, vector<2x128xf32> -> vector<2x128xf32>
      %97 = vector.extract_strided_slice %5 {offsets = [2, 0, 0], sizes = [1, 1, 128], strides = [1, 1, 1]} : vector<3x1x128xf32> to vector<1x1x128xf32>
      %98 = vector.shape_cast %97 : vector<1x1x128xf32> to vector<1x128xf32>
      %99 = vector.broadcast %98 : vector<1x128xf32> to vector<2x128xf32>
      %100 = arith.addf %96, %99 : vector<2x128xf32>
      %101 = arith.addf %57, %64 : vector<2x128xf32>
      %102 = arith.negf %101 : vector<2x128xf32>
      %103 = math.exp %102 : vector<2x128xf32>
      %cst_68 = arith.constant 1.000000e+00 : f32
      %104 = vector.broadcast %cst_68 : f32 to vector<2x128xf32>
      %105 = arith.addf %104, %103 : vector<2x128xf32>
      %106 = arith.divf %104, %105 : vector<2x128xf32>
      %107 = arith.addf %75, %82 : vector<2x128xf32>
      %108 = arith.negf %107 : vector<2x128xf32>
      %109 = math.exp %108 : vector<2x128xf32>
      %cst_69 = arith.constant 1.000000e+00 : f32
      %110 = vector.broadcast %cst_69 : f32 to vector<2x128xf32>
      %111 = arith.addf %110, %109 : vector<2x128xf32>
      %112 = arith.divf %110, %111 : vector<2x128xf32>
      %113 = arith.mulf %106, %100 : vector<2x128xf32>
      %114 = arith.addf %93, %113 : vector<2x128xf32>
      %115 = math.tanh %114 : vector<2x128xf32>
      %cst_70 = arith.constant 1.000000e+00 : f32
      %116 = vector.broadcast %cst_70 : f32 to vector<2x128xf32>
      %117 = arith.subf %116, %112 : vector<2x128xf32>
      %118 = arith.mulf %117, %115 : vector<2x128xf32>
      %119 = arith.mulf %112, %arg21 : vector<2x128xf32>
      %120 = arith.addf %118, %119 : vector<2x128xf32>
      %121 = arith.truncf %120 : vector<2x128xf32> to vector<2x128xbf16>
      %c0_71 = arith.constant 0 : index
      %c0_72 = arith.constant 0 : index
      %122 = vector.load %arg13[%c0_71, %c0_72] : memref<128x128xbf16, #tpu.memory_space<vmem>>, vector<128x128xbf16>
      %cst_73 = arith.constant dense<0.000000e+00> : vector<2x128xf32>
      %123 = tpu.matmul %121, %122, %cst_73 {dimension_numbers = #tpu.dot_dimension_numbers<[1], [0], [0], [1], [0, 0, 1, 1], [], []>} : vector<2x128xbf16>, vector<128x128xbf16>, vector<2x128xf32> -> vector<2x128xf32>
      %124 = vector.broadcast %6 : vector<1x128xf32> to vector<2x128xf32>
      %125 = arith.addf %123, %124 : vector<2x128xf32>
      %cst_74 = arith.constant dense<0xFF800000> : vector<2xf32>
      %126 = vector.multi_reduction <maximumf>, %125, %cst_74 [1] : vector<2x128xf32> to vector<2xf32>
      %127 = vector.shape_cast %126 : vector<2xf32> to vector<2x1xf32>
      %128 = vector.broadcast %127 : vector<2x1xf32> to vector<2x128xf32>
      %129 = arith.subf %125, %128 : vector<2x128xf32>
      %130 = math.exp %129 : vector<2x128xf32>
      %cst_75 = arith.constant dense<0.000000e+00> : vector<2xf32>
      %131 = vector.multi_reduction <add>, %130, %cst_75 [1] : vector<2x128xf32> to vector<2xf32>
      %132 = vector.shape_cast %131 : vector<2xf32> to vector<2x1xf32>
      %133 = math.log %132 : vector<2x1xf32>
      %134 = arith.addf %133, %127 : vector<2x1xf32>
      %135 = vector.broadcast %134 : vector<2x1xf32> to vector<2x128xf32>
      %136 = arith.subf %125, %135 : vector<2x128xf32>
      %137 = arith.index_cast %arg20 : i32 to index
      %c0_76 = arith.constant 0 : index
      %c0_77 = arith.constant 0 : index
      %138 = vector.load %arg15[%137, %c0_76, %c0_77] : memref<2x2x128xf32, #tpu.memory_space<vmem>>, vector<1x2x128xf32>
      %139 = vector.shape_cast %138 : vector<1x2x128xf32> to vector<2x128xf32>
      %140 = vector.shape_cast %136 : vector<2x128xf32> to vector<1x2x128xf32>
      tpu.vector_store %arg15[%137, %c0_76, %c0_77], %140 {strides = array<i32>} : memref<2x2x128xf32, #tpu.memory_space<vmem>>, vector<1x2x128xf32>,
      %141 = tpu.iota {dimensions = array<i32: 1>} : vector<2x128xi32>
      %142 = arith.subf %127, %134 : vector<2x1xf32>
      %143 = vector.broadcast %142 : vector<2x1xf32> to vector<2x128xf32>
      %144 = arith.cmpf oeq, %136, %143 : vector<2x128xf32>
      %c128_i32 = arith.constant 128 : i32
      %145 = vector.broadcast %c128_i32 : i32 to vector<2x128xi32>
      %146 = arith.select %144, %141, %145 : vector<2x128xi1>, vector<2x128xi32>
      %cst_78 = arith.constant dense<2147483647> : vector<2xi32>
      %147 = vector.multi_reduction <minsi>, %146, %cst_78 [1] : vector<2x128xi32> to vector<2xi32>
      %148 = vector.shape_cast %147 : vector<2xi32> to vector<2x1xi32>
      %149 = vector.broadcast %148 : vector<2x1xi32> to vector<2x128xi32>
      %150 = arith.cmpi eq, %141, %149 : vector<2x128xi32>
      %151 = arith.extui %150 : vector<2x128xi1> to vector<2x128xi32>
      %152 = arith.sitofp %151 : vector<2x128xi32> to vector<2x128xf32>
      %153 = arith.truncf %152 : vector<2x128xf32> to vector<2x128xbf16>
      %c0_79 = arith.constant 0 : index
      %c0_80 = arith.constant 0 : index
      %154 = vector.load %arg3[%c0_79, %c0_80] : memref<128x128xbf16, #tpu.memory_space<vmem>>, vector<128x128xbf16>
      %cst_81 = arith.constant dense<0.000000e+00> : vector<2x128xf32>
      %155 = tpu.matmul %153, %154, %cst_81 {dimension_numbers = #tpu.dot_dimension_numbers<[1], [0], [0], [1], [0, 0, 1, 1], [], []>} : vector<2x128xbf16>, vector<128x128xbf16>, vector<2x128xf32> -> vector<2x128xf32>
      scf.yield %120, %155 : vector<2x128xf32>, vector<2x128xf32>
    }
    %c2_i32_15 = arith.constant 2 : i32
    %c0_16 = arith.constant 0 : index
    %c0_17 = arith.constant 0 : index
    %11 = vector.load %arg18[%c0_16, %c0_17] : memref<2x128xf32, #tpu.memory_space<vmem>>, vector<2x128xf32>
    tpu.vector_store %arg18[%c0_16, %c0_17], %10#0 {strides = array<i32>} : memref<2x128xf32, #tpu.memory_space<vmem>>, vector<2x128xf32>,
    %c0_18 = arith.constant 0 : index
    %c0_19 = arith.constant 0 : index
    %12 = vector.load %arg19[%c0_18, %c0_19] : memref<2x128xf32, #tpu.memory_space<vmem>>, vector<2x128xf32>
    tpu.vector_store %arg19[%c0_18, %c0_19], %10#1 {strides = array<i32>} : memref<2x128xf32, #tpu.memory_space<vmem>>, vector<2x128xf32>,
    %c0_20 = arith.constant 0 : index
    %c0_21 = arith.constant 0 : index
    %13 = vector.load %arg16[%c0_20, %c0_21] : memref<2x128xf32, #tpu.memory_space<vmem>>, vector<2x128xf32>
    tpu.vector_store %arg16[%c0_20, %c0_21], %10#0 {strides = array<i32>} : memref<2x128xf32, #tpu.memory_space<vmem>>, vector<2x128xf32>,
    return
  }
  func.func @transform_0(%arg0: i32, %arg1: i32) -> (i32, i32, i32) {
    %c0_i32 = arith.constant 0 : i32
    %c0_i32_0 = arith.constant 0 : i32
    %c0_i32_1 = arith.constant 0 : i32
    return %arg0, %c0_i32, %c0_i32_0 : i32, i32, i32
  }
  func.func @transform_1(%arg0: i32, %arg1: i32) -> (i32, i32) {
    %c0_i32 = arith.constant 0 : i32
    %c0_i32_0 = arith.constant 0 : i32
    %c0_i32_1 = arith.constant 0 : i32
    return %c0_i32, %c0_i32_0 : i32, i32
  }
  func.func @transform_2(%arg0: i32, %arg1: i32) -> (i32, i32) {
    %c0_i32 = arith.constant 0 : i32
    %c0_i32_0 = arith.constant 0 : i32
    %c0_i32_1 = arith.constant 0 : i32
    return %c0_i32, %c0_i32_0 : i32, i32
  }
  func.func @transform_3(%arg0: i32, %arg1: i32) -> (i32, i32) {
    %c0_i32 = arith.constant 0 : i32
    %c0_i32_0 = arith.constant 0 : i32
    %c0_i32_1 = arith.constant 0 : i32
    return %c0_i32, %c0_i32_0 : i32, i32
  }
  func.func @transform_4(%arg0: i32, %arg1: i32) -> (i32, i32) {
    %c0_i32 = arith.constant 0 : i32
    %c0_i32_0 = arith.constant 0 : i32
    %c0_i32_1 = arith.constant 0 : i32
    return %c0_i32, %c0_i32_0 : i32, i32
  }
  func.func @transform_5(%arg0: i32, %arg1: i32) -> (i32, i32) {
    %c0_i32 = arith.constant 0 : i32
    %c0_i32_0 = arith.constant 0 : i32
    %c0_i32_1 = arith.constant 0 : i32
    return %c0_i32, %c0_i32_0 : i32, i32
  }
  func.func @transform_6(%arg0: i32, %arg1: i32) -> (i32, i32, i32) {
    %c0_i32 = arith.constant 0 : i32
    %c0_i32_0 = arith.constant 0 : i32
    %c0_i32_1 = arith.constant 0 : i32
    %c0_i32_2 = arith.constant 0 : i32
    return %c0_i32, %c0_i32_0, %c0_i32_1 : i32, i32, i32
  }
  func.func @transform_7(%arg0: i32, %arg1: i32) -> (i32, i32, i32) {
    %c0_i32 = arith.constant 0 : i32
    %c0_i32_0 = arith.constant 0 : i32
    %c0_i32_1 = arith.constant 0 : i32
    %c0_i32_2 = arith.constant 0 : i32
    return %c0_i32, %c0_i32_0, %c0_i32_1 : i32, i32, i32
  }
  func.func @transform_8(%arg0: i32, %arg1: i32) -> (i32, i32, i32) {
    %c0_i32 = arith.constant 0 : i32
    %c0_i32_0 = arith.constant 0 : i32
    %c0_i32_1 = arith.constant 0 : i32
    %c0_i32_2 = arith.constant 0 : i32
    return %c0_i32, %c0_i32_0, %c0_i32_1 : i32, i32, i32
  }
  func.func @transform_9(%arg0: i32, %arg1: i32) -> (i32, i32, i32) {
    %c0_i32 = arith.constant 0 : i32
    %c0_i32_0 = arith.constant 0 : i32
    %c0_i32_1 = arith.constant 0 : i32
    %c0_i32_2 = arith.constant 0 : i32
    return %c0_i32, %c0_i32_0, %c0_i32_1 : i32, i32, i32
  }
  func.func @transform_10(%arg0: i32, %arg1: i32) -> (i32, i32, i32) {
    %c0_i32 = arith.constant 0 : i32
    %c0_i32_0 = arith.constant 0 : i32
    %c0_i32_1 = arith.constant 0 : i32
    %c0_i32_2 = arith.constant 0 : i32
    return %c0_i32, %c0_i32_0, %c0_i32_1 : i32, i32, i32
  }
  func.func @transform_11(%arg0: i32, %arg1: i32) -> (i32, i32) {
    %c0_i32 = arith.constant 0 : i32
    %c0_i32_0 = arith.constant 0 : i32
    %c0_i32_1 = arith.constant 0 : i32
    return %c0_i32, %c0_i32_0 : i32, i32
  }
  func.func @transform_12(%arg0: i32, %arg1: i32) -> (i32, i32) {
    %c0_i32 = arith.constant 0 : i32
    %c0_i32_0 = arith.constant 0 : i32
    %c0_i32_1 = arith.constant 0 : i32
    return %c0_i32, %c0_i32_0 : i32, i32
  }
  func.func @transform_13(%arg0: i32, %arg1: i32) -> (i32, i32, i32) {
    %c0_i32 = arith.constant 0 : i32
    %c0_i32_0 = arith.constant 0 : i32
    return %arg1, %arg0, %c0_i32 : i32, i32, i32
  }
  func.func @transform_14(%arg0: i32, %arg1: i32) -> (i32, i32) {
    %c0_i32 = arith.constant 0 : i32
    %c0_i32_0 = arith.constant 0 : i32
    return %arg0, %c0_i32 : i32, i32
  }
}

</mosaic_0001>

<bundles_post_ra>
// kernel: tpu_custom_call.1
= control target key start
LH: loop header
LB: loop body
LE: loop exit
PB: predicated region body
PF: predicated region fallthrough
CT: control target
= control target key end

     0   :  { %s4451_s0 = inlined_call_operand.hbm [shape: bf16[2,8,128], index: 0, kind: input, shape index: {}]   ;;  %s4452_s1 = inlined_call_operand.hbm [shape: bf16[128,128], index: 1, kind: input, shape index: {}]   ;;  %s4453_s2 = inlined_call_operand.hbm [shape: bf16[128,128], index: 2, kind: input, shape index: {}]   ;;  %s4454_s3 = inlined_call_operand.hbm [shape: bf16[128,128], index: 3, kind: input, shape index: {}]   ;;  %s4455_s4 = inlined_call_operand.vmem [shape: f32[1,128], index: 4, kind: input, shape index: {}]   ;;  %s4456_s5 = inlined_call_operand.vmem [shape: f32[1,128], index: 5, kind: input, shape index: {}]   ;;  %s4457_s6 = inlined_call_operand.hbm [shape: bf16[3,128,128], index: 6, kind: input, shape index: {}]   ;;  %s4458_s7 = inlined_call_operand.hbm [shape: bf16[3,128,128], index: 7, kind: input, shape index: {}]   ;;  %s4459_s8 = inlined_call_operand.vmem [shape: f32[3,1,128], index: 8, kind: input, shape index: {}]   ;;  %s4460_s9 = inlined_call_operand.hbm [shape: bf16[3,128,128], index: 9, kind: input, shape index: {}]   ;;  %s4461_s10 = inlined_call_operand.vmem [shape: f32[3,1,128], index: 10, kind: input, shape index: {}]   ;;  %s4462_s11 = inlined_call_operand.hbm [shape: bf16[128,128], index: 11, kind: input, shape index: {}]   ;;  %s4463_s12 = inlined_call_operand.vmem [shape: f32[1,128], index: 12, kind: input, shape index: {}]   ;;  %s4464_s13 = inlined_call_operand.hbm [shape: f32[6,2,128], index: 13, kind: output, shape index: {0}]   ;;  %s4465_s14 = inlined_call_operand.hbm [shape: f32[2,128], index: 14, kind: output, shape index: {1}]  }
   0x1   :  { %4485 = sst [smem:[#allocation38_spill]] %s4452_s1 }
   0x2   :  { %4486 = sst [smem:[#allocation39_spill]] %s4463_s12 }
   0x3   :  { %4487 = sst [smem:[#allocation40_spill]] %s4464_s13 }
   0x4   :  { %4488 = sst [smem:[#allocation41_spill]] %s4465_s14 }
   0x5   :  { %20 = vsyncpa [#allocation6], 0 }
   0x6   :  { %21 = vsyncpa [#allocation9], 0 }
   0x7   :  { %22 = vsyncpa [#allocation12], 0 }
   0x8   :  { %23 = vsyncpa [#allocation15], 0 }
   0x9   :  { %24 = vsyncpa [#allocation18], 0 }
   0xa   :  { %25 = vsyncpa [#allocation7], 0 }
   0xb   :  { %27 = vsyncpa [#allocation7 + $0x1], 0 }
   0xc   :  { %28 = vsyncpa [#allocation21], 0  ;;  %s3818_s29 = smov 0   ;;  %s3820_s30 = smov 0  }
   0xd   :  { %s3822_s15 = smov 0   ;;  %s3824_s16 = smov 0  }
   0xe   :  { %s3826_s17 = smov 0   ;;  %s3828_s18 = smov 0  }
   0xf LB: > { %4489 = sst [smem:[#allocation29_spill]] %s3688_s29  ;;  %s2478_s19 = sadd.s32 4294967295, %s3708_s18   ;;  %s3708_s18 = sphi %s3828_s18, %s34_s18   ;;  %s3704_s17 = sphi %s3826_s17, %s4525_s17   ;;  %s3700_s16 = sphi %s3824_s16, %s4528_s16   ;;  %s3696_s15 = sphi %s3822_s15, %s4523_s15   ;;  %s3692_s30 = sphi %s3820_s30, %s4527_s30   ;;  %s3688_s29 = sphi %s3818_s29, %s4526_s29  }
  0x10   : > { %4490 = sst [smem:[#allocation30_spill]] %s3696_s15  ;;  %s2479_s20 = sadd.s32 4294967294, %s3708_s18  }
  0x11   : > { %4491 = sst [smem:[#allocation31_spill]] %s3704_s17  ;;  %s43_s21 = sadd.s32 1, %s3704_s17 }
  0x12   : > { %4492 = sst [smem:[#allocation32_spill]] %s3708_s18  ;;  %s333_s22 = sadd.s32 1, %s3696_s15 }
  0x13   : > { %p44_p0 = scmp.ge.s32.totalorder %s43_s21, 3  ;;  %p343_p1 = scmp.ne.s32.totalorder %s3696_s15, %s3692_s30 }
  0x14   : > { %p3854_p2 = scmp.eq.s32.totalorder %s2478_s19, 2  ;;  %p349_p3 = scmp.ne.s32.totalorder %s3692_s30, %s3688_s29 }
  0x15   : > { %s4530_s21 = smov (%p44_p0, %s43_s21), 0  ;;  %p350_p5 = scmp.eq.s32.totalorder %s2479_s20, 2 }
  0x16   : > { %s4493_s23 = scalar_select %p3854_p2, 1, 0 }
  0x17   : > { %4495 = sst [smem:[#allocation34_spill]] %s4530_s21  ;;  %p3864_p4 = por %p3854_p2, %p343_p1 }
  0x18   : > { %4494 = sst [smem:[#allocation33_spill]] %s4493_s23  ;;  %s328_s25 = ssub.s32 %s3704_s17, %s4530_s21 }
  0x19   : > { %s4496_s24 = scalar_select %p3864_p4, 1, 0 }
  0x1a   : > { %p2480_p6 = scmp.ge.s32.totalorder %s3708_s18, 1  ;;  %p331_p7 = scmp.eq.s32.totalorder %s328_s25, 0 }
  0x1b   : > { %4497 = sst [smem:[#allocation35_spill]] %s4496_s24  ;;  %p3871_p8 = por %p350_p5, %p349_p3 }
  0x1c   : > { %p383_p9 = scmp.lt.s32.totalorder %s3708_s18, 4  ;;  %p3883_p11 = scmp.eq.s32.totalorder %s2478_s19, 0 }
  0x1d   : > { %s4498_s26 = scalar_select %p3871_p8, 1, 0 }
  0x1e   : > { %s3877_s27 = scalar_select %p331_p7, %s3696_s15, %s333_s22  }
  0x1f   : > { %4499 = sst [smem:[#allocation36_spill]] %s4498_s26  ;;  %p3879_p10 = pnand %p2480_p6, %p383_p9 }
  0x20   : > { %4500 = sst [smem:[#allocation37_spill]] %s3877_s27  ;;  %s3722_s20 = smov [#allocation8]  }
  0x21   : > { %s4501_s28 = scalar_select %p3879_p10, 1, 0 }
  0x22   : > { %s4502_s29 = scalar_select %p3883_p11, 1, 0 }
  0x23   : > { %p3073_p12 = pneg %p3879_p10  ;;  %s411_s25 = sshll.u32 %s3722_s20, 4  ;;  %s412_s25 = int_to_ptr.vmem [resolvable:$true] %s411_s25 }
  0x24   : > { %s3723_s22 = smov [#allocation11]   ;;  %s4504_s1 = sld [smem:[#allocation38_spill]] }
  0x25   : > { %p3891_p13 = pnand %p3883_p11, %p3073_p12  ;;  %s437_s17 = sshll.u32 %s3723_s22, 4  ;;  %s3895_s17 = int_to_ptr.vmem [resolvable:$true] %s437_s17 }
  0x27   : > { %p3905_p1 = pneg %p3891_p13 }
  0x2a   : > { %s3344_s15 = scalar_lea.hbm %s4504_s1, 1024 }
  0x2b   : > { %p3345_p0 = scmp.ne.s32.totalorder %s4504_s1, %s3344_s15  ;;  %p3351_p6 = scmp.lt.u32.totalorder %s3344_s15, %s4504_s1 }
  0x2d   : > { %p3347_p3 = pnand %p3905_p1, %p3345_p0 }
  0x2f   : > { %p3348_p5 = pneg %p3347_p3 }
  0x31   : > { %p3353_p7 = pnand %p3351_p6, %p3348_p5 }
  0x33   : > { %3356 = shalt.err (!%p3353_p7)
}
  0x34   : > { %s3357_s27 = scalar_lea.vmem %s412_s25, 1024  ;;  %p3365_p2 = scmp.lt.s32.totalorder %s412_s25, %s412_s25 }
  0x35   : > { %p3358_p9 = scmp.ne.s32.totalorder %s412_s25, %s3357_s27  ;;  %p3366_p4 = scmp.lt.s32.totalorder %s3357_s27, %s3357_s27 }
  0x37   : > { %p3360_p12 = pnand %p3358_p9, %p3905_p1  ;;  %p3367_p11 = por %p3366_p4, %p3365_p2 }
  0x39   : > { %p3361_p8 = pneg %p3360_p12 }
  0x3b   : > { %p3368_p10 = pnand %p3367_p11, %p3361_p8 }
  0x3d   : > { %3371 = shalt.err (!%p3368_p10)
}
  0x3e   : > { %s3724_s18 = smov 64   ;;  %s3725_s26 = smov 4  }
  0x3f   : > { %3079 = dma.hbm_to_vmem [thread:$0]  (!%p3891_p13), %s4504_s1, 1024, %s412_s25, [#allocation9], %s3724_s18, %s3724_s18, %s3725_s26  }
  0x40   : > { %s3372_s23 = scalar_lea.hbm %s4454_s3, 1024 }
  0x41   : > { %p3373_p2 = scmp.ne.s32.totalorder %s4454_s3, %s3372_s23  ;;  %p3379_p10 = scmp.lt.u32.totalorder %s3372_s23, %s4454_s3 }
  0x43   : > { %p3375_p4 = pnand %p3373_p2, %p3905_p1 }
  0x45   : > { %p3376_p8 = pneg %p3375_p4 }
  0x47   : > { %p3381_p11 = pnand %p3379_p10, %p3376_p8 }
  0x49   : > { %3384 = shalt.err (!%p3381_p11)
}
  0x4a   : > { %s3385_s25 = scalar_lea.vmem %s3895_s17, 1024  ;;  %p3393_p6 = scmp.lt.s32.totalorder %s3895_s17, %s3895_s17 }
  0x4b   : > { %p3386_p0 = scmp.ne.s32.totalorder %s3895_s17, %s3385_s25  ;;  %p3394_p7 = scmp.lt.s32.totalorder %s3385_s25, %s3385_s25 }
  0x4d   : > { %p3388_p3 = pnand %p3386_p0, %p3905_p1  ;;  %p3395_p9 = por %p3394_p7, %p3393_p6 }
  0x4f   : > { %p3389_p5 = pneg %p3388_p3 }
  0x51   : > { %p3396_p12 = pnand %p3395_p9, %p3389_p5 }
  0x53   : > { %3399 = shalt.err (!%p3396_p12)
}
  0x54   : > { %3085 = dma.hbm_to_vmem [thread:$0]  (!%p3891_p13), %s4454_s3, 1024, %s3895_s17, [#allocation12], %s3724_s18, %s3724_s18, %s3725_s26  }
  0x55   : > { %s3726_s23 = smov [#allocation14]   ;;  %s3400_s19 = scalar_lea.hbm %s4458_s7, 3072 }
  0x56   : > { %s469_s24 = sshll.u32 %s3726_s23, 4  ;;  %p3401_p2 = scmp.ne.s32.totalorder %s4458_s7, %s3400_s19  ;;  %s470_s24 = int_to_ptr.vmem [resolvable:$true] %s469_s24 }
  0x57   : > { %p3407_p10 = scmp.lt.u32.totalorder %s3400_s19, %s4458_s7 }
  0x58   : > { %p3403_p4 = pnand %p3401_p2, %p3905_p1 }
  0x5a   : > { %p3404_p8 = pneg %p3403_p4 }
  0x5c   : > { %p3409_p11 = pnand %p3407_p10, %p3404_p8 }
  0x5e   : > { %3412 = shalt.err (!%p3409_p11)
}
  0x5f   : > { %s3413_s17 = scalar_lea.vmem %s470_s24, 3072  ;;  %p3421_p6 = scmp.lt.s32.totalorder %s470_s24, %s470_s24 }
  0x60   : > { %p3414_p0 = scmp.ne.s32.totalorder %s470_s24, %s3413_s17  ;;  %p3422_p7 = scmp.lt.s32.totalorder %s3413_s17, %s3413_s17 }
  0x62   : > { %p3416_p3 = pnand %p3414_p0, %p3905_p1  ;;  %p3423_p9 = por %p3422_p7, %p3421_p6 }
  0x64   : > { %p3417_p5 = pneg %p3416_p3 }
  0x66   : > { %p3424_p12 = pnand %p3423_p9, %p3417_p5 }
  0x68   : > { %3427 = shalt.err (!%p3424_p12)
}
  0x69   : > { %3091 = dma.hbm_to_vmem [thread:$0]  (!%p3891_p13), %s4458_s7, 3072, %s470_s24, [#allocation15], %s3724_s18, %s3724_s18, %s3725_s26  }
  0x6a   : > { %s3727_s13 = smov [#allocation5]   ;;  %s3728_s14 = smov [#allocation10]  }
  0x6b   : > { %s398_s23 = sshll.u32 %s3727_s13, 4  ;;  %s424_s15 = sshll.u32 %s3728_s14, 4  ;;  %s399_s23 = int_to_ptr.vmem [resolvable:$true] %s398_s23  ;;  %s3971_s15 = int_to_ptr.vmem [resolvable:$true] %s424_s15 }
  0x6c   : > { %s3428_s27 = scalar_lea.hbm %s4451_s0, 128 }
  0x6d   : > { %p3429_p2 = scmp.ne.s32.totalorder %s4451_s0, %s3428_s27  ;;  %p3435_p10 = scmp.lt.u32.totalorder %s3428_s27, %s4451_s0 }
  0x6f   : > { %p3431_p4 = pnand %p3429_p2, %p3905_p1 }
  0x71   : > { %p3432_p8 = pneg %p3431_p4 }
  0x73   : > { %p3437_p11 = pnand %p3435_p10, %p3432_p8 }
  0x75   : > { %3440 = shalt.err (!%p3437_p11)
}
  0x76   : > { %s3441_s12 = scalar_lea.vmem %s399_s23, 128  ;;  %p3449_p6 = scmp.lt.s32.totalorder %s399_s23, %s399_s23 }
  0x77   : > { %p3442_p0 = scmp.ne.s32.totalorder %s399_s23, %s3441_s12  ;;  %p3450_p7 = scmp.lt.s32.totalorder %s3441_s12, %s3441_s12 }
  0x79   : > { %p3444_p3 = pnand %p3442_p0, %p3905_p1  ;;  %p3451_p9 = por %p3450_p7, %p3449_p6 }
  0x7b   : > { %p3445_p5 = pneg %p3444_p3 }
  0x7d   : > { %p3452_p12 = pnand %p3451_p9, %p3445_p5 }
  0x7f   : > { %3455 = shalt.err (!%p3452_p12)
}
  0x80   : > { %3076 = dma.hbm_to_vmem [thread:$0]  (!%p3891_p13), %s4451_s0, 128, %s399_s23, [#allocation6], %s3724_s18, %s3724_s18, %s3725_s26  }
  0x81   : > { %s3456_s27 = scalar_lea.hbm %s4453_s2, 1024 }
  0x82   : > { %p3457_p2 = scmp.ne.s32.totalorder %s4453_s2, %s3456_s27  ;;  %p3463_p10 = scmp.lt.u32.totalorder %s3456_s27, %s4453_s2 }
  0x84   : > { %p3459_p4 = pnand %p3457_p2, %p3905_p1 }
  0x86   : > { %p3460_p8 = pneg %p3459_p4 }
  0x88   : > { %p3465_p11 = pnand %p3463_p10, %p3460_p8 }
  0x8a   : > { %3468 = shalt.err (!%p3465_p11)
}
  0x8b   : > { %s3469_s23 = scalar_lea.vmem %s3971_s15, 1024  ;;  %p3477_p6 = scmp.lt.s32.totalorder %s3971_s15, %s3971_s15 }
  0x8c   : > { %p3470_p0 = scmp.ne.s32.totalorder %s3971_s15, %s3469_s23  ;;  %p3478_p7 = scmp.lt.s32.totalorder %s3469_s23, %s3469_s23 }
  0x8e   : > { %p3472_p3 = pnand %p3470_p0, %p3905_p1  ;;  %p3479_p9 = por %p3478_p7, %p3477_p6 }
  0x90   : > { %p3473_p5 = pneg %p3472_p3 }
  0x92   : > { %p3480_p12 = pnand %p3479_p9, %p3473_p5 }
  0x94   : > { %3483 = shalt.err (!%p3480_p12)
}
  0x95   : > { %3082 = dma.hbm_to_vmem [thread:$0]  (!%p3891_p13), %s4453_s2, 1024, %s3971_s15, [#allocation9], %s3724_s18, %s3724_s18, %s3725_s26  }
  0x96   : > { %s3729_s14 = smov [#allocation13]   ;;  %s3730_s22 = smov [#allocation16]  }
  0x97   : > { %s456_s19 = sshll.u32 %s3729_s14, 4  ;;  %s485_s27 = sshll.u32 %s3730_s22, 4  ;;  %s457_s19 = int_to_ptr.vmem [resolvable:$true] %s456_s19  ;;  %s4020_s27 = int_to_ptr.vmem [resolvable:$true] %s485_s27 }
  0x98   : > { %s3484_s1 = scalar_lea.hbm %s4457_s6, 3072 }
  0x99   : > { %p3485_p2 = scmp.ne.s32.totalorder %s4457_s6, %s3484_s1  ;;  %p3491_p10 = scmp.lt.u32.totalorder %s3484_s1, %s4457_s6 }
  0x9b   : > { %p3487_p4 = pnand %p3485_p2, %p3905_p1 }
  0x9d   : > { %p3488_p8 = pneg %p3487_p4 }
  0x9f   : > { %p3493_p11 = pnand %p3491_p10, %p3488_p8 }
  0xa1   : > { %3496 = shalt.err (!%p3493_p11)
}
  0xa2   : > { %s3497_s13 = scalar_lea.vmem %s457_s19, 3072  ;;  %p3505_p6 = scmp.lt.s32.totalorder %s457_s19, %s457_s19 }
  0xa3   : > { %p3498_p0 = scmp.ne.s32.totalorder %s457_s19, %s3497_s13  ;;  %p3506_p7 = scmp.lt.s32.totalorder %s3497_s13, %s3497_s13 }
  0xa5   : > { %p3500_p3 = pnand %p3498_p0, %p3905_p1  ;;  %p3507_p9 = por %p3506_p7, %p3505_p6 }
  0xa7   : > { %p3501_p5 = pneg %p3500_p3 }
  0xa9   : > { %p3508_p12 = pnand %p3507_p9, %p3501_p5 }
  0xab   : > { %3511 = shalt.err (!%p3508_p12)
}
  0xac   : > { %3088 = dma.hbm_to_vmem [thread:$0]  (!%p3891_p13), %s4457_s6, 3072, %s457_s19, [#allocation12], %s3724_s18, %s3724_s18, %s3725_s26  }
  0xad   : > { %s3512_s1 = scalar_lea.hbm %s4460_s9, 3072 }
  0xae   : > { %p3513_p2 = scmp.ne.s32.totalorder %s4460_s9, %s3512_s1  ;;  %p3519_p10 = scmp.lt.u32.totalorder %s3512_s1, %s4460_s9 }
  0xb0   : > { %p3515_p4 = pnand %p3513_p2, %p3905_p1 }
  0xb2   : > { %p3516_p8 = pneg %p3515_p4 }
  0xb4   : > { %p3521_p11 = pnand %p3519_p10, %p3516_p8 }
  0xb6   : > { %3524 = shalt.err (!%p3521_p11)
}
  0xb7   : > { %s3525_s19 = scalar_lea.vmem %s4020_s27, 3072  ;;  %p3533_p6 = scmp.lt.s32.totalorder %s4020_s27, %s4020_s27 }
  0xb8   : > { %p3526_p0 = scmp.ne.s32.totalorder %s4020_s27, %s3525_s19  ;;  %p3534_p7 = scmp.lt.s32.totalorder %s3525_s19, %s3525_s19 }
  0xba   : > { %p3528_p3 = pnand %p3526_p0, %p3905_p1  ;;  %p3535_p9 = por %p3534_p7, %p3533_p6 }
  0xbc   : > { %p3529_p5 = pneg %p3528_p3 }
  0xbe   : > { %p3536_p12 = pnand %p3535_p9, %p3529_p5 }
  0xc0   : > { %3539 = shalt.err (!%p3536_p12)
}
  0xc1   : > { %3094 = dma.hbm_to_vmem [thread:$0]  (!%p3891_p13), %s4460_s9, 3072, %s4020_s27, [#allocation15], %s3724_s18, %s3724_s18, %s3725_s26  }
  0xc2   : > { %s3731_s22 = smov [#allocation17]   ;;  %s3540_s24 = scalar_lea.hbm %s4462_s11, 1024 }
  0xc3   : > { %s501_s25 = sshll.u32 %s3731_s22, 4  ;;  %p3541_p2 = scmp.ne.s32.totalorder %s4462_s11, %s3540_s24  ;;  %s502_s25 = int_to_ptr.vmem [resolvable:$true] %s501_s25 }
  0xc4   : > { %p3547_p10 = scmp.lt.u32.totalorder %s3540_s24, %s4462_s11 }
  0xc5   : > { %p3543_p4 = pnand %p3541_p2, %p3905_p1 }
  0xc7   : > { %p3544_p8 = pneg %p3543_p4 }
  0xc9   : > { %p3549_p11 = pnand %p3547_p10, %p3544_p8 }
  0xcb   : > { %3552 = shalt.err (!%p3549_p11)
}
  0xcc   : > { %s3553_s27 = scalar_lea.vmem %s502_s25, 1024  ;;  %p3561_p6 = scmp.lt.s32.totalorder %s502_s25, %s502_s25 }
  0xcd   : > { %p3554_p0 = scmp.ne.s32.totalorder %s502_s25, %s3553_s27  ;;  %p3562_p7 = scmp.lt.s32.totalorder %s3553_s27, %s3553_s27 }
  0xcf   : > { %p3556_p3 = pnand %p3554_p0, %p3905_p1  ;;  %p3563_p9 = por %p3562_p7, %p3561_p6 }
  0xd1   : > { %p3557_p5 = pneg %p3556_p3 }
  0xd3   : > { %p3564_p12 = pnand %p3563_p9, %p3557_p5 }
  0xd5   : > { %3567 = shalt.err (!%p3564_p12)
}
  0xd6   : > { %3097 = dma.hbm_to_vmem [thread:$0]  (!%p3891_p13), %s4462_s11, 1024, %s502_s25, [#allocation18], %s3724_s18, %s3724_s18, %s3725_s26  }
  0xd7   : > { %p4506_p2 = scmp.ne.s32.totalorder %s4501_s28, 0 }
  0xd8   : > { %p4507_p1 = scmp.ne.s32.totalorder (!%p4506_p2), %s4502_s29, 0 }
  0xd9   : > { %520 = sbr.rel (%p4506_p2) target bundleno = 2980 (0xba4), region = 72 }
  0xe0   : > { %3659 = dma.done.wait (%p4507_p1), [#allocation6], 128  }
  0xe1   : > { %3661 = vsyncadd (%p4507_p1), [#allocation6], 4294967168 }
  0xe2   : > { %3663 = dma.done.wait (%p4507_p1), [#allocation9], 2048  }
  0xe3   : > { %3665 = vsyncadd (%p4507_p1), [#allocation9], 4294965248 }
  0xe4   : > { %3667 = dma.done.wait (%p4507_p1), [#allocation12], 4096  }
  0xe5   : > { %3669 = vsyncadd (%p4507_p1), [#allocation12], 4294963200 }
  0xe6   : > { %3671 = dma.done.wait (%p4507_p1), [#allocation15], 6144  }
  0xe7   : > { %3673 = vsyncadd (%p4507_p1), [#allocation15], 4294961152 }
  0xe8   : > { %3675 = dma.done.wait (%p4507_p1), [#allocation18], 1024  }
  0xe9   : > { %3677 = vsyncadd (%p4507_p1), [#allocation18], 4294966272  ;;  %s584_s21 = sand.u32 1, %s3692_s30   ;;  %p2499_p13 = scmp.ne.s32.totalorder %s3700_s16, 0 }
  0xea   : > { %s4115_s28 = sshll.u32 %s584_s21, 2  ;;  %v3213_v0 = vld [vmem:[#allocation11] sm:$0xff] (!%p2499_p13)   ;;  %v3732_v1 = vmov (!%p2499_p13), 0.0   ;;  %v3214_v2 = vld [vmem:[#allocation11 + $0x8] sm:$0xff] (!%p2499_p13)   ;;  %vm3733_vm0 = vmmov (!%p2499_p13), 0   ;;  %v3215_v3 = vld [vmem:[#allocation11 + $0x10] sm:$0xff] (!%p2499_p13)   ;;  %v725_v10 = vlaneseq (!%p2499_p13) }
  0xeb   : > { %s586_s20 = scalar_lea.vmem [#allocation19], %s4115_s28  ;;  %595 = sbr.rel (%p2499_p13) target bundleno = 486 (0x1e6), region = 108  ;;  %2755 = vmatprep.subr.bf16.mxu0 (!%p2499_p13), %v3732_v1  ;;  %722 = vst [vmem:[#allocation3] sm:$0x3] (!%p2499_p13), %v3732_v1  ;;  %2771 = vmatprep.mubr.msk.bf16.mxu0 (!%p2499_p13), %vm3733_vm0, %v3732_v1  ;;  %v3216_v4 = vld [vmem:[#allocation11 + $0x18] sm:$0xff] (!%p2499_p13)   ;;  %v3217_v5 = vld [vmem:[#allocation11 + $0x20] sm:$0xff] (!%p2499_p13)  }
  0xec   : > { %2756 = vmatpush3.bf16.msra.mxu0 (!%p2499_p13), %v3213_v0  ;;  %v3218_v6 = vld [vmem:[#allocation11 + $0x28] sm:$0xff] (!%p2499_p13)   ;;  %v3219_v7 = vld [vmem:[#allocation11 + $0x30] sm:$0xff] (!%p2499_p13)   ;;  %v3220_v8 = vld [vmem:[#allocation11 + $0x38] sm:$0xff] (!%p2499_p13)   ;;  %v726_v11 = vshrl.u32 (!%p2499_p13), %v725_v10, 7 }
  0xed   : > { %2757 = vmatprep.subr.bf16.mxu0 (!%p2499_p13), %v3732_v1  ;;  %v3221_v9 = vld [vmem:[#allocation5] sm:$0xff] (!%p2499_p13)   ;;  %v723_v12 = vld [vmem:[#allocation8] sm:$0x1] (!%p2499_p13)  ;;  %v2509_v17 = vld [vmem:[%s4455_s4] ss:$0 sm:$0xff] (!%p2499_p13) }
  0xee   : > { %v724_v13 = vunpack.c.l.bf16 (!%p2499_p13), %v723_v12  ;;  %v727_v14 = vsub.s32 (!%p2499_p13), 1, %v726_v11 }
  0xf0   : > { %2758 = vmatpush3.bf16.msra.mxu0 (!%p2499_p13), %v3214_v2  ;;  %v728_v15 = vrot.slane (!%p2499_p13), %v724_v13, %v727_v14 }
  0xf1   : > { %2759 = vmatprep.subr.bf16.mxu0 (!%p2499_p13), %v3732_v1 }
  0xf2   : > { %729 = vst [vmem:[#allocation4] sm:$0x3] %v728_v15 }
  0xf4   : > { %2760 = vmatpush3.bf16.msra.mxu0 %v3215_v3 }
  0xf5   : > { %2761 = vmatprep.subr.bf16.mxu0 %v3732_v1 }
  0xf8   : > { %2762 = vmatpush3.bf16.msra.mxu0 %v3216_v4 }
  0xf9   : > { %2763 = vmatprep.subr.bf16.mxu0 %v3732_v1 }
  0xfc   : > { %2764 = vmatpush3.bf16.msra.mxu0 %v3217_v5 }
  0xfd   : > { %2765 = vmatprep.subr.bf16.mxu0 %v3732_v1 }
 0x100   : > { %2766 = vmatpush3.bf16.msra.mxu0 %v3218_v6 }
 0x101   : > { %2767 = vmatprep.subr.bf16.mxu0 %v3732_v1 }
 0x104   : > { %2768 = vmatpush3.bf16.msra.mxu0 %v3219_v7 }
 0x105   : > { %2769 = vmatprep.subr.bf16.mxu0 %v3732_v1 }
 0x108   : > { %2770 = vmatpush3.bf16.msra.mxu0 %v3220_v8 }
 0x10b   : > { %2772 = vmatmul.mubr.bf16.vlgmr.msra.gmra.mrb[0].mxu0 %v3221_v9 }
 0x1de   : > { %v702_v16 = vpop.f32.mrb[0].mxu0 }
 0x1df   : > { %v2773_v18 = vpop.f32.mrb[1].mxu0  ;;  %v716_v20 = vadd.f32 %v2509_v17, %v702_v16 }
 0x1e0   : > { %v705_v19 = vpop.f32.mrb[2].mxu0 }
 0x1e1   : > { %v717_v21 = vadd.f32 %v2509_v17, %v705_v19  ;;  %v2774_v22 = vpop.f32.mrb[3].mxu0 }
 0x1e3   : > { %v2632_v23 = vpack.c.bf16 %v717_v21, %v716_v20 }
 0x1e5   : > { %2633 = vst [vmem:[#allocation2] sm:$0xff] %v2632_v23  }
 0x1e6 PF: > { %v4125_v24 = vld [vmem:[%s4456_s5] ss:$0 sm:$0xff]  ;;  %v4135_v26 = vld [vmem:[%s4459_s8 + $0x1] ss:$0 sm:$0xff]  ;;  %v4140_v27 = vld [vmem:[%s4459_s8 + $0x2] ss:$0 sm:$0xff] }
 0x1e7   : > { %v4130_v25 = vld [vmem:[%s4459_s8] ss:$0 sm:$0xff]  ;;  %v4150_v29 = vld [vmem:[%s4461_s10 + $0x1] ss:$0 sm:$0xff]  ;;  %v4155_v30 = vld [vmem:[%s4461_s10 + $0x2] ss:$0 sm:$0xff] }
 0x1e8   : > { %v4145_v28 = vld [vmem:[%s4461_s10] ss:$0 sm:$0xff]  ;;  %s4508_s22 = sld [smem:[#allocation39_spill]]  ;;  %v738_v32 = vld [vmem:[#allocation3] sm:$0x3]   ;;  %s4166_s25 = smov 0  }
 0x1ed   : > { %v739_v33 = vld [vmem:[#allocation4] sm:$0x3]  }
 0x1ee   : > { %v4160_v31 = vld [vmem:[%s4508_s22] ss:$0 sm:$0xff] }
 0x1ef LB: >> { %v3224_v34 = vld [vmem:[#allocation10] sm:$0xff]   ;;  %v3734_v35 = vmov 0.0   ;;  %v3225_v36 = vld [vmem:[#allocation10 + $0x8] sm:$0xff]   ;;  %vm3735_vm1 = vmmov 0   ;;  %v3226_v37 = vld [vmem:[#allocation10 + $0x10] sm:$0xff]   ;;  %v4192_v43 = vpack.c.bf16 %v3716_v32, %v3716_v32  ;;  %v860_v46 = vlaneseq  ;;  %s2609_s17 = sshll.u32 %s3720_s25, 1  ;;  %s3720_s25 = sphi %s4166_s25, %s745_s25   ;;  %v3716_v32 = vphi %v738_v32, %v4511_v32   ;;  %v3712_v33 = vphi %v739_v33, %v4510_v33  }
 0x1f0   : >> { %2775 = vmatprep.subr.bf16.mxu0 %v3734_v35  ;;  %2795 = vmatprep.subr.bf16.mxu1 %v3734_v35  ;;  %v3227_v38 = vld [vmem:[#allocation10 + $0x18] sm:$0xff]   ;;  %v3228_v39 = vld [vmem:[#allocation10 + $0x20] sm:$0xff]   ;;  %v3229_v40 = vld [vmem:[#allocation10 + $0x28] sm:$0xff]   ;;  %v3736_v44 = vmov 1966171168   ;;  %vm927_vm2 = vcmask 1041409   ;;  %s2152_s1 = scalar_lea.vmem %s586_s20, %s2609_s17 [#allocation19] }
 0x1f1   : >> { %2776 = vmatpush3.bf16.msra.mxu0 %v3224_v34  ;;  %2791 = vmatprep.mubr.msk.bf16.mxu0 %vm3735_vm1, %v3734_v35  ;;  %v3230_v41 = vld [vmem:[#allocation10 + $0x30] sm:$0xff]   ;;  %v3231_v42 = vld [vmem:[#allocation10 + $0x38] sm:$0xff]   ;;  %v858_v45 = vunpack.c.l.s4 %v3736_v44  ;;  %v4198_v48 = vshrl.u32 %v860_v46, 7  ;;  %v853_v0 = vld [vmem:[#allocation2] sm:$0xf]  ;;  %v4210_v13 = vand.u32 127, %v860_v46 }
 0x1f2   : >> { %2777 = vmatprep.subr.bf16.mxu0 %v3734_v35  ;;  %2811 = vmatprep.mubr.msk.bf16.mxu1 %vm3735_vm1, %v3734_v35  ;;  %v854_v3 = vld [vmem:[#allocation2 + $0x4] sm:$0xf]  ;;  %vm930_vm3 = vcmask 58368   ;;  %v3737_v21 = vmov 0   ;;  %vm2137_vm4 = vcmask 1041408   ;;  %s745_s25 = sadd.s32 1, %s3720_s25  }
 0x1f3   : >> { %v859_v47 = vunpack.c.0.s8 %v858_v45  ;;  %v4202_v57 = vsub.s32 0, %v4198_v48  ;;  %v921_v15 = vsub.s32 %v4210_v13, %v4198_v48  ;;  %3223 = vset.pattern.permute.xlu0 %v3737_v21  ;;  %3222 = vset.pattern.permute.xlu1 %v3737_v21  ;;  %v941_v22 = vsub.s32 1, %v4198_v48  ;;  %p742_p4 = scmp.ge.s32.totalorder %s745_s25, 2  }
 0x1f4   : > { %s4512_s24 = sld [smem:[#allocation35_spill]] (%p742_p4)  ;;  %s2628_s23 = sshll.u32 (%p742_p4), %s3700_s16, 6 }
 0x1f5   : >> { %2778 = vmatpush3.bf16.msra.mxu0 %v3225_v36  ;;  %v862_v49 = vsub.s32 %v859_v47, %v4198_v48  ;;  %s4513_s19 = sld [smem:[#allocation40_spill]] (%p742_p4)  ;;  %s2298_s13 = sshll.u32 (%p742_p4), %s586_s20, 4  ;;  %s4379_s13 = int_to_ptr.vmem [resolvable:$true] %s2298_s13 }
 0x1f6   : >> { %2779 = vmatprep.subr.bf16.mxu0 %v3734_v35  ;;  %s4383_s14 = scalar_lea.sflag (%p742_p4), [#allocation7], %s584_s21  ;;  %s3568_s29 = scalar_lea.vmem (%p742_p4), %s4379_s13, 64 }
 0x1f7   : > { %p3569_p8 = scmp.ne.s32.totalorder (%p742_p4), %s4379_s13, %s3568_s29  ;;  %s3739_s16 = smov (%p742_p4), [#allocation19]  }
 0x1f8   : > { %s3572_s18 = sshll.u32 (%p742_p4), %s3739_s16, 4  ;;  %s3573_s18 = int_to_ptr.vmem [resolvable:$false] %s3572_s18 }
 0x1f9   : >> { %2780 = vmatpush3.bf16.msra.mxu0 %v3226_v37  ;;  %s3574_s26 = scalar_lea.vmem (%p742_p4), %s3573_s18, 128  ;;  %p3575_p3 = scmp.lt.s32.totalorder (%p742_p4), %s4379_s13, %s3573_s18 }
 0x1fa   : >> { %2781 = vmatprep.subr.bf16.mxu0 %v3734_v35  ;;  %p4514_p10 = scmp.ne.s32.totalorder (%p742_p4), %s4512_s24, 0  ;;  %p3576_p5 = scmp.lt.s32.totalorder (%p742_p4), %s3574_s26, %s3568_s29 }
 0x1fb   : > { %s4375_s27 = scalar_lea.hbm (%p742_p4), %s4513_s19, %s2628_s23 }
 0x1fc   : > { %p3570_p11 = pnand (%p742_p4), %p3569_p8, %p4514_p10  ;;  %p3577_p6 = por (%p742_p4), %p3576_p5, %p3575_p3 }
 0x1fd   : >> { %2782 = vmatpush3.bf16.msra.mxu0 %v3227_v38 }
 0x1fe   : >> { %2783 = vmatprep.subr.bf16.mxu0 %v3734_v35  ;;  %p3571_p0 = pneg (%p742_p4), %p3570_p11 }
 0x200   : > { %p3578_p7 = pnand (%p742_p4), %p3577_p6, %p3571_p0 }
 0x201   : >> { %2784 = vmatpush3.bf16.msra.mxu0 %v3228_v39 }
 0x202   : >> { %2785 = vmatprep.subr.bf16.mxu0 %v3734_v35 }
 0x205   : >> { %2786 = vmatpush3.bf16.msra.mxu0 %v3229_v40 }
 0x206   : >> { %2787 = vmatprep.subr.bf16.mxu0 %v3734_v35 }
 0x209   : >> { %2788 = vmatpush3.bf16.msra.mxu0 %v3230_v41 }
 0x20a   : >> { %2789 = vmatprep.subr.bf16.mxu0 %v3734_v35 }
 0x20d   : >> { %2790 = vmatpush3.bf16.msra.mxu0 %v3231_v42 }
 0x20e   : >> { %2855 = vmatprep.subr.bf16.mxu0 %v3734_v35 }
 0x210   : >> { %2792 = vmatmul.mubr.bf16.vlgmr.msra.gmra.mrb[0].mxu0 %v4192_v43 }
 0x211   : >> { %2871 = vmatprep.mubr.msk.bf16.mxu0 %vm3735_vm1, %v3734_v35 }
 0x2e3   : >> { %v847_v50 = vpop.f32.mrb[0].mxu0 }
 0x2e4   : >> { %v855_v51 = vpack.c.bf16 %v847_v50, %v847_v50  ;;  %v2793_v52 = vpop.f32.mrb[1].mxu0  ;;  %v3232_v50 = vld [vmem:[#allocation14] sm:$0xff]  }
 0x2e5   : >> { %v850_v53 = vpop.f32.mrb[2].mxu0  ;;  %2796 = vmatpush3.bf16.msra.mxu1 %v3232_v50  ;;  %v3234_v52 = vld [vmem:[#allocation14 + $0x8] sm:$0xff]   ;;  %v3252_v50 = vld [vmem:[#allocation13 + $0x10] sm:$0xff]  }
 0x2e6   : >> { %v863_v54 = vrot.slane %v855_v51, %v862_v49  ;;  %v2794_v55 = vpop.f32.mrb[3].mxu0  ;;  %v3233_v51 = vld [vmem:[#allocation14 + $0x40] sm:$0xff]   ;;  %v3235_v53 = vld [vmem:[#allocation14 + $0x48] sm:$0xff]   ;;  %2797 = vmatprep.subr.bf16.mxu1 %v3734_v35 }
 0x2e7   : >> { %2856 = vmatpush3.bf16.msra.mxu0 %v3233_v51  ;;  %v3253_v51 = vld [vmem:[#allocation13 + $0x50] sm:$0xff]  }
 0x2e8   : >> { %v870_v56 = vrot.slane %v863_v54, %v862_v49  ;;  %2857 = vmatprep.subr.bf16.mxu0 %v3734_v35 }
 0x2e9   : >> { %2798 = vmatpush3.bf16.msra.mxu1 %v3234_v52  ;;  %v3254_v52 = vld [vmem:[#allocation13 + $0x18] sm:$0xff]  }
 0x2ea   : >> { %v872_v58 = vunpack.i.h.s16 %v870_v56  ;;  %v2518_v59 = vpack.i.b16 %v870_v56, %v870_v56  ;;  %2799 = vmatprep.subr.bf16.mxu1 %v3734_v35 }
 0x2eb   : >> { %2858 = vmatpush3.bf16.msra.mxu0 %v3235_v53  ;;  %v3255_v53 = vld [vmem:[#allocation13 + $0x58] sm:$0xff]  }
 0x2ec   : >> { %v874_v60 = vpack.i.b16 %v872_v58, %v872_v58  ;;  %v878_v61 = vrot.slane %v2518_v59, %v4202_v57  ;;  %2859 = vmatprep.subr.bf16.mxu0 %v3734_v35 }
 0x2ee   : >> { %v882_v62 = vrot.slane %v874_v60, %v4202_v57  ;;  %v884_v63 = vpack.i.b16 %v878_v61, %v878_v61  ;;  %v3236_v60 = vld [vmem:[#allocation14 + $0x10] sm:$0xff]  }
 0x2ef   : >> { %v3237_v61 = vld [vmem:[#allocation14 + $0x50] sm:$0xff]   ;;  %2800 = vmatpush3.bf16.msra.mxu1 %v3236_v60 }
 0x2f0   : >> { %v889_v1 = vrot.slane %v884_v63, %v4202_v57  ;;  %v891_v2 = vpack.i.b16 %v882_v62, %v882_v62  ;;  %2860 = vmatpush3.bf16.msra.mxu0 %v3237_v61  ;;  %2801 = vmatprep.subr.bf16.mxu1 %v3734_v35  ;;  %v3238_v63 = vld [vmem:[#allocation14 + $0x18] sm:$0xff]   ;;  %v3261_v60 = vld [vmem:[#allocation13 + $0x70] sm:$0xff]  }
 0x2f1   : >> { %2861 = vmatprep.subr.bf16.mxu0 %v3734_v35  ;;  %v3262_v61 = vld [vmem:[#allocation13 + $0x38] sm:$0xff]  }
 0x2f2   : >> { %v897_v4 = vadd.bf16 %v889_v1, %v853_v0  ;;  %v896_v5 = vrot.slane %v891_v2, %v4202_v57  ;;  %v3239_v0 = vld [vmem:[#allocation14 + $0x58] sm:$0xff]   ;;  %v3241_v1 = vld [vmem:[#allocation14 + $0x60] sm:$0xff]   ;;  %v3242_v2 = vld [vmem:[#allocation14 + $0x28] sm:$0xff]  }
 0x2f3   : >> { %2802 = vmatpush3.bf16.msra.mxu1 %v3238_v63  ;;  %v4262_v63 = vpack.c.bf16 %v3712_v33, %v3712_v33  ;;  %v3268_v33 = vld [vmem:[#allocation16 + $0x10] sm:$0xff]  }
 0x2f4   : >> { %3320 = vtanh.bf16 %v897_v4  ;;  %v898_v6 = vadd.bf16 %v896_v5, %v854_v3  ;;  %2862 = vmatpush3.bf16.msra.mxu0 %v3239_v0  ;;  %2803 = vmatprep.subr.bf16.mxu1 %v3734_v35  ;;  %v3243_v3 = vld [vmem:[#allocation14 + $0x68] sm:$0xff]   ;;  %v3244_v4 = vld [vmem:[#allocation14 + $0x30] sm:$0xff]   ;;  %v3264_v0 = vld [vmem:[#allocation16] sm:$0xff]  }
 0x2f5   : >> { %2863 = vmatprep.subr.bf16.mxu0 %v3734_v35  ;;  %v3245_v5 = vld [vmem:[#allocation14 + $0x70] sm:$0xff]  }
 0x2f6   : >> { %3322 = vtanh.bf16 %v898_v6  ;;  %v3246_v6 = vld [vmem:[#allocation14 + $0x38] sm:$0xff]  }
 0x2f8   : >> { %2864 = vmatpush3.bf16.msra.mxu0 %v3241_v1  ;;  %v3266_v1 = vld [vmem:[#allocation16 + $0x8] sm:$0xff]  }
 0x2f9   : >> { %2865 = vmatprep.subr.bf16.mxu0 %v3734_v35 }
 0x2fc   : >> { %2866 = vmatpush3.bf16.msra.mxu0 %v3243_v3  ;;  %v3269_v3 = vld [vmem:[#allocation16 + $0x50] sm:$0xff]  }
 0x2fd   : >> { %2867 = vmatprep.subr.bf16.mxu0 %v3734_v35 }
 0x2ff   : >> { %v3321_v7 = vpop.eup %3320 }
 0x300   : >> { %v901_v8 = vunpack.c.l.bf16 %v3321_v7  ;;  %2868 = vmatpush3.bf16.msra.mxu0 %v3245_v5  ;;  %v3247_v7 = vld [vmem:[#allocation14 + $0x78] sm:$0xff]  }
 0x301   : >> { %v3323_v9 = vpop.eup %3322  ;;  %2869 = vmatprep.subr.bf16.mxu0 %v3734_v35  ;;  %v3271_v5 = vld [vmem:[#allocation16 + $0x58] sm:$0xff]  }
 0x302   : >> { %v909_v10 = vmul.f32 %v4125_v24, %v901_v8  ;;  %v902_v11 = vunpack.c.l.bf16 %v3323_v9  ;;  %v2635_v8 = vld [vmem:[#allocation5] sm:$0xff]  }
 0x303   : >> { %v2636_v9 = vunpack.c.l.bf16 %v2635_v8 }
 0x304   : >> { %911 = vadd.xlane.f32.xlu0 %v909_v10  ;;  %v910_v12 = vmul.f32 %v4125_v24, %v902_v11  ;;  %2870 = vmatpush3.bf16.msra.mxu0 %v3247_v7  ;;  %v3273_v7 = vld [vmem:[#allocation16 + $0x60] sm:$0xff]  }
 0x305   : >> { %2875 = vmatprep.subr.bf16.mxu0 %v3734_v35 }
 0x308   : >> { %913 = vadd.xlane.f32.xlu0 %v910_v12  ;;  %v2637_v12 = vunpack.c.h.bf16 %v2635_v8  ;;  %v3274_v8 = vld [vmem:[#allocation16 + $0x28] sm:$0xff]  }
 0x391   : >> { %v912_v14 = vpop.xlane.xlu0 %911 }
 0x392   : >> { %v922_v17 = vrot.slane %v912_v14, %v921_v15 }
 0x395   : >> { %v914_v16 = vpop.xlane.xlu0 %913 }
 0x396   : >> { %v926_v18 = vrot.slane %v914_v16, %v921_v15 }
 0x398   : >> { %v928_v19 = vsel %vm927_vm2, %v926_v18, %v922_v17 }
 0x399   : >> { %v931_v20 = vsel %vm930_vm3, %v928_v19, -inf }
 0x39a   : >> { %932 = vmax.xlane.f32.xlu1 %v931_v20 }
 0x427   : >> { %v933_v23 = vpop.xlane.xlu1 %932 }
 0x428   : >> { %v938_v34 = vrot.slane %v933_v23, %v4202_v57  ;;  %v942_v36 = vrot.slane %v933_v23, %v941_v22 }
 0x42a   : >> { %v945_v37 = vsub.f32 %v912_v14, %v938_v34  ;;  %v946_v38 = vsub.f32 %v914_v16, %v942_v36 }
 0x42c   : >> { %v947_v39 = vmul.f32 1.442695, %v945_v37  ;;  %v949_v40 = vmul.f32 1.442695, %v946_v38 }
 0x42e   : >> { %3324 = vpow2.f32 %v947_v39 }
 0x42f   : >> { %3326 = vpow2.f32 %v949_v40 }
 0x438   : >> { %v3325_v41 = vpop.eup %3324 }
 0x439   : >> { %v3327_v42 = vpop.eup %3326  ;;  %954 = vperm.xlu1 %3222, %v3325_v41  }
 0x43a   : >> { %957 = vperm.xlu0 %3223, %v3327_v42  }
 0x4b8   : >> { %v955_v44 = vpop.permute.xlu1 %954 }
 0x4b9   : >> { %v958_v45 = vpop.permute.xlu0 %957  ;;  %v962_v46 = vrot.slane %v955_v44, %v921_v15 }
 0x4ba   : >> { %v966_v47 = vrot.slane %v958_v45, %v921_v15  ;;  %v3248_v45 = vld [vmem:[#allocation13] sm:$0xff]  }
 0x4bc   : >> { %v967_v48 = vsel %vm927_vm2, %v966_v47, %v962_v46  ;;  %v3249_v46 = vld [vmem:[#allocation13 + $0x40] sm:$0xff]  }
 0x4bd   : >> { %v969_v49 = vsel %vm930_vm3, %v967_v48, 0.0  ;;  %v3250_v48 = vld [vmem:[#allocation13 + $0x8] sm:$0xff]  }
 0x4be   : >> { %970 = vadd.xlane.f32.xlu1 %v969_v49  ;;  %v3251_v49 = vld [vmem:[#allocation13 + $0x48] sm:$0xff]  }
 0x54b   : >> { %v971_v54 = vpop.xlane.xlu1 %970 }
 0x54c   : >> { %3328 = vrcp.f32 %v971_v54  ;;  %v3256_v54 = vld [vmem:[#allocation13 + $0x20] sm:$0xff]  }
 0x556   : >> { %v3329_v55 = vpop.eup %3328 }
 0x557   : >> { %v977_v56 = vrot.slane %v3329_v55, %v4202_v57  ;;  %v981_v59 = vrot.slane %v3329_v55, %v941_v22  ;;  %v3240_v57 = vld [vmem:[#allocation14 + $0x20] sm:$0xff]  }
 0x558   : >> { %2804 = vmatpush3.bf16.msra.mxu1 %v3240_v57  ;;  %v3257_v55 = vld [vmem:[#allocation13 + $0x60] sm:$0xff]  }
 0x559   : >> { %v984_v58 = vmul.f32 %v3325_v41, %v977_v56  ;;  %v985_v62 = vmul.f32 %v3327_v42, %v981_v59  ;;  %2805 = vmatprep.subr.bf16.mxu1 %v3734_v35  ;;  %v3258_v56 = vld [vmem:[#allocation13 + $0x28] sm:$0xff]   ;;  %v3260_v59 = vld [vmem:[#allocation13 + $0x30] sm:$0xff]   ;;  %v3265_v57 = vld [vmem:[#allocation16 + $0x40] sm:$0xff]  }
 0x55b   : >> { %992 = vperm.xlu0 %3223, %v984_v58   ;;  %v3259_v58 = vld [vmem:[#allocation13 + $0x68] sm:$0xff]  }
 0x55c   : >> { %2806 = vmatpush3.bf16.msra.mxu1 %v3242_v2  ;;  %v3267_v2 = vld [vmem:[#allocation16 + $0x48] sm:$0xff]  }
 0x55d   : >> { %2807 = vmatprep.subr.bf16.mxu1 %v3734_v35 }
 0x55f   : >> { %997 = vperm.xlu0 %3223, %v985_v62   ;;  %v3263_v62 = vld [vmem:[#allocation13 + $0x78] sm:$0xff]  }
 0x560   : >> { %2808 = vmatpush3.bf16.msra.mxu1 %v3244_v4  ;;  %v3270_v4 = vld [vmem:[#allocation16 + $0x18] sm:$0xff]  }
 0x561   : >> { %2809 = vmatprep.subr.bf16.mxu1 %v3734_v35 }
 0x564   : >> { %2810 = vmatpush3.bf16.msra.mxu1 %v3246_v6  ;;  %v3272_v6 = vld [vmem:[#allocation16 + $0x20] sm:$0xff]  }
 0x565   : >> { %2815 = vmatprep.subr.bf16.mxu1 %v3734_v35 }
 0x5da   : >> { %v993_v10 = vpop.permute.xlu0 %992 }
 0x5db   : >> { %v1000_v11 = vmul.f32 %v2636_v9, %v993_v10  ;;  %v3275_v9 = vld [vmem:[#allocation16 + $0x68] sm:$0xff]   ;;  %v3276_v10 = vld [vmem:[#allocation16 + $0x30] sm:$0xff]  }
 0x5dd   : >> { %v1002_v14 = vrot.slane %v1000_v11, 4 }
 0x5de   : >> { %v998_v15 = vpop.permute.xlu0 %997 }
 0x5df   : >> { %v1003_v16 = vadd.f32 %v1002_v14, %v1000_v11  ;;  %v1001_v17 = vmul.f32 %v2637_v12, %v998_v15  ;;  %v3277_v11 = vld [vmem:[#allocation16 + $0x70] sm:$0xff]   ;;  %v3278_v12 = vld [vmem:[#allocation16 + $0x38] sm:$0xff]   ;;  %v3280_v15 = vld [vmem:[#allocation14 + $0x80] sm:$0xff]  }
 0x5e0   : >> { %v3279_v14 = vld [vmem:[#allocation16 + $0x78] sm:$0xff]  }
 0x5e1   : >> { %v1004_v18 = vrot.slane %v1003_v16, 2  ;;  %v1008_v19 = vrot.slane %v1001_v17, 4 }
 0x5e3   : >> { %v1005_v20 = vadd.f32 %v1004_v18, %v1003_v16  ;;  %v1009_v21 = vadd.f32 %v1008_v19, %v1001_v17  ;;  %v3281_v16 = vld [vmem:[#allocation13 + $0x80] sm:$0xff]   ;;  %v3282_v17 = vld [vmem:[#allocation14 + $0x88] sm:$0xff]   ;;  %v3284_v19 = vld [vmem:[#allocation14 + $0x90] sm:$0xff]  }
 0x5e4   : >> { %v3283_v18 = vld [vmem:[#allocation13 + $0x88] sm:$0xff]  }
 0x5e5   : >> { %v1006_v22 = vrot.slane %v1005_v20, 1  ;;  %v1010_v23 = vrot.slane %v1009_v21, 2 }
 0x5e7   : >> { %v1007_v34 = vadd.f32 %v1006_v22, %v1005_v20  ;;  %v1011_v36 = vadd.f32 %v1010_v23, %v1009_v21  ;;  %v3285_v20 = vld [vmem:[#allocation13 + $0x90] sm:$0xff]   ;;  %v3286_v21 = vld [vmem:[#allocation14 + $0x98] sm:$0xff]   ;;  %v3288_v23 = vld [vmem:[#allocation14 + $0xa0] sm:$0xff]  }
 0x5e8   : >> { %v3287_v22 = vld [vmem:[#allocation13 + $0x98] sm:$0xff]  }
 0x5e9   : >> { %v1012_v37 = vrot.slane %v1011_v36, 1  ;;  %v1015_v38 = vpack.c.bf16 %v1007_v34, %v1007_v34  ;;  %v3289_v34 = vld [vmem:[#allocation13 + $0xa0] sm:$0xff]  }
 0x5eb   : >> { %v1013_v39 = vadd.f32 %v1012_v37, %v1011_v36  ;;  %v1051_v41 = vunpack.c.l.b16 %v1015_v38  ;;  %v3290_v36 = vld [vmem:[#allocation14 + $0xa8] sm:$0xff]   ;;  %v3292_v38 = vld [vmem:[#allocation14 + $0xb0] sm:$0xff]  }
 0x5ec   : >> { %v3291_v37 = vld [vmem:[#allocation13 + $0xa8] sm:$0xff]  }
 0x5ed   : >> { %v1016_v40 = vpack.c.bf16 %v1013_v39, %v1013_v39  ;;  %v3293_v39 = vld [vmem:[#allocation13 + $0xb0] sm:$0xff]  }
 0x5ef   : >> { %v1052_v42 = vunpack.c.l.b16 %v1016_v40  ;;  %v3294_v40 = vld [vmem:[#allocation14 + $0xb8] sm:$0xff]  }
 0x5f1   : >> { %v1053_v44 = vsel %vm927_vm2, %v1052_v42, %v1051_v41  ;;  %v3295_v41 = vld [vmem:[#allocation13 + $0xb8] sm:$0xff]   ;;  %v3296_v42 = vld [vmem:[#allocation16 + $0x80] sm:$0xff]  }
 0x5f2   : >> { %v4238_v47 = vpack.c.b16 %v1053_v44, %v1053_v44  ;;  %v3297_v44 = vld [vmem:[#allocation16 + $0x88] sm:$0xff]  }
 0x5f4   : >> { %2812 = vmatmul.mubr.bf16.vlgmr.msra.gmra.mrb[0].mxu1 %v4238_v47  ;;  %2872 = vmatmul.mubr.bf16.vlgmr.msra.gmra.mrb[4].mxu0 %v4238_v47 }
 0x5f5   : >> { %2816 = vmatpush3.bf16.msra.mxu1 %v3248_v45  ;;  %2876 = vmatpush3.bf16.msra.mxu0 %v3249_v46  ;;  %v3298_v45 = vld [vmem:[#allocation16 + $0x90] sm:$0xff]   ;;  %v3299_v46 = vld [vmem:[#allocation16 + $0x98] sm:$0xff]  }
 0x5f6   : >> { %2817 = vmatprep.subr.bf16.mxu1 %v3734_v35  ;;  %2877 = vmatprep.subr.bf16.mxu0 %v3734_v35 }
 0x5f7   : >> { %2831 = vmatprep.mubr.msk.bf16.mxu1 %vm3735_vm1, %v3734_v35  ;;  %2891 = vmatprep.mubr.msk.bf16.mxu0 %vm3735_vm1, %v3734_v35 }
 0x5f9   : >> { %2818 = vmatpush3.bf16.msra.mxu1 %v3250_v48  ;;  %2878 = vmatpush3.bf16.msra.mxu0 %v3251_v49  ;;  %v3301_v48 = vld [vmem:[#allocation16 + $0xa8] sm:$0xff]   ;;  %v3302_v49 = vld [vmem:[#allocation16 + $0xb0] sm:$0xff]  }
 0x5fa   : >> { %2819 = vmatprep.subr.bf16.mxu1 %v3734_v35  ;;  %2879 = vmatprep.subr.bf16.mxu0 %v3734_v35 }
 0x5fd   : >> { %2820 = vmatpush3.bf16.msra.mxu1 %v3252_v50  ;;  %2880 = vmatpush3.bf16.msra.mxu0 %v3253_v51  ;;  %v3303_v50 = vld [vmem:[#allocation16 + $0xb8] sm:$0xff]   ;;  %v3304_v51 = vld [vmem:[#allocation17] sm:$0xff]  }
 0x5fe   : >> { %2821 = vmatprep.subr.bf16.mxu1 %v3734_v35  ;;  %2881 = vmatprep.subr.bf16.mxu0 %v3734_v35 }
 0x601   : >> { %2822 = vmatpush3.bf16.msra.mxu1 %v3254_v52  ;;  %2882 = vmatpush3.bf16.msra.mxu0 %v3255_v53  ;;  %v3305_v52 = vld [vmem:[#allocation17 + $0x8] sm:$0xff]   ;;  %v3306_v53 = vld [vmem:[#allocation17 + $0x10] sm:$0xff]  }
 0x602   : >> { %2823 = vmatprep.subr.bf16.mxu1 %v3734_v35  ;;  %2883 = vmatprep.subr.bf16.mxu0 %v3734_v35 }
 0x605   : >> { %2824 = vmatpush3.bf16.msra.mxu1 %v3256_v54  ;;  %2884 = vmatpush3.bf16.msra.mxu0 %v3257_v55  ;;  %v3307_v54 = vld [vmem:[#allocation17 + $0x18] sm:$0xff]   ;;  %v3309_v55 = vld [vmem:[#allocation17 + $0x28] sm:$0xff]  }
 0x606   : >> { %2825 = vmatprep.subr.bf16.mxu1 %v3734_v35  ;;  %2885 = vmatprep.subr.bf16.mxu0 %v3734_v35 }
 0x609   : >> { %2826 = vmatpush3.bf16.msra.mxu1 %v3258_v56  ;;  %2886 = vmatpush3.bf16.msra.mxu0 %v3259_v58  ;;  %v3310_v56 = vld [vmem:[#allocation17 + $0x30] sm:$0xff]   ;;  %v3311_v58 = vld [vmem:[#allocation17 + $0x38] sm:$0xff]  }
 0x60a   : >> { %2827 = vmatprep.subr.bf16.mxu1 %v3734_v35  ;;  %2887 = vmatprep.subr.bf16.mxu0 %v3734_v35 }
 0x60d   : >> { %2828 = vmatpush3.bf16.msra.mxu1 %v3260_v59  ;;  %2888 = vmatpush3.bf16.msra.mxu0 %v3261_v60 }
 0x60e   : >> { %2829 = vmatprep.subr.bf16.mxu1 %v3734_v35  ;;  %2889 = vmatprep.subr.bf16.mxu0 %v3734_v35 }
 0x611   : >> { %2830 = vmatpush3.bf16.msra.mxu1 %v3262_v61  ;;  %2890 = vmatpush3.bf16.msra.mxu0 %v3263_v62 }
 0x612   : >> { %2835 = vmatprep.subr.bf16.mxu1 %v3734_v35  ;;  %2895 = vmatprep.subr.bf16.mxu0 %v3734_v35 }
 0x614   : >> { %2832 = vmatmul.mubr.bf16.vlgmr.msra.gmra.mrb[0].mxu1 %v4262_v63  ;;  %2892 = vmatmul.mubr.bf16.vlgmr.msra.gmra.mrb[4].mxu0 %v4262_v63 }
 0x615   : >> { %2836 = vmatpush3.bf16.msra.mxu1 %v3264_v0  ;;  %2896 = vmatpush3.bf16.msra.mxu0 %v3265_v57 }
 0x616   : >> { %2837 = vmatprep.subr.bf16.mxu1 %v3734_v35  ;;  %2897 = vmatprep.subr.bf16.mxu0 %v3734_v35 }
 0x617   : >> { %2851 = vmatprep.mubr.msk.bf16.mxu1 %vm3735_vm1, %v3734_v35  ;;  %2911 = vmatprep.mubr.msk.bf16.mxu0 %vm3735_vm1, %v3734_v35 }
 0x619   : >> { %2838 = vmatpush3.bf16.msra.mxu1 %v3266_v1  ;;  %2898 = vmatpush3.bf16.msra.mxu0 %v3267_v2  ;;  %v3015_v2 = vadd.f32 %v4145_v28, %v4130_v25 }
 0x61a   : >> { %2839 = vmatprep.subr.bf16.mxu1 %v3734_v35  ;;  %2899 = vmatprep.subr.bf16.mxu0 %v3734_v35 }
 0x61d   : >> { %2840 = vmatpush3.bf16.msra.mxu1 %v3268_v33  ;;  %2900 = vmatpush3.bf16.msra.mxu0 %v3269_v3 }
 0x61e   : >> { %2841 = vmatprep.subr.bf16.mxu1 %v3734_v35  ;;  %2901 = vmatprep.subr.bf16.mxu0 %v3734_v35 }
 0x621   : >> { %2842 = vmatpush3.bf16.msra.mxu1 %v3270_v4  ;;  %2902 = vmatpush3.bf16.msra.mxu0 %v3271_v5 }
 0x622   : >> { %2843 = vmatprep.subr.bf16.mxu1 %v3734_v35  ;;  %2903 = vmatprep.subr.bf16.mxu0 %v3734_v35 }
 0x625   : >> { %2844 = vmatpush3.bf16.msra.mxu1 %v3272_v6  ;;  %2904 = vmatpush3.bf16.msra.mxu0 %v3273_v7 }
 0x626   : >> { %2845 = vmatprep.subr.bf16.mxu1 %v3734_v35  ;;  %2905 = vmatprep.subr.bf16.mxu0 %v3734_v35 }
 0x629   : >> { %2846 = vmatpush3.bf16.msra.mxu1 %v3274_v8  ;;  %2906 = vmatpush3.bf16.msra.mxu0 %v3275_v9 }
 0x62a   : >> { %2847 = vmatprep.subr.bf16.mxu1 %v3734_v35  ;;  %2907 = vmatprep.subr.bf16.mxu0 %v3734_v35 }
 0x62d   : >> { %2848 = vmatpush3.bf16.msra.mxu1 %v3276_v10  ;;  %2908 = vmatpush3.bf16.msra.mxu0 %v3277_v11 }
 0x62e   : >> { %2849 = vmatprep.subr.bf16.mxu1 %v3734_v35  ;;  %2909 = vmatprep.subr.bf16.mxu0 %v3734_v35 }
 0x631   : >> { %2850 = vmatpush3.bf16.msra.mxu1 %v3278_v12  ;;  %2910 = vmatpush3.bf16.msra.mxu0 %v3279_v14  ;;  %v3017_v14 = vadd.f32 %v4150_v29, %v4135_v26 }
 0x632   : >> { %2915 = vmatprep.subr.bf16.mxu1 %v3734_v35  ;;  %2935 = vmatprep.subr.bf16.mxu0 %v3734_v35 }
 0x634   : >> { %2852 = vmatmul.mubr.bf16.vlgmr.msra.gmra.mrb[0].mxu1 %v4192_v43  ;;  %2912 = vmatmul.mubr.bf16.vlgmr.msra.gmra.mrb[4].mxu0 %v4192_v43 }
 0x635   : >> { %2916 = vmatpush3.bf16.msra.mxu1 %v3280_v15  ;;  %2936 = vmatpush3.bf16.msra.mxu0 %v3281_v16 }
 0x636   : >> { %2917 = vmatprep.subr.bf16.mxu1 %v3734_v35  ;;  %2937 = vmatprep.subr.bf16.mxu0 %v3734_v35 }
 0x637   : >> { %2931 = vmatprep.mubr.msk.bf16.mxu1 %vm3735_vm1, %v3734_v35  ;;  %2951 = vmatprep.mubr.msk.bf16.mxu0 %vm3735_vm1, %v3734_v35 }
 0x639   : >> { %2918 = vmatpush3.bf16.msra.mxu1 %v3282_v17  ;;  %2938 = vmatpush3.bf16.msra.mxu0 %v3283_v18 }
 0x63a   : >> { %2919 = vmatprep.subr.bf16.mxu1 %v3734_v35  ;;  %2939 = vmatprep.subr.bf16.mxu0 %v3734_v35 }
 0x63d   : >> { %2920 = vmatpush3.bf16.msra.mxu1 %v3284_v19  ;;  %2940 = vmatpush3.bf16.msra.mxu0 %v3285_v20 }
 0x63e   : >> { %2921 = vmatprep.subr.bf16.mxu1 %v3734_v35  ;;  %2941 = vmatprep.subr.bf16.mxu0 %v3734_v35 }
 0x641   : >> { %2922 = vmatpush3.bf16.msra.mxu1 %v3286_v21  ;;  %2942 = vmatpush3.bf16.msra.mxu0 %v3287_v22 }
 0x642   : >> { %2923 = vmatprep.subr.bf16.mxu1 %v3734_v35  ;;  %2943 = vmatprep.subr.bf16.mxu0 %v3734_v35 }
 0x645   : >> { %2924 = vmatpush3.bf16.msra.mxu1 %v3288_v23  ;;  %2944 = vmatpush3.bf16.msra.mxu0 %v3289_v34 }
 0x646   : >> { %2925 = vmatprep.subr.bf16.mxu1 %v3734_v35  ;;  %2945 = vmatprep.subr.bf16.mxu0 %v3734_v35 }
 0x649   : >> { %2926 = vmatpush3.bf16.msra.mxu1 %v3290_v36  ;;  %2946 = vmatpush3.bf16.msra.mxu0 %v3291_v37 }
 0x64a   : >> { %2927 = vmatprep.subr.bf16.mxu1 %v3734_v35  ;;  %2947 = vmatprep.subr.bf16.mxu0 %v3734_v35 }
 0x64d   : >> { %2928 = vmatpush3.bf16.msra.mxu1 %v3292_v38  ;;  %2948 = vmatpush3.bf16.msra.mxu0 %v3293_v39 }
 0x64e   : >> { %2929 = vmatprep.subr.bf16.mxu1 %v3734_v35  ;;  %2949 = vmatprep.subr.bf16.mxu0 %v3734_v35 }
 0x651   : >> { %2930 = vmatpush3.bf16.msra.mxu1 %v3294_v40  ;;  %2950 = vmatpush3.bf16.msra.mxu0 %v3295_v41 }
 0x652   : >> { %2955 = vmatprep.subr.bf16.mxu1 %v3734_v35  ;;  %2975 = vmatprep.subr.bf16.mxu0 %v3734_v35 }
 0x654   : >> { %2932 = vmatmul.mubr.bf16.vlgmr.msra.gmra.mrb[4].mxu1 %v4238_v47  ;;  %2952 = vmatmul.mubr.bf16.vlgmr.msra.gmra.mrb[8].mxu0 %v4262_v63  ;;  %v3300_v47 = vld [vmem:[#allocation16 + $0xa0] sm:$0xff]  }
 0x655   : >> { %2956 = vmatpush3.bf16.msra.mxu1 %v3296_v42  ;;  %2971 = vmatprep.mubr.msk.bf16.mxu1 %vm3735_vm1, %v3734_v35 }
 0x656   : >> { %2957 = vmatprep.subr.bf16.mxu1 %v3734_v35  ;;  %2991 = vmatprep.mubr.msk.bf16.mxu0 %vm3735_vm1, %v3734_v35 }
 0x657   : >> { %2976 = vmatpush3.bf16.msra.mxu0 %v3304_v51 }
 0x658   : >> { %2977 = vmatprep.subr.bf16.mxu0 %v3734_v35 }
 0x659   : >> { %2958 = vmatpush3.bf16.msra.mxu1 %v3297_v44 }
 0x65a   : >> { %2959 = vmatprep.subr.bf16.mxu1 %v3734_v35 }
 0x65b   : >> { %2978 = vmatpush3.bf16.msra.mxu0 %v3305_v52 }
 0x65c   : >> { %2979 = vmatprep.subr.bf16.mxu0 %v3734_v35 }
 0x65d   : >> { %2960 = vmatpush3.bf16.msra.mxu1 %v3298_v45 }
 0x65e   : >> { %2961 = vmatprep.subr.bf16.mxu1 %v3734_v35 }
 0x65f   : >> { %2980 = vmatpush3.bf16.msra.mxu0 %v3306_v53 }
 0x660   : >> { %2981 = vmatprep.subr.bf16.mxu0 %v3734_v35 }
 0x661   : >> { %2962 = vmatpush3.bf16.msra.mxu1 %v3299_v46 }
 0x662   : >> { %2963 = vmatprep.subr.bf16.mxu1 %v3734_v35 }
 0x663   : >> { %2982 = vmatpush3.bf16.msra.mxu0 %v3307_v54 }
 0x664   : >> { %2983 = vmatprep.subr.bf16.mxu0 %v3734_v35 }
 0x665   : >> { %2964 = vmatpush3.bf16.msra.mxu1 %v3300_v47 }
 0x666   : >> { %2965 = vmatprep.subr.bf16.mxu1 %v3734_v35 }
 0x669   : >> { %2966 = vmatpush3.bf16.msra.mxu1 %v3301_v48 }
 0x66a   : >> { %2967 = vmatprep.subr.bf16.mxu1 %v3734_v35 }
 0x66d   : >> { %2968 = vmatpush3.bf16.msra.mxu1 %v3302_v49 }
 0x66e   : >> { %2969 = vmatprep.subr.bf16.mxu1 %v3734_v35 }
 0x671   : >> { %2970 = vmatpush3.bf16.msra.mxu1 %v3303_v50 }
 0x672   : >> { %2995 = vmatprep.subr.bf16.mxu1 %v3734_v35 }
 0x674   : >> { %2972 = vmatmul.mubr.bf16.vlgmr.msra.gmra.mrb[8].mxu1 %v4192_v43  ;;  %v3308_v43 = vld [vmem:[#allocation17 + $0x20] sm:$0xff]  }
 0x675   : >> { %3011 = vmatprep.mubr.msk.bf16.mxu1 %vm3735_vm1, %v3734_v35  ;;  %2984 = vmatpush3.bf16.msra.mxu0 %v3308_v43 }
 0x676   : >> { %2985 = vmatprep.subr.bf16.mxu0 %v3734_v35 }
 0x679   : >> { %2986 = vmatpush3.bf16.msra.mxu0 %v3309_v55 }
 0x67a   : >> { %2987 = vmatprep.subr.bf16.mxu0 %v3734_v35 }
 0x67d   : >> { %2988 = vmatpush3.bf16.msra.mxu0 %v3310_v56 }
 0x67e   : >> { %2989 = vmatprep.subr.bf16.mxu0 %v3734_v35 }
 0x681   : >> { %2990 = vmatpush3.bf16.msra.mxu0 %v3311_v58 }
 0x707   : >> { %v1343_v59 = vpop.f32.mrb[0].mxu1  ;;  %v1671_v60 = vpop.f32.mrb[4].mxu0 }
 0x708   : >> { %v2853_v61 = vpop.f32.mrb[1].mxu1  ;;  %v2913_v62 = vpop.f32.mrb[5].mxu0  ;;  %v3016_v33 = vadd.f32 %v3015_v2, %v1343_v59  ;;  %v3018_v15 = vadd.f32 %v3017_v14, %v1671_v60 }
 0x709   : >> { %v1346_v63 = vpop.f32.mrb[2].mxu1  ;;  %v1674_v0 = vpop.f32.mrb[6].mxu0 }
 0x70a   : >> { %v2854_v57 = vpop.f32.mrb[3].mxu1  ;;  %v2914_v1 = vpop.f32.mrb[7].mxu0  ;;  %v2598_v10 = vmul.f32 -1.442695, %v3016_v33  ;;  %v2599_v16 = vmul.f32 -1.442695, %v3018_v15 }
 0x70b   : >> { %v3319_v15 = vld [vmem:[#allocation8 + $0x38] sm:$0xff]  }
 0x70c   : >> { %3330 = vpow2.f32 %v2598_v10 }
 0x70d   : >> { %3332 = vpow2.f32 %v2599_v16 }
 0x716   : >> { %v3331_v17 = vpop.eup %3330 }
 0x717   : >> { %v2009_v18 = vadd.f32 1.0, %v3331_v17  ;;  %v3333_v19 = vpop.eup %3332 }
 0x718   : >> { %v2016_v20 = vadd.f32 1.0, %v3333_v19 }
 0x719   : >> { %3334 = vrcp.f32 %v2009_v18 }
 0x71a   : >> { %3336 = vrcp.f32 %v2016_v20 }
 0x723   : >> { %v3335_v34 = vpop.eup %3334 }
 0x724   : >> { %v3337_v41 = vpop.eup %3336 }
 0x725   : >> { %v2022_v42 = vsub.f32 1.0, %v3337_v41  ;;  %v2024_v46 = vmul.f32 %v3716_v32, %v3337_v41 }
 0x727   : >> { %v1793_v3 = vpop.f32.mrb[4].mxu1  ;;  %v1881_v4 = vpop.f32.mrb[8].mxu0 }
 0x728   : >> { %v1882_v5 = vadd.f32 %v1881_v4, %v1793_v3  ;;  %v2933_v6 = vpop.f32.mrb[5].mxu1  ;;  %v2953_v7 = vpop.f32.mrb[9].mxu0  ;;  %v3312_v3 = vld [vmem:[#allocation8] sm:$0xff]   ;;  %v3313_v4 = vld [vmem:[#allocation8 + $0x8] sm:$0xff]  }
 0x729   : >> { %v1796_v8 = vpop.f32.mrb[6].mxu1  ;;  %v1884_v9 = vpop.f32.mrb[10].mxu0  ;;  %2996 = vmatpush3.bf16.msra.mxu1 %v3312_v3  ;;  %v3315_v6 = vld [vmem:[#allocation8 + $0x18] sm:$0xff]   ;;  %v3316_v7 = vld [vmem:[#allocation8 + $0x20] sm:$0xff]  }
 0x72a   : >> { %v2934_v11 = vpop.f32.mrb[7].mxu1  ;;  %v2954_v12 = vpop.f32.mrb[11].mxu0  ;;  %v1893_v37 = vadd.f32 %v4140_v27, %v1882_v5  ;;  %2997 = vmatprep.subr.bf16.mxu1 %v3734_v35  ;;  %v3314_v5 = vld [vmem:[#allocation8 + $0x10] sm:$0xff]   ;;  %v3317_v8 = vld [vmem:[#allocation8 + $0x28] sm:$0xff]  }
 0x72b   : >> { %v3318_v9 = vld [vmem:[#allocation8 + $0x30] sm:$0xff]  }
 0x72d   : >> { %2998 = vmatpush3.bf16.msra.mxu1 %v3313_v4 }
 0x72e   : >> { %2999 = vmatprep.subr.bf16.mxu1 %v3734_v35 }
 0x731   : >> { %3000 = vmatpush3.bf16.msra.mxu1 %v3314_v5 }
 0x732   : >> { %3001 = vmatprep.subr.bf16.mxu1 %v3734_v35 }
 0x735   : >> { %3002 = vmatpush3.bf16.msra.mxu1 %v3315_v6 }
 0x736   : >> { %3003 = vmatprep.subr.bf16.mxu1 %v3734_v35 }
 0x739   : >> { %3004 = vmatpush3.bf16.msra.mxu1 %v3316_v7 }
 0x73a   : >> { %3005 = vmatprep.subr.bf16.mxu1 %v3734_v35 }
 0x73d   : >> { %3006 = vmatpush3.bf16.msra.mxu1 %v3317_v8 }
 0x73e   : >> { %3007 = vmatprep.subr.bf16.mxu1 %v3734_v35 }
 0x741   : >> { %3008 = vmatpush3.bf16.msra.mxu1 %v3318_v9 }
 0x742   : >> { %3009 = vmatprep.subr.bf16.mxu1 %v3734_v35 }
 0x745   : >> { %3010 = vmatpush3.bf16.msra.mxu1 %v3319_v15 }
 0x747   : >> { %v1999_v21 = vpop.f32.mrb[8].mxu1 }
 0x748   : >> { %v2000_v22 = vadd.f32 %v4155_v30, %v1999_v21  ;;  %v2973_v23 = vpop.f32.mrb[9].mxu1  ;;  %v3738_v21 = vmov 1.0|1.0  }
 0x749   : >> { %v2002_v36 = vpop.f32.mrb[10].mxu1 }
 0x74a   : >> { %v2019_v38 = vmul.f32 %v3335_v34, %v2000_v22  ;;  %v2974_v39 = vpop.f32.mrb[11].mxu1 }
 0x74c   : >> { %v2020_v40 = vadd.f32 %v2019_v38, %v1893_v37 }
 0x74e   : >> { %3338 = vtanh.f32 %v2020_v40 }
 0x758   : >> { %v3339_v44 = vpop.eup %3338 }
 0x759   : >> { %v2023_v45 = vmul.f32 %v3339_v44, %v2022_v42 }
 0x75b   : >> { %v4341_v32 = vadd.f32 %v2024_v46, %v2023_v45  }
 0x75d   : >> { %v4509_v47 = vmov %v4341_v32 }
 0x75e   : >> { %v2026_v48 = vpack.c.bf16 %v4509_v47, %v4509_v47  ;;  %2282 = vst [vmem:[#allocation20] sm:$0x3] (%p742_p4), %v4509_v47  ;;  %2280 = vst [vmem:[#allocation3] sm:$0x3] (%p742_p4), %v4509_v47 }
 0x760   : >> { %2992 = vmatmul.mubr.bf16.vlgmr.msra.gmra.mrb[12].mxu0 %v2026_v48 }
 0x833   : >> { %v2131_v49 = vpop.f32.mrb[12].mxu0 }
 0x834   : >> { %v2132_v50 = vadd.f32 %v4160_v31, %v2131_v49  ;;  %v2993_v51 = vpop.f32.mrb[13].mxu0 }
 0x835   : >> { %v2134_v52 = vpop.f32.mrb[14].mxu0 }
 0x836   : >> { %v2994_v53 = vpop.f32.mrb[15].mxu0  ;;  %v2138_v54 = vsel %vm2137_vm4, %v2132_v50, -inf }
 0x837   : >> { %2139 = vmax.xlane.f32.xlu1 %v2138_v54 }
 0x8c4   : >> { %v2140_v43 = vpop.xlane.xlu1 %2139 }
 0x8c5   : >> { %v2141_v55 = vsub.f32 %v2132_v50, %v2140_v43 }
 0x8c7   : >> { %v2142_v56 = vmul.f32 1.442695, %v2141_v55 }
 0x8c9   : >> { %3340 = vpow2.f32 %v2142_v56 }
 0x8d3   : >> { %v3341_v32 = vpop.eup %3340 }
 0x8d4   : >> { %v2144_v58 = vsel %vm2137_vm4, %v3341_v32, 0.0  ;;  %v4511_v32 = vmov %v4509_v47 }
 0x8d5   : >> { %2145 = vadd.xlane.f32.xlu0 %v2144_v58 }
 0x962   : >> { %v2146_v59 = vpop.xlane.xlu0 %2145 }
 0x963   : >> { %3342 = vlog2.f32 %v2146_v59 }
 0x96d   : >> { %v3343_v60 = vpop.eup %3342 }
 0x96e   : >> { %v2148_v61 = vmul.f32 0.6931472, %v3343_v60 }
 0x970   : >> { %v2149_v62 = vadd.f32 %v2148_v61, %v2140_v43 }
 0x972   : >> { %v2150_v63 = vsub.f32 %v2132_v50, %v2149_v62  ;;  %v2154_v0 = vsub.f32 %v2140_v43, %v2149_v62 }
 0x974   : >> { %2153 = vst [vmem:[%s2152_s1] sm:$0x3] %v2150_v63  ;;  %vm2155_vm5 = vcmp.eq.f32.partialorder %v2150_v63, %v2154_v0 }
 0x975   : >> { %v2156_v57 = vsel %vm2155_vm5, %v4210_v13, 128 }
 0x976   : >> { %v2157_v1 = vsel %vm2137_vm4, %v2156_v57, 2147483647 }
 0x977   : >> { %v2159_v2 = vshra.s32 %v2157_v1, 16  ;;  %v2158_v10 = vand.u32 65535, %v2157_v1 }
 0x979   : >> { %v2161_v33 = vcvt.s32.f32 %v2159_v2  ;;  %v2160_v12 = vcvt.s32.f32 %v2158_v10 }
 0x97b   : >> { %2162 = vmin.xlane.f32.xlu1 %v2161_v33 }
 0xa08   : >> { %v2163_v11 = vpop.xlane.xlu1 %2162 }
 0xa09   : >> { %vm2164_vm6 = vcmp.eq.f32.partialorder %v2161_v33, %v2163_v11  ;;  %v2169_v16 = vcvt.f32.s32 %v2163_v11 }
 0xa0a   : >> { %v2165_v14 = vsel %vm2164_vm6, %v2160_v12, inf }
 0xa0b   : >> { %2166 = vmin.xlane.f32.xlu1 %v2165_v14  ;;  %v2170_v18 = vshll.u32 %v2169_v16, 16 }
 0xa98   : >> { %v2167_v17 = vpop.xlane.xlu1 %2166 }
 0xa99   : >> { %v2168_v19 = vcvt.f32.s32 %v2167_v17 }
 0xa9b   : >> { %v2171_v20 = vadd.s32 %v2170_v18, %v2168_v19 }
 0xa9d   : >> { %vm2172_vm7 = vcmp.eq.s32.totalorder %v4210_v13, %v2171_v20 }
 0xa9e   : >> { %vm2619_vm8 = vmpackc.low %vm2172_vm7, %vm2172_vm7 }
 0xa9f   : >> { %3012 = vmatmul.mubr.msk.bf16.vlgmr.msra.gmra.mrb[12].mxu1 %vm2619_vm8, %v3738_v21 }
 0xb6f   : > { %744 = sbr.rel (!%p742_p4) target bundleno = 495 (0x1ef), region = 165 }
 0xb72   : >> { %v2274_v22 = vpop.f32.mrb[12].mxu1  }
 0xb73   : >> { %v3013_v35 = vpop.f32.mrb[13].mxu1  ;;  %v4510_v33 = vmov %v2274_v22  ;;  %2281 = vst [vmem:[#allocation4] sm:$0x3] (%p742_p4), %v2274_v22 }
 0xb74   : >> { %v2277_v23 = vpop.f32.mrb[14].mxu1 }
 0xb75   : >> { %v3014_v34 = vpop.f32.mrb[15].mxu1 }
 0xb76   : > { %3581 = shalt.err (!%p3578_p7)
}
 0xb77   : > { %s3582_s21 = scalar_lea.hbm %s4375_s27, 64  ;;  %s3586_s22 = scalar_lea.hbm %s4513_s19, 192 }
 0xb78   : > { %p3583_p9 = scmp.ne.s32.totalorder %s4375_s27, %s3582_s21  ;;  %p3587_p1 = scmp.lt.u32.totalorder %s4375_s27, %s4513_s19 }
 0xb79   : > { %p3588_p13 = scmp.lt.u32.totalorder %s3586_s22, %s3582_s21  ;;  %p3590_p8 = scmp.lt.u32.totalorder %s3582_s21, %s4375_s27 }
 0xb7a   : > { %p3584_p12 = pnand %p3583_p9, %p4514_p10 }
 0xb7b   : > { %p3589_p4 = por %p3588_p13, %p3587_p1 }
 0xb7c   : > { %p3585_p2 = pneg %p3584_p12 }
 0xb7d   : > { %p3591_p11 = por %p3590_p8, %p3589_p4 }
 0xb7f   : > { %p3592_p0 = pnand %p3591_p11, %p3585_p2 }
 0xb81   : > { %3595 = shalt.err (!%p3592_p0)
}
 0xb82   : > { %s3740_s1 = smov 32   ;;  %s4515_s23 = sld [smem:[#allocation33_spill]] }
 0xb83   : > { %s3741_s12 = smov 2   ;;  %s3742_s15 = smov [#allocation20]  }
 0xb84   : > { %3067 = dma.vmem_to_hbm [thread:$0]  (%p4514_p10), %s4379_s13, 64, %s4375_s27, %s4383_s14, %s3740_s1, %s3740_s1, %s3741_s12  }
 0xb85   : > { %s2314_s29 = sshll.u32 %s3742_s15, 4  ;;  %s2315_s29 = int_to_ptr.vmem [resolvable:$true] %s2314_s29 }
 0xb86   : > { %s3596_s16 = scalar_lea.vmem %s2315_s29, 32  ;;  %p3603_p9 = scmp.lt.s32.totalorder %s2315_s29, %s2315_s29 }
 0xb87   : > { %p3597_p3 = scmp.ne.s32.totalorder %s2315_s29, %s3596_s16  ;;  %p3604_p12 = scmp.lt.s32.totalorder %s3596_s16, %s3596_s16 }
 0xb88   : > { %p4516_p5 = scmp.ne.s32.totalorder %s4515_s23, 0 }
 0xb89   : > { %p3605_p2 = por %p3604_p12, %p3603_p9 }
 0xb8a   : > { %p3598_p6 = pnand %p3597_p3, %p4516_p5 }
 0xb8c   : > { %p3599_p7 = pneg %p3598_p6 }
 0xb8e   : > { %p3606_p1 = pnand %p3605_p2, %p3599_p7 }
 0xb90   : > { %3609 = shalt.err (!%p3606_p1)
}
 0xb91   : > { %s4517_s21 = sld [smem:[#allocation41_spill]] }
 0xb97   : > { %s3610_s28 = scalar_lea.hbm %s4517_s21, 32 }
 0xb98   : > { %p3611_p10 = scmp.ne.s32.totalorder %s4517_s21, %s3610_s28  ;;  %p3616_p8 = scmp.lt.u32.totalorder %s3610_s28, %s4517_s21 }
 0xb9a   : > { %p3612_p13 = pnand %p3611_p10, %p4516_p5 }
 0xb9c   : > { %p3613_p4 = pneg %p3612_p13 }
 0xb9e   : > { %p3618_p11 = pnand %p3616_p8, %p3613_p4 }
 0xba0   : > { %3621 = shalt.err (!%p3618_p11)
}
 0xba1   : > { %3069 = dma.vmem_to_hbm [thread:$0]  (%p4516_p5), %s2315_s29, 32, %s4517_s21, [#allocation21]  }
 0xba2   : > { %3679 = dma.done.wait (%p4516_p5), [#allocation21], 32  }
 0xba3   : > { %3681 = vsyncadd (%p4516_p5), [#allocation21], 4294967264 }
 0xba4 PF: > { %s4518_s25 = sld [smem:[#allocation32_spill]]  ;;  %s4519_s17 = sld [smem:[#allocation29_spill]] }
 0xba5   : > { %s4520_s1 = sld [smem:[#allocation36_spill]] }
 0xbaa   : > { %p3120_p0 = scmp.ge.s32.totalorder %s4518_s25, 2  ;;  %s2330_s12 = sand.u32 1, %s4519_s17  }
 0xbab   : > { %p4521_p3 = scmp.ne.s32.totalorder %s4520_s1, 0  ;;  %s2331_s15 = scalar_lea.sflag [#allocation7], %s2330_s12 }
 0xbad   : > { %p3099_p6 = pnand %p3120_p0, %p4521_p3 }
 0xbaf   : > { %3683 = dma.done.wait (!%p3099_p6), %s2331_s15, 64  }
 0xbb0   : > { %3685 = vsyncadd (!%p3099_p6), %s2331_s15, 4294967232  ;;  %s34_s18 = sadd.s32 1, %s4518_s25   ;;  %s4522_s16 = sld [smem:[#allocation30_spill]] }
 0xbb1   : > { %p31_p7 = scmp.ge.s32.totalorder %s34_s18, 5   ;;  %s4523_s15 = sld [smem:[#allocation37_spill]] }
 0xbb2   : > { %s4524_s26 = sld [smem:[#allocation31_spill]]  ;;  %s4525_s17 = sld [smem:[#allocation34_spill]] }
 0xbb3   : > { %s4526_s29 = smov %s3692_s30  ;;  %33 = sbr.rel (!%p31_p7) target bundleno = 15 (0xf), region = 176 }
 0xbb6   : > { %s4527_s30 = smov %s4522_s16 }
 0xbb8   : > { %s4528_s16 = smov %s4524_s26 }
 0xbba   :  { %2336 = vsyncpa [#allocation6], 1 }
 0xbbb   :  { %2338 = vsyncpa [#allocation6 + $0x1], 1 }
 0xbbc   :  { %2339 = vsyncpa [#allocation9], 1 }
 0xbbd   :  { %2340 = vsyncpa [#allocation12], 1 }
 0xbbe   :  { %2341 = vsyncpa [#allocation15], 1 }
 0xbbf   :  { %2342 = vsyncpa [#allocation18], 1 }
 0xbc0   :  { %2343 = vsyncpa [#allocation7], 1 }
 0xbc1   :  { %2345 = vsyncpa [#allocation7 + $0x1], 1 }
 0xbc2   :  { %2346 = vsyncpa [#allocation21], 1 }

// kernel: tpu_custom_call.1
= control target key start
LH: loop header
LB: loop body
LE: loop exit
PB: predicated region body
PF: predicated region fallthrough
CT: control target
= control target key end

     0   :  { %s4451_s0 = inlined_call_operand.hbm [shape: bf16[2,8,128], index: 0, kind: input, shape index: {}]   ;;  %s4452_s1 = inlined_call_operand.hbm [shape: bf16[128,128], index: 1, kind: input, shape index: {}]   ;;  %s4453_s2 = inlined_call_operand.hbm [shape: bf16[128,128], index: 2, kind: input, shape index: {}]   ;;  %s4454_s3 = inlined_call_operand.hbm [shape: bf16[128,128], index: 3, kind: input, shape index: {}]   ;;  %s4455_s4 = inlined_call_operand.vmem [shape: f32[1,128], index: 4, kind: input, shape index: {}]   ;;  %s4456_s5 = inlined_call_operand.vmem [shape: f32[1,128], index: 5, kind: input, shape index: {}]   ;;  %s4457_s6 = inlined_call_operand.hbm [shape: bf16[3,128,128], index: 6, kind: input, shape index: {}]   ;;  %s4458_s7 = inlined_call_operand.hbm [shape: bf16[3,128,128], index: 7, kind: input, shape index: {}]   ;;  %s4459_s8 = inlined_call_operand.vmem [shape: f32[3,1,128], index: 8, kind: input, shape index: {}]   ;;  %s4460_s9 = inlined_call_operand.hbm [shape: bf16[3,128,128], index: 9, kind: input, shape index: {}]   ;;  %s4461_s10 = inlined_call_operand.vmem [shape: f32[3,1,128], index: 10, kind: input, shape index: {}]   ;;  %s4462_s11 = inlined_call_operand.hbm [shape: bf16[128,128], index: 11, kind: input, shape index: {}]   ;;  %s4463_s12 = inlined_call_operand.vmem [shape: f32[1,128], index: 12, kind: input, shape index: {}]   ;;  %s4464_s13 = inlined_call_operand.hbm [shape: f32[6,2,128], index: 13, kind: output, shape index: {0}]   ;;  %s4465_s14 = inlined_call_operand.hbm [shape: f32[2,128], index: 14, kind: output, shape index: {1}]  }
   0x1   :  { %4485 = sst [smem:[#allocation38_spill]] %s4452_s1 }
   0x2   :  { %4486 = sst [smem:[#allocation39_spill]] %s4463_s12 }
   0x3   :  { %4487 = sst [smem:[#allocation40_spill]] %s4464_s13 }
   0x4   :  { %4488 = sst [smem:[#allocation41_spill]] %s4465_s14 }
   0x5   :  { %20 = vsyncpa [#allocation6], 0 }
   0x6   :  { %21 = vsyncpa [#allocation9], 0 }
   0x7   :  { %22 = vsyncpa [#allocation12], 0 }
   0x8   :  { %23 = vsyncpa [#allocation15], 0 }
   0x9   :  { %24 = vsyncpa [#allocation18], 0 }
   0xa   :  { %25 = vsyncpa [#allocation7], 0 }
   0xb   :  { %27 = vsyncpa [#allocation7 + $0x1], 0 }
   0xc   :  { %28 = vsyncpa [#allocation21], 0  ;;  %s3818_s29 = smov 0   ;;  %s3820_s30 = smov 0  }
   0xd   :  { %s3822_s15 = smov 0   ;;  %s3824_s16 = smov 0  }
   0xe   :  { %s3826_s17 = smov 0   ;;  %s3828_s18 = smov 0  }
   0xf LB: > { %4489 = sst [smem:[#allocation29_spill]] %s3688_s29  ;;  %s2478_s19 = sadd.s32 4294967295, %s3708_s18   ;;  %s3708_s18 = sphi %s3828_s18, %s34_s18   ;;  %s3704_s17 = sphi %s3826_s17, %s4525_s17   ;;  %s3700_s16 = sphi %s3824_s16, %s4528_s16   ;;  %s3696_s15 = sphi %s3822_s15, %s4523_s15   ;;  %s3692_s30 = sphi %s3820_s30, %s4527_s30   ;;  %s3688_s29 = sphi %s3818_s29, %s4526_s29  }
  0x10   : > { %4490 = sst [smem:[#allocation30_spill]] %s3696_s15  ;;  %s2479_s20 = sadd.s32 4294967294, %s3708_s18  }
  0x11   : > { %4491 = sst [smem:[#allocation31_spill]] %s3704_s17  ;;  %s43_s21 = sadd.s32 1, %s3704_s17 }
  0x12   : > { %4492 = sst [smem:[#allocation32_spill]] %s3708_s18  ;;  %s333_s22 = sadd.s32 1, %s3696_s15 }
  0x13   : > { %p44_p0 = scmp.ge.s32.totalorder %s43_s21, 3  ;;  %p343_p1 = scmp.ne.s32.totalorder %s3696_s15, %s3692_s30 }
  0x14   : > { %p3854_p2 = scmp.eq.s32.totalorder %s2478_s19, 2  ;;  %p349_p3 = scmp.ne.s32.totalorder %s3692_s30, %s3688_s29 }
  0x15   : > { %s4530_s21 = smov (%p44_p0, %s43_s21), 0  ;;  %p350_p5 = scmp.eq.s32.totalorder %s2479_s20, 2 }
  0x16   : > { %s4493_s23 = scalar_select %p3854_p2, 1, 0 }
  0x17   : > { %4495 = sst [smem:[#allocation34_spill]] %s4530_s21  ;;  %p3864_p4 = por %p3854_p2, %p343_p1 }
  0x18   : > { %4494 = sst [smem:[#allocation33_spill]] %s4493_s23  ;;  %s328_s25 = ssub.s32 %s3704_s17, %s4530_s21 }
  0x19   : > { %s4496_s24 = scalar_select %p3864_p4, 1, 0 }
  0x1a   : > { %p2480_p6 = scmp.ge.s32.totalorder %s3708_s18, 1  ;;  %p331_p7 = scmp.eq.s32.totalorder %s328_s25, 0 }
  0x1b   : > { %4497 = sst [smem:[#allocation35_spill]] %s4496_s24  ;;  %p3871_p8 = por %p350_p5, %p349_p3 }
  0x1c   : > { %p383_p9 = scmp.lt.s32.totalorder %s3708_s18, 4  ;;  %p3883_p11 = scmp.eq.s32.totalorder %s2478_s19, 0 }
  0x1d   : > { %s4498_s26 = scalar_select %p3871_p8, 1, 0 }
  0x1e   : > { %s3877_s27 = scalar_select %p331_p7, %s3696_s15, %s333_s22  }
  0x1f   : > { %4499 = sst [smem:[#allocation36_spill]] %s4498_s26  ;;  %p3879_p10 = pnand %p2480_p6, %p383_p9 }
  0x20   : > { %4500 = sst [smem:[#allocation37_spill]] %s3877_s27  ;;  %s3722_s20 = smov [#allocation8]  }
  0x21   : > { %s4501_s28 = scalar_select %p3879_p10, 1, 0 }
  0x22   : > { %s4502_s29 = scalar_select %p3883_p11, 1, 0 }
  0x23   : > { %p3073_p12 = pneg %p3879_p10  ;;  %s411_s25 = sshll.u32 %s3722_s20, 4  ;;  %s412_s25 = int_to_ptr.vmem [resolvable:$true] %s411_s25 }
  0x24   : > { %s3723_s22 = smov [#allocation11]   ;;  %s4504_s1 = sld [smem:[#allocation38_spill]] }
  0x25   : > { %p3891_p13 = pnand %p3883_p11, %p3073_p12  ;;  %s437_s17 = sshll.u32 %s3723_s22, 4  ;;  %s3895_s17 = int_to_ptr.vmem [resolvable:$true] %s437_s17 }
  0x27   : > { %p3905_p1 = pneg %p3891_p13 }
  0x2a   : > { %s3344_s15 = scalar_lea.hbm %s4504_s1, 1024 }
  0x2b   : > { %p3345_p0 = scmp.ne.s32.totalorder %s4504_s1, %s3344_s15  ;;  %p3351_p6 = scmp.lt.u32.totalorder %s3344_s15, %s4504_s1 }
  0x2d   : > { %p3347_p3 = pnand %p3905_p1, %p3345_p0 }
  0x2f   : > { %p3348_p5 = pneg %p3347_p3 }
  0x31   : > { %p3353_p7 = pnand %p3351_p6, %p3348_p5 }
  0x33   : > { %3356 = shalt.err (!%p3353_p7)
}
  0x34   : > { %s3357_s27 = scalar_lea.vmem %s412_s25, 1024  ;;  %p3365_p2 = scmp.lt.s32.totalorder %s412_s25, %s412_s25 }
  0x35   : > { %p3358_p9 = scmp.ne.s32.totalorder %s412_s25, %s3357_s27  ;;  %p3366_p4 = scmp.lt.s32.totalorder %s3357_s27, %s3357_s27 }
  0x37   : > { %p3360_p12 = pnand %p3358_p9, %p3905_p1  ;;  %p3367_p11 = por %p3366_p4, %p3365_p2 }
  0x39   : > { %p3361_p8 = pneg %p3360_p12 }
  0x3b   : > { %p3368_p10 = pnand %p3367_p11, %p3361_p8 }
  0x3d   : > { %3371 = shalt.err (!%p3368_p10)
}
  0x3e   : > { %s3724_s18 = smov 64   ;;  %s3725_s26 = smov 4  }
  0x3f   : > { %3079 = dma.hbm_to_vmem [thread:$0]  (!%p3891_p13), %s4504_s1, 1024, %s412_s25, [#allocation9], %s3724_s18, %s3724_s18, %s3725_s26  }
  0x40   : > { %s3372_s23 = scalar_lea.hbm %s4454_s3, 1024 }
  0x41   : > { %p3373_p2 = scmp.ne.s32.totalorder %s4454_s3, %s3372_s23  ;;  %p3379_p10 = scmp.lt.u32.totalorder %s3372_s23, %s4454_s3 }
  0x43   : > { %p3375_p4 = pnand %p3373_p2, %p3905_p1 }
  0x45   : > { %p3376_p8 = pneg %p3375_p4 }
  0x47   : > { %p3381_p11 = pnand %p3379_p10, %p3376_p8 }
  0x49   : > { %3384 = shalt.err (!%p3381_p11)
}
  0x4a   : > { %s3385_s25 = scalar_lea.vmem %s3895_s17, 1024  ;;  %p3393_p6 = scmp.lt.s32.totalorder %s3895_s17, %s3895_s17 }
  0x4b   : > { %p3386_p0 = scmp.ne.s32.totalorder %s3895_s17, %s3385_s25  ;;  %p3394_p7 = scmp.lt.s32.totalorder %s3385_s25, %s3385_s25 }
  0x4d   : > { %p3388_p3 = pnand %p3386_p0, %p3905_p1  ;;  %p3395_p9 = por %p3394_p7, %p3393_p6 }
  0x4f   : > { %p3389_p5 = pneg %p3388_p3 }
  0x51   : > { %p3396_p12 = pnand %p3395_p9, %p3389_p5 }
  0x53   : > { %3399 = shalt.err (!%p3396_p12)
}
  0x54   : > { %3085 = dma.hbm_to_vmem [thread:$0]  (!%p3891_p13), %s4454_s3, 1024, %s3895_s17, [#allocation12], %s3724_s18, %s3724_s18, %s3725_s26  }
  0x55   : > { %s3726_s23 = smov [#allocation14]   ;;  %s3400_s19 = scalar_lea.hbm %s4458_s7, 3072 }
  0x56   : > { %s469_s24 = sshll.u32 %s3726_s23, 4  ;;  %p3401_p2 = scmp.ne.s32.totalorder %s4458_s7, %s3400_s19  ;;  %s470_s24 = int_to_ptr.vmem [resolvable:$true] %s469_s24 }
  0x57   : > { %p3407_p10 = scmp.lt.u32.totalorder %s3400_s19, %s4458_s7 }
  0x58   : > { %p3403_p4 = pnand %p3401_p2, %p3905_p1 }
  0x5a   : > { %p3404_p8 = pneg %p3403_p4 }
  0x5c   : > { %p3409_p11 = pnand %p3407_p10, %p3404_p8 }
  0x5e   : > { %3412 = shalt.err (!%p3409_p11)
}
  0x5f   : > { %s3413_s17 = scalar_lea.vmem %s470_s24, 3072  ;;  %p3421_p6 = scmp.lt.s32.totalorder %s470_s24, %s470_s24 }
  0x60   : > { %p3414_p0 = scmp.ne.s32.totalorder %s470_s24, %s3413_s17  ;;  %p3422_p7 = scmp.lt.s32.totalorder %s3413_s17, %s3413_s17 }
  0x62   : > { %p3416_p3 = pnand %p3414_p0, %p3905_p1  ;;  %p3423_p9 = por %p3422_p7, %p3421_p6 }
  0x64   : > { %p3417_p5 = pneg %p3416_p3 }
  0x66   : > { %p3424_p12 = pnand %p3423_p9, %p3417_p5 }
  0x68   : > { %3427 = shalt.err (!%p3424_p12)
}
  0x69   : > { %3091 = dma.hbm_to_vmem [thread:$0]  (!%p3891_p13), %s4458_s7, 3072, %s470_s24, [#allocation15], %s3724_s18, %s3724_s18, %s3725_s26  }
  0x6a   : > { %s3727_s13 = smov [#allocation5]   ;;  %s3728_s14 = smov [#allocation10]  }
  0x6b   : > { %s398_s23 = sshll.u32 %s3727_s13, 4  ;;  %s424_s15 = sshll.u32 %s3728_s14, 4  ;;  %s399_s23 = int_to_ptr.vmem [resolvable:$true] %s398_s23  ;;  %s3971_s15 = int_to_ptr.vmem [resolvable:$true] %s424_s15 }
  0x6c   : > { %s3428_s27 = scalar_lea.hbm %s4451_s0, 128 }
  0x6d   : > { %p3429_p2 = scmp.ne.s32.totalorder %s4451_s0, %s3428_s27  ;;  %p3435_p10 = scmp.lt.u32.totalorder %s3428_s27, %s4451_s0 }
  0x6f   : > { %p3431_p4 = pnand %p3429_p2, %p3905_p1 }
  0x71   : > { %p3432_p8 = pneg %p3431_p4 }
  0x73   : > { %p3437_p11 = pnand %p3435_p10, %p3432_p8 }
  0x75   : > { %3440 = shalt.err (!%p3437_p11)
}
  0x76   : > { %s3441_s12 = scalar_lea.vmem %s399_s23, 128  ;;  %p3449_p6 = scmp.lt.s32.totalorder %s399_s23, %s399_s23 }
  0x77   : > { %p3442_p0 = scmp.ne.s32.totalorder %s399_s23, %s3441_s12  ;;  %p3450_p7 = scmp.lt.s32.totalorder %s3441_s12, %s3441_s12 }
  0x79   : > { %p3444_p3 = pnand %p3442_p0, %p3905_p1  ;;  %p3451_p9 = por %p3450_p7, %p3449_p6 }
  0x7b   : > { %p3445_p5 = pneg %p3444_p3 }
  0x7d   : > { %p3452_p12 = pnand %p3451_p9, %p3445_p5 }
  0x7f   : > { %3455 = shalt.err (!%p3452_p12)
}
  0x80   : > { %3076 = dma.hbm_to_vmem [thread:$0]  (!%p3891_p13), %s4451_s0, 128, %s399_s23, [#allocation6], %s3724_s18, %s3724_s18, %s3725_s26  }
  0x81   : > { %s3456_s27 = scalar_lea.hbm %s4453_s2, 1024 }
  0x82   : > { %p3457_p2 = scmp.ne.s32.totalorder %s4453_s2, %s3456_s27  ;;  %p3463_p10 = scmp.lt.u32.totalorder %s3456_s27, %s4453_s2 }
  0x84   : > { %p3459_p4 = pnand %p3457_p2, %p3905_p1 }
  0x86   : > { %p3460_p8 = pneg %p3459_p4 }
  0x88   : > { %p3465_p11 = pnand %p3463_p10, %p3460_p8 }
  0x8a   : > { %3468 = shalt.err (!%p3465_p11)
}
  0x8b   : > { %s3469_s23 = scalar_lea.vmem %s3971_s15, 1024  ;;  %p3477_p6 = scmp.lt.s32.totalorder %s3971_s15, %s3971_s15 }
  0x8c   : > { %p3470_p0 = scmp.ne.s32.totalorder %s3971_s15, %s3469_s23  ;;  %p3478_p7 = scmp.lt.s32.totalorder %s3469_s23, %s3469_s23 }
  0x8e   : > { %p3472_p3 = pnand %p3470_p0, %p3905_p1  ;;  %p3479_p9 = por %p3478_p7, %p3477_p6 }
  0x90   : > { %p3473_p5 = pneg %p3472_p3 }
  0x92   : > { %p3480_p12 = pnand %p3479_p9, %p3473_p5 }
  0x94   : > { %3483 = shalt.err (!%p3480_p12)
}
  0x95   : > { %3082 = dma.hbm_to_vmem [thread:$0]  (!%p3891_p13), %s4453_s2, 1024, %s3971_s15, [#allocation9], %s3724_s18, %s3724_s18, %s3725_s26  }
  0x96   : > { %s3729_s14 = smov [#allocation13]   ;;  %s3730_s22 = smov [#allocation16]  }
  0x97   : > { %s456_s19 = sshll.u32 %s3729_s14, 4  ;;  %s485_s27 = sshll.u32 %s3730_s22, 4  ;;  %s457_s19 = int_to_ptr.vmem [resolvable:$true] %s456_s19  ;;  %s4020_s27 = int_to_ptr.vmem [resolvable:$true] %s485_s27 }
  0x98   : > { %s3484_s1 = scalar_lea.hbm %s4457_s6, 3072 }
  0x99   : > { %p3485_p2 = scmp.ne.s32.totalorder %s4457_s6, %s3484_s1  ;;  %p3491_p10 = scmp.lt.u32.totalorder %s3484_s1, %s4457_s6 }
  0x9b   : > { %p3487_p4 = pnand %p3485_p2, %p3905_p1 }
  0x9d   : > { %p3488_p8 = pneg %p3487_p4 }
  0x9f   : > { %p3493_p11 = pnand %p3491_p10, %p3488_p8 }
  0xa1   : > { %3496 = shalt.err (!%p3493_p11)
}
  0xa2   : > { %s3497_s13 = scalar_lea.vmem %s457_s19, 3072  ;;  %p3505_p6 = scmp.lt.s32.totalorder %s457_s19, %s457_s19 }
  0xa3   : > { %p3498_p0 = scmp.ne.s32.totalorder %s457_s19, %s3497_s13  ;;  %p3506_p7 = scmp.lt.s32.totalorder %s3497_s13, %s3497_s13 }
  0xa5   : > { %p3500_p3 = pnand %p3498_p0, %p3905_p1  ;;  %p3507_p9 = por %p3506_p7, %p3505_p6 }
  0xa7   : > { %p3501_p5 = pneg %p3500_p3 }
  0xa9   : > { %p3508_p12 = pnand %p3507_p9, %p3501_p5 }
  0xab   : > { %3511 = shalt.err (!%p3508_p12)
}
  0xac   : > { %3088 = dma.hbm_to_vmem [thread:$0]  (!%p3891_p13), %s4457_s6, 3072, %s457_s19, [#allocation12], %s3724_s18, %s3724_s18, %s3725_s26  }
  0xad   : > { %s3512_s1 = scalar_lea.hbm %s4460_s9, 3072 }
  0xae   : > { %p3513_p2 = scmp.ne.s32.totalorder %s4460_s9, %s3512_s1  ;;  %p3519_p10 = scmp.lt.u32.totalorder %s3512_s1, %s4460_s9 }
  0xb0   : > { %p3515_p4 = pnand %p3513_p2, %p3905_p1 }
  0xb2   : > { %p3516_p8 = pneg %p3515_p4 }
  0xb4   : > { %p3521_p11 = pnand %p3519_p10, %p3516_p8 }
  0xb6   : > { %3524 = shalt.err (!%p3521_p11)
}
  0xb7   : > { %s3525_s19 = scalar_lea.vmem %s4020_s27, 3072  ;;  %p3533_p6 = scmp.lt.s32.totalorder %s4020_s27, %s4020_s27 }
  0xb8   : > { %p3526_p0 = scmp.ne.s32.totalorder %s4020_s27, %s3525_s19  ;;  %p3534_p7 = scmp.lt.s32.totalorder %s3525_s19, %s3525_s19 }
  0xba   : > { %p3528_p3 = pnand %p3526_p0, %p3905_p1  ;;  %p3535_p9 = por %p3534_p7, %p3533_p6 }
  0xbc   : > { %p3529_p5 = pneg %p3528_p3 }
  0xbe   : > { %p3536_p12 = pnand %p3535_p9, %p3529_p5 }
  0xc0   : > { %3539 = shalt.err (!%p3536_p12)
}
  0xc1   : > { %3094 = dma.hbm_to_vmem [thread:$0]  (!%p3891_p13), %s4460_s9, 3072, %s4020_s27, [#allocation15], %s3724_s18, %s3724_s18, %s3725_s26  }
  0xc2   : > { %s3731_s22 = smov [#allocation17]   ;;  %s3540_s24 = scalar_lea.hbm %s4462_s11, 1024 }
  0xc3   : > { %s501_s25 = sshll.u32 %s3731_s22, 4  ;;  %p3541_p2 = scmp.ne.s32.totalorder %s4462_s11, %s3540_s24  ;;  %s502_s25 = int_to_ptr.vmem [resolvable:$true] %s501_s25 }
  0xc4   : > { %p3547_p10 = scmp.lt.u32.totalorder %s3540_s24, %s4462_s11 }
  0xc5   : > { %p3543_p4 = pnand %p3541_p2, %p3905_p1 }
  0xc7   : > { %p3544_p8 = pneg %p3543_p4 }
  0xc9   : > { %p3549_p11 = pnand %p3547_p10, %p3544_p8 }
  0xcb   : > { %3552 = shalt.err (!%p3549_p11)
}
  0xcc   : > { %s3553_s27 = scalar_lea.vmem %s502_s25, 1024  ;;  %p3561_p6 = scmp.lt.s32.totalorder %s502_s25, %s502_s25 }
  0xcd   : > { %p3554_p0 = scmp.ne.s32.totalorder %s502_s25, %s3553_s27  ;;  %p3562_p7 = scmp.lt.s32.totalorder %s3553_s27, %s3553_s27 }
  0xcf   : > { %p3556_p3 = pnand %p3554_p0, %p3905_p1  ;;  %p3563_p9 = por %p3562_p7, %p3561_p6 }
  0xd1   : > { %p3557_p5 = pneg %p3556_p3 }
  0xd3   : > { %p3564_p12 = pnand %p3563_p9, %p3557_p5 }
  0xd5   : > { %3567 = shalt.err (!%p3564_p12)
}
  0xd6   : > { %3097 = dma.hbm_to_vmem [thread:$0]  (!%p3891_p13), %s4462_s11, 1024, %s502_s25, [#allocation18], %s3724_s18, %s3724_s18, %s3725_s26  }
  0xd7   : > { %p4506_p2 = scmp.ne.s32.totalorder %s4501_s28, 0 }
  0xd8   : > { %p4507_p1 = scmp.ne.s32.totalorder (!%p4506_p2), %s4502_s29, 0 }
  0xd9   : > { %520 = sbr.rel (%p4506_p2) target bundleno = 2980 (0xba4), region = 72 }
  0xe0   : > { %3659 = dma.done.wait (%p4507_p1), [#allocation6], 128  }
  0xe1   : > { %3661 = vsyncadd (%p4507_p1), [#allocation6], 4294967168 }
  0xe2   : > { %3663 = dma.done.wait (%p4507_p1), [#allocation9], 2048  }
  0xe3   : > { %3665 = vsyncadd (%p4507_p1), [#allocation9], 4294965248 }
  0xe4   : > { %3667 = dma.done.wait (%p4507_p1), [#allocation12], 4096  }
  0xe5   : > { %3669 = vsyncadd (%p4507_p1), [#allocation12], 4294963200 }
  0xe6   : > { %3671 = dma.done.wait (%p4507_p1), [#allocation15], 6144  }
  0xe7   : > { %3673 = vsyncadd (%p4507_p1), [#allocation15], 4294961152 }
  0xe8   : > { %3675 = dma.done.wait (%p4507_p1), [#allocation18], 1024  }
  0xe9   : > { %3677 = vsyncadd (%p4507_p1), [#allocation18], 4294966272  ;;  %s584_s21 = sand.u32 1, %s3692_s30   ;;  %p2499_p13 = scmp.ne.s32.totalorder %s3700_s16, 0 }
  0xea   : > { %s4115_s28 = sshll.u32 %s584_s21, 2  ;;  %v3213_v0 = vld [vmem:[#allocation11] sm:$0xff] (!%p2499_p13)   ;;  %v3732_v1 = vmov (!%p2499_p13), 0.0   ;;  %v3214_v2 = vld [vmem:[#allocation11 + $0x8] sm:$0xff] (!%p2499_p13)   ;;  %vm3733_vm0 = vmmov (!%p2499_p13), 0   ;;  %v3215_v3 = vld [vmem:[#allocation11 + $0x10] sm:$0xff] (!%p2499_p13)   ;;  %v725_v10 = vlaneseq (!%p2499_p13) }
  0xeb   : > { %s586_s20 = scalar_lea.vmem [#allocation19], %s4115_s28  ;;  %595 = sbr.rel (%p2499_p13) target bundleno = 486 (0x1e6), region = 108  ;;  %2755 = vmatprep.subr.bf16.mxu0 (!%p2499_p13), %v3732_v1  ;;  %722 = vst [vmem:[#allocation3] sm:$0x3] (!%p2499_p13), %v3732_v1  ;;  %2771 = vmatprep.mubr.msk.bf16.mxu0 (!%p2499_p13), %vm3733_vm0, %v3732_v1  ;;  %v3216_v4 = vld [vmem:[#allocation11 + $0x18] sm:$0xff] (!%p2499_p13)   ;;  %v3217_v5 = vld [vmem:[#allocation11 + $0x20] sm:$0xff] (!%p2499_p13)  }
  0xec   : > { %2756 = vmatpush3.bf16.msra.mxu0 (!%p2499_p13), %v3213_v0  ;;  %v3218_v6 = vld [vmem:[#allocation11 + $0x28] sm:$0xff] (!%p2499_p13)   ;;  %v3219_v7 = vld [vmem:[#allocation11 + $0x30] sm:$0xff] (!%p2499_p13)   ;;  %v3220_v8 = vld [vmem:[#allocation11 + $0x38] sm:$0xff] (!%p2499_p13)   ;;  %v726_v11 = vshrl.u32 (!%p2499_p13), %v725_v10, 7 }
  0xed   : > { %2757 = vmatprep.subr.bf16.mxu0 (!%p2499_p13), %v3732_v1  ;;  %v3221_v9 = vld [vmem:[#allocation5] sm:$0xff] (!%p2499_p13)   ;;  %v723_v12 = vld [vmem:[#allocation8] sm:$0x1] (!%p2499_p13)  ;;  %v2509_v17 = vld [vmem:[%s4455_s4] ss:$0 sm:$0xff] (!%p2499_p13) }
  0xee   : > { %v724_v13 = vunpack.c.l.bf16 (!%p2499_p13), %v723_v12  ;;  %v727_v14 = vsub.s32 (!%p2499_p13), 1, %v726_v11 }
  0xf0   : > { %2758 = vmatpush3.bf16.msra.mxu0 (!%p2499_p13), %v3214_v2  ;;  %v728_v15 = vrot.slane (!%p2499_p13), %v724_v13, %v727_v14 }
  0xf1   : > { %2759 = vmatprep.subr.bf16.mxu0 (!%p2499_p13), %v3732_v1 }
  0xf2   : > { %729 = vst [vmem:[#allocation4] sm:$0x3] %v728_v15 }
  0xf4   : > { %2760 = vmatpush3.bf16.msra.mxu0 %v3215_v3 }
  0xf5   : > { %2761 = vmatprep.subr.bf16.mxu0 %v3732_v1 }
  0xf8   : > { %2762 = vmatpush3.bf16.msra.mxu0 %v3216_v4 }
  0xf9   : > { %2763 = vmatprep.subr.bf16.mxu0 %v3732_v1 }
  0xfc   : > { %2764 = vmatpush3.bf16.msra.mxu0 %v3217_v5 }
  0xfd   : > { %2765 = vmatprep.subr.bf16.mxu0 %v3732_v1 }
 0x100   : > { %2766 = vmatpush3.bf16.msra.mxu0 %v3218_v6 }
 0x101   : > { %2767 = vmatprep.subr.bf16.mxu0 %v3732_v1 }
 0x104   : > { %2768 = vmatpush3.bf16.msra.mxu0 %v3219_v7 }
 0x105   : > { %2769 = vmatprep.subr.bf16.mxu0 %v3732_v1 }
 0x108   : > { %2770 = vmatpush3.bf16.msra.mxu0 %v3220_v8 }
 0x10b   : > { %2772 = vmatmul.mubr.bf16.vlgmr.msra.gmra.mrb[0].mxu0 %v3221_v9 }
 0x1de   : > { %v702_v16 = vpop.f32.mrb[0].mxu0 }
 0x1df   : > { %v2773_v18 = vpop.f32.mrb[1].mxu0  ;;  %v716_v20 = vadd.f32 %v2509_v17, %v702_v16 }
 0x1e0   : > { %v705_v19 = vpop.f32.mrb[2].mxu0 }
 0x1e1   : > { %v717_v21 = vadd.f32 %v2509_v17, %v705_v19  ;;  %v2774_v22 = vpop.f32.mrb[3].mxu0 }
 0x1e3   : > { %v2632_v23 = vpack.c.bf16 %v717_v21, %v716_v20 }
 0x1e5   : > { %2633 = vst [vmem:[#allocation2] sm:$0xff] %v2632_v23  }
 0x1e6 PF: > { %v4125_v24 = vld [vmem:[%s4456_s5] ss:$0 sm:$0xff]  ;;  %v4135_v26 = vld [vmem:[%s4459_s8 + $0x1] ss:$0 sm:$0xff]  ;;  %v4140_v27 = vld [vmem:[%s4459_s8 + $0x2] ss:$0 sm:$0xff] }
 0x1e7   : > { %v4130_v25 = vld [vmem:[%s4459_s8] ss:$0 sm:$0xff]  ;;  %v4150_v29 = vld [vmem:[%s4461_s10 + $0x1] ss:$0 sm:$0xff]  ;;  %v4155_v30 = vld [vmem:[%s4461_s10 + $0x2] ss:$0 sm:$0xff] }
 0x1e8   : > { %v4145_v28 = vld [vmem:[%s4461_s10] ss:$0 sm:$0xff]  ;;  %s4508_s22 = sld [smem:[#allocation39_spill]]  ;;  %v738_v32 = vld [vmem:[#allocation3] sm:$0x3]   ;;  %s4166_s25 = smov 0  }
 0x1ed   : > { %v739_v33 = vld [vmem:[#allocation4] sm:$0x3]  }
 0x1ee   : > { %v4160_v31 = vld [vmem:[%s4508_s22] ss:$0 sm:$0xff] }
 0x1ef LB: >> { %v3224_v34 = vld [vmem:[#allocation10] sm:$0xff]   ;;  %v3734_v35 = vmov 0.0   ;;  %v3225_v36 = vld [vmem:[#allocation10 + $0x8] sm:$0xff]   ;;  %vm3735_vm1 = vmmov 0   ;;  %v3226_v37 = vld [vmem:[#allocation10 + $0x10] sm:$0xff]   ;;  %v4192_v43 = vpack.c.bf16 %v3716_v32, %v3716_v32  ;;  %v860_v46 = vlaneseq  ;;  %s2609_s17 = sshll.u32 %s3720_s25, 1  ;;  %s3720_s25 = sphi %s4166_s25, %s745_s25   ;;  %v3716_v32 = vphi %v738_v32, %v4511_v32   ;;  %v3712_v33 = vphi %v739_v33, %v4510_v33  }
 0x1f0   : >> { %2775 = vmatprep.subr.bf16.mxu0 %v3734_v35  ;;  %2795 = vmatprep.subr.bf16.mxu1 %v3734_v35  ;;  %v3227_v38 = vld [vmem:[#allocation10 + $0x18] sm:$0xff]   ;;  %v3228_v39 = vld [vmem:[#allocation10 + $0x20] sm:$0xff]   ;;  %v3229_v40 = vld [vmem:[#allocation10 + $0x28] sm:$0xff]   ;;  %v3736_v44 = vmov 1966171168   ;;  %vm927_vm2 = vcmask 1041409   ;;  %s2152_s1 = scalar_lea.vmem %s586_s20, %s2609_s17 [#allocation19] }
 0x1f1   : >> { %2776 = vmatpush3.bf16.msra.mxu0 %v3224_v34  ;;  %2791 = vmatprep.mubr.msk.bf16.mxu0 %vm3735_vm1, %v3734_v35  ;;  %v3230_v41 = vld [vmem:[#allocation10 + $0x30] sm:$0xff]   ;;  %v3231_v42 = vld [vmem:[#allocation10 + $0x38] sm:$0xff]   ;;  %v858_v45 = vunpack.c.l.s4 %v3736_v44  ;;  %v4198_v48 = vshrl.u32 %v860_v46, 7  ;;  %v853_v0 = vld [vmem:[#allocation2] sm:$0xf]  ;;  %v4210_v13 = vand.u32 127, %v860_v46 }
 0x1f2   : >> { %2777 = vmatprep.subr.bf16.mxu0 %v3734_v35  ;;  %2811 = vmatprep.mubr.msk.bf16.mxu1 %vm3735_vm1, %v3734_v35  ;;  %v854_v3 = vld [vmem:[#allocation2 + $0x4] sm:$0xf]  ;;  %vm930_vm3 = vcmask 58368   ;;  %v3737_v21 = vmov 0   ;;  %vm2137_vm4 = vcmask 1041408   ;;  %s745_s25 = sadd.s32 1, %s3720_s25  }
 0x1f3   : >> { %v859_v47 = vunpack.c.0.s8 %v858_v45  ;;  %v4202_v57 = vsub.s32 0, %v4198_v48  ;;  %v921_v15 = vsub.s32 %v4210_v13, %v4198_v48  ;;  %3223 = vset.pattern.permute.xlu0 %v3737_v21  ;;  %3222 = vset.pattern.permute.xlu1 %v3737_v21  ;;  %v941_v22 = vsub.s32 1, %v4198_v48  ;;  %p742_p4 = scmp.ge.s32.totalorder %s745_s25, 2  }
 0x1f4   : > { %s4512_s24 = sld [smem:[#allocation35_spill]] (%p742_p4)  ;;  %s2628_s23 = sshll.u32 (%p742_p4), %s3700_s16, 6 }
 0x1f5   : >> { %2778 = vmatpush3.bf16.msra.mxu0 %v3225_v36  ;;  %v862_v49 = vsub.s32 %v859_v47, %v4198_v48  ;;  %s4513_s19 = sld [smem:[#allocation40_spill]] (%p742_p4)  ;;  %s2298_s13 = sshll.u32 (%p742_p4), %s586_s20, 4  ;;  %s4379_s13 = int_to_ptr.vmem [resolvable:$true] %s2298_s13 }
 0x1f6   : >> { %2779 = vmatprep.subr.bf16.mxu0 %v3734_v35  ;;  %s4383_s14 = scalar_lea.sflag (%p742_p4), [#allocation7], %s584_s21  ;;  %s3568_s29 = scalar_lea.vmem (%p742_p4), %s4379_s13, 64 }
 0x1f7   : > { %p3569_p8 = scmp.ne.s32.totalorder (%p742_p4), %s4379_s13, %s3568_s29  ;;  %s3739_s16 = smov (%p742_p4), [#allocation19]  }
 0x1f8   : > { %s3572_s18 = sshll.u32 (%p742_p4), %s3739_s16, 4  ;;  %s3573_s18 = int_to_ptr.vmem [resolvable:$false] %s3572_s18 }
 0x1f9   : >> { %2780 = vmatpush3.bf16.msra.mxu0 %v3226_v37  ;;  %s3574_s26 = scalar_lea.vmem (%p742_p4), %s3573_s18, 128  ;;  %p3575_p3 = scmp.lt.s32.totalorder (%p742_p4), %s4379_s13, %s3573_s18 }
 0x1fa   : >> { %2781 = vmatprep.subr.bf16.mxu0 %v3734_v35  ;;  %p4514_p10 = scmp.ne.s32.totalorder (%p742_p4), %s4512_s24, 0  ;;  %p3576_p5 = scmp.lt.s32.totalorder (%p742_p4), %s3574_s26, %s3568_s29 }
 0x1fb   : > { %s4375_s27 = scalar_lea.hbm (%p742_p4), %s4513_s19, %s2628_s23 }
 0x1fc   : > { %p3570_p11 = pnand (%p742_p4), %p3569_p8, %p4514_p10  ;;  %p3577_p6 = por (%p742_p4), %p3576_p5, %p3575_p3 }
 0x1fd   : >> { %2782 = vmatpush3.bf16.msra.mxu0 %v3227_v38 }
 0x1fe   : >> { %2783 = vmatprep.subr.bf16.mxu0 %v3734_v35  ;;  %p3571_p0 = pneg (%p742_p4), %p3570_p11 }
 0x200   : > { %p3578_p7 = pnand (%p742_p4), %p3577_p6, %p3571_p0 }
 0x201   : >> { %2784 = vmatpush3.bf16.msra.mxu0 %v3228_v39 }
 0x202   : >> { %2785 = vmatprep.subr.bf16.mxu0 %v3734_v35 }
 0x205   : >> { %2786 = vmatpush3.bf16.msra.mxu0 %v3229_v40 }
 0x206   : >> { %2787 = vmatprep.subr.bf16.mxu0 %v3734_v35 }
 0x209   : >> { %2788 = vmatpush3.bf16.msra.mxu0 %v3230_v41 }
 0x20a   : >> { %2789 = vmatprep.subr.bf16.mxu0 %v3734_v35 }
 0x20d   : >> { %2790 = vmatpush3.bf16.msra.mxu0 %v3231_v42 }
 0x20e   : >> { %2855 = vmatprep.subr.bf16.mxu0 %v3734_v35 }
 0x210   : >> { %2792 = vmatmul.mubr.bf16.vlgmr.msra.gmra.mrb[0].mxu0 %v4192_v43 }
 0x211   : >> { %2871 = vmatprep.mubr.msk.bf16.mxu0 %vm3735_vm1, %v3734_v35 }
 0x2e3   : >> { %v847_v50 = vpop.f32.mrb[0].mxu0 }
 0x2e4   : >> { %v855_v51 = vpack.c.bf16 %v847_v50, %v847_v50  ;;  %v2793_v52 = vpop.f32.mrb[1].mxu0  ;;  %v3232_v50 = vld [vmem:[#allocation14] sm:$0xff]  }
 0x2e5   : >> { %v850_v53 = vpop.f32.mrb[2].mxu0  ;;  %2796 = vmatpush3.bf16.msra.mxu1 %v3232_v50  ;;  %v3234_v52 = vld [vmem:[#allocation14 + $0x8] sm:$0xff]   ;;  %v3252_v50 = vld [vmem:[#allocation13 + $0x10] sm:$0xff]  }
 0x2e6   : >> { %v863_v54 = vrot.slane %v855_v51, %v862_v49  ;;  %v2794_v55 = vpop.f32.mrb[3].mxu0  ;;  %v3233_v51 = vld [vmem:[#allocation14 + $0x40] sm:$0xff]   ;;  %v3235_v53 = vld [vmem:[#allocation14 + $0x48] sm:$0xff]   ;;  %2797 = vmatprep.subr.bf16.mxu1 %v3734_v35 }
 0x2e7   : >> { %2856 = vmatpush3.bf16.msra.mxu0 %v3233_v51  ;;  %v3253_v51 = vld [vmem:[#allocation13 + $0x50] sm:$0xff]  }
 0x2e8   : >> { %v870_v56 = vrot.slane %v863_v54, %v862_v49  ;;  %2857 = vmatprep.subr.bf16.mxu0 %v3734_v35 }
 0x2e9   : >> { %2798 = vmatpush3.bf16.msra.mxu1 %v3234_v52  ;;  %v3254_v52 = vld [vmem:[#allocation13 + $0x18] sm:$0xff]  }
 0x2ea   : >> { %v872_v58 = vunpack.i.h.s16 %v870_v56  ;;  %v2518_v59 = vpack.i.b16 %v870_v56, %v870_v56  ;;  %2799 = vmatprep.subr.bf16.mxu1 %v3734_v35 }
 0x2eb   : >> { %2858 = vmatpush3.bf16.msra.mxu0 %v3235_v53  ;;  %v3255_v53 = vld [vmem:[#allocation13 + $0x58] sm:$0xff]  }
 0x2ec   : >> { %v874_v60 = vpack.i.b16 %v872_v58, %v872_v58  ;;  %v878_v61 = vrot.slane %v2518_v59, %v4202_v57  ;;  %2859 = vmatprep.subr.bf16.mxu0 %v3734_v35 }
 0x2ee   : >> { %v882_v62 = vrot.slane %v874_v60, %v4202_v57  ;;  %v884_v63 = vpack.i.b16 %v878_v61, %v878_v61  ;;  %v3236_v60 = vld [vmem:[#allocation14 + $0x10] sm:$0xff]  }
 0x2ef   : >> { %v3237_v61 = vld [vmem:[#allocation14 + $0x50] sm:$0xff]   ;;  %2800 = vmatpush3.bf16.msra.mxu1 %v3236_v60 }
 0x2f0   : >> { %v889_v1 = vrot.slane %v884_v63, %v4202_v57  ;;  %v891_v2 = vpack.i.b16 %v882_v62, %v882_v62  ;;  %2860 = vmatpush3.bf16.msra.mxu0 %v3237_v61  ;;  %2801 = vmatprep.subr.bf16.mxu1 %v3734_v35  ;;  %v3238_v63 = vld [vmem:[#allocation14 + $0x18] sm:$0xff]   ;;  %v3261_v60 = vld [vmem:[#allocation13 + $0x70] sm:$0xff]  }
 0x2f1   : >> { %2861 = vmatprep.subr.bf16.mxu0 %v3734_v35  ;;  %v3262_v61 = vld [vmem:[#allocation13 + $0x38] sm:$0xff]  }
 0x2f2   : >> { %v897_v4 = vadd.bf16 %v889_v1, %v853_v0  ;;  %v896_v5 = vrot.slane %v891_v2, %v4202_v57  ;;  %v3239_v0 = vld [vmem:[#allocation14 + $0x58] sm:$0xff]   ;;  %v3241_v1 = vld [vmem:[#allocation14 + $0x60] sm:$0xff]   ;;  %v3242_v2 = vld [vmem:[#allocation14 + $0x28] sm:$0xff]  }
 0x2f3   : >> { %2802 = vmatpush3.bf16.msra.mxu1 %v3238_v63  ;;  %v4262_v63 = vpack.c.bf16 %v3712_v33, %v3712_v33  ;;  %v3268_v33 = vld [vmem:[#allocation16 + $0x10] sm:$0xff]  }
 0x2f4   : >> { %3320 = vtanh.bf16 %v897_v4  ;;  %v898_v6 = vadd.bf16 %v896_v5, %v854_v3  ;;  %2862 = vmatpush3.bf16.msra.mxu0 %v3239_v0  ;;  %2803 = vmatprep.subr.bf16.mxu1 %v3734_v35  ;;  %v3243_v3 = vld [vmem:[#allocation14 + $0x68] sm:$0xff]   ;;  %v3244_v4 = vld [vmem:[#allocation14 + $0x30] sm:$0xff]   ;;  %v3264_v0 = vld [vmem:[#allocation16] sm:$0xff]  }
 0x2f5   : >> { %2863 = vmatprep.subr.bf16.mxu0 %v3734_v35  ;;  %v3245_v5 = vld [vmem:[#allocation14 + $0x70] sm:$0xff]  }
 0x2f6   : >> { %3322 = vtanh.bf16 %v898_v6  ;;  %v3246_v6 = vld [vmem:[#allocation14 + $0x38] sm:$0xff]  }
 0x2f8   : >> { %2864 = vmatpush3.bf16.msra.mxu0 %v3241_v1  ;;  %v3266_v1 = vld [vmem:[#allocation16 + $0x8] sm:$0xff]  }
 0x2f9   : >> { %2865 = vmatprep.subr.bf16.mxu0 %v3734_v35 }
 0x2fc   : >> { %2866 = vmatpush3.bf16.msra.mxu0 %v3243_v3  ;;  %v3269_v3 = vld [vmem:[#allocation16 + $0x50] sm:$0xff]  }
 0x2fd   : >> { %2867 = vmatprep.subr.bf16.mxu0 %v3734_v35 }
 0x2ff   : >> { %v3321_v7 = vpop.eup %3320 }
 0x300   : >> { %v901_v8 = vunpack.c.l.bf16 %v3321_v7  ;;  %2868 = vmatpush3.bf16.msra.mxu0 %v3245_v5  ;;  %v3247_v7 = vld [vmem:[#allocation14 + $0x78] sm:$0xff]  }
 0x301   : >> { %v3323_v9 = vpop.eup %3322  ;;  %2869 = vmatprep.subr.bf16.mxu0 %v3734_v35  ;;  %v3271_v5 = vld [vmem:[#allocation16 + $0x58] sm:$0xff]  }
 0x302   : >> { %v909_v10 = vmul.f32 %v4125_v24, %v901_v8  ;;  %v902_v11 = vunpack.c.l.bf16 %v3323_v9  ;;  %v2635_v8 = vld [vmem:[#allocation5] sm:$0xff]  }
 0x303   : >> { %v2636_v9 = vunpack.c.l.bf16 %v2635_v8 }
 0x304   : >> { %911 = vadd.xlane.f32.xlu0 %v909_v10  ;;  %v910_v12 = vmul.f32 %v4125_v24, %v902_v11  ;;  %2870 = vmatpush3.bf16.msra.mxu0 %v3247_v7  ;;  %v3273_v7 = vld [vmem:[#allocation16 + $0x60] sm:$0xff]  }
 0x305   : >> { %2875 = vmatprep.subr.bf16.mxu0 %v3734_v35 }
 0x308   : >> { %913 = vadd.xlane.f32.xlu0 %v910_v12  ;;  %v2637_v12 = vunpack.c.h.bf16 %v2635_v8  ;;  %v3274_v8 = vld [vmem:[#allocation16 + $0x28] sm:$0xff]  }
 0x391   : >> { %v912_v14 = vpop.xlane.xlu0 %911 }
 0x392   : >> { %v922_v17 = vrot.slane %v912_v14, %v921_v15 }
 0x395   : >> { %v914_v16 = vpop.xlane.xlu0 %913 }
 0x396   : >> { %v926_v18 = vrot.slane %v914_v16, %v921_v15 }
 0x398   : >> { %v928_v19 = vsel %vm927_vm2, %v926_v18, %v922_v17 }
 0x399   : >> { %v931_v20 = vsel %vm930_vm3, %v928_v19, -inf }
 0x39a   : >> { %932 = vmax.xlane.f32.xlu1 %v931_v20 }
 0x427   : >> { %v933_v23 = vpop.xlane.xlu1 %932 }
 0x428   : >> { %v938_v34 = vrot.slane %v933_v23, %v4202_v57  ;;  %v942_v36 = vrot.slane %v933_v23, %v941_v22 }
 0x42a   : >> { %v945_v37 = vsub.f32 %v912_v14, %v938_v34  ;;  %v946_v38 = vsub.f32 %v914_v16, %v942_v36 }
 0x42c   : >> { %v947_v39 = vmul.f32 1.442695, %v945_v37  ;;  %v949_v40 = vmul.f32 1.442695, %v946_v38 }
 0x42e   : >> { %3324 = vpow2.f32 %v947_v39 }
 0x42f   : >> { %3326 = vpow2.f32 %v949_v40 }
 0x438   : >> { %v3325_v41 = vpop.eup %3324 }
 0x439   : >> { %v3327_v42 = vpop.eup %3326  ;;  %954 = vperm.xlu1 %3222, %v3325_v41  }
 0x43a   : >> { %957 = vperm.xlu0 %3223, %v3327_v42  }
 0x4b8   : >> { %v955_v44 = vpop.permute.xlu1 %954 }
 0x4b9   : >> { %v958_v45 = vpop.permute.xlu0 %957  ;;  %v962_v46 = vrot.slane %v955_v44, %v921_v15 }
 0x4ba   : >> { %v966_v47 = vrot.slane %v958_v45, %v921_v15  ;;  %v3248_v45 = vld [vmem:[#allocation13] sm:$0xff]  }
 0x4bc   : >> { %v967_v48 = vsel %vm927_vm2, %v966_v47, %v962_v46  ;;  %v3249_v46 = vld [vmem:[#allocation13 + $0x40] sm:$0xff]  }
 0x4bd   : >> { %v969_v49 = vsel %vm930_vm3, %v967_v48, 0.0  ;;  %v3250_v48 = vld [vmem:[#allocation13 + $0x8] sm:$0xff]  }
 0x4be   : >> { %970 = vadd.xlane.f32.xlu1 %v969_v49  ;;  %v3251_v49 = vld [vmem:[#allocation13 + $0x48] sm:$0xff]  }
 0x54b   : >> { %v971_v54 = vpop.xlane.xlu1 %970 }
 0x54c   : >> { %3328 = vrcp.f32 %v971_v54  ;;  %v3256_v54 = vld [vmem:[#allocation13 + $0x20] sm:$0xff]  }
 0x556   : >> { %v3329_v55 = vpop.eup %3328 }
 0x557   : >> { %v977_v56 = vrot.slane %v3329_v55, %v4202_v57  ;;  %v981_v59 = vrot.slane %v3329_v55, %v941_v22  ;;  %v3240_v57 = vld [vmem:[#allocation14 + $0x20] sm:$0xff]  }
 0x558   : >> { %2804 = vmatpush3.bf16.msra.mxu1 %v3240_v57  ;;  %v3257_v55 = vld [vmem:[#allocation13 + $0x60] sm:$0xff]  }
 0x559   : >> { %v984_v58 = vmul.f32 %v3325_v41, %v977_v56  ;;  %v985_v62 = vmul.f32 %v3327_v42, %v981_v59  ;;  %2805 = vmatprep.subr.bf16.mxu1 %v3734_v35  ;;  %v3258_v56 = vld [vmem:[#allocation13 + $0x28] sm:$0xff]   ;;  %v3260_v59 = vld [vmem:[#allocation13 + $0x30] sm:$0xff]   ;;  %v3265_v57 = vld [vmem:[#allocation16 + $0x40] sm:$0xff]  }
 0x55b   : >> { %992 = vperm.xlu0 %3223, %v984_v58   ;;  %v3259_v58 = vld [vmem:[#allocation13 + $0x68] sm:$0xff]  }
 0x55c   : >> { %2806 = vmatpush3.bf16.msra.mxu1 %v3242_v2  ;;  %v3267_v2 = vld [vmem:[#allocation16 + $0x48] sm:$0xff]  }
 0x55d   : >> { %2807 = vmatprep.subr.bf16.mxu1 %v3734_v35 }
 0x55f   : >> { %997 = vperm.xlu0 %3223, %v985_v62   ;;  %v3263_v62 = vld [vmem:[#allocation13 + $0x78] sm:$0xff]  }
 0x560   : >> { %2808 = vmatpush3.bf16.msra.mxu1 %v3244_v4  ;;  %v3270_v4 = vld [vmem:[#allocation16 + $0x18] sm:$0xff]  }
 0x561   : >> { %2809 = vmatprep.subr.bf16.mxu1 %v3734_v35 }
 0x564   : >> { %2810 = vmatpush3.bf16.msra.mxu1 %v3246_v6  ;;  %v3272_v6 = vld [vmem:[#allocation16 + $0x20] sm:$0xff]  }
 0x565   : >> { %2815 = vmatprep.subr.bf16.mxu1 %v3734_v35 }
 0x5da   : >> { %v993_v10 = vpop.permute.xlu0 %992 }
 0x5db   : >> { %v1000_v11 = vmul.f32 %v2636_v9, %v993_v10  ;;  %v3275_v9 = vld [vmem:[#allocation16 + $0x68] sm:$0xff]   ;;  %v3276_v10 = vld [vmem:[#allocation16 + $0x30] sm:$0xff]  }
 0x5dd   : >> { %v1002_v14 = vrot.slane %v1000_v11, 4 }
 0x5de   : >> { %v998_v15 = vpop.permute.xlu0 %997 }
 0x5df   : >> { %v1003_v16 = vadd.f32 %v1002_v14, %v1000_v11  ;;  %v1001_v17 = vmul.f32 %v2637_v12, %v998_v15  ;;  %v3277_v11 = vld [vmem:[#allocation16 + $0x70] sm:$0xff]   ;;  %v3278_v12 = vld [vmem:[#allocation16 + $0x38] sm:$0xff]   ;;  %v3280_v15 = vld [vmem:[#allocation14 + $0x80] sm:$0xff]  }
 0x5e0   : >> { %v3279_v14 = vld [vmem:[#allocation16 + $0x78] sm:$0xff]  }
 0x5e1   : >> { %v1004_v18 = vrot.slane %v1003_v16, 2  ;;  %v1008_v19 = vrot.slane %v1001_v17, 4 }
 0x5e3   : >> { %v1005_v20 = vadd.f32 %v1004_v18, %v1003_v16  ;;  %v1009_v21 = vadd.f32 %v1008_v19, %v1001_v17  ;;  %v3281_v16 = vld [vmem:[#allocation13 + $0x80] sm:$0xff]   ;;  %v3282_v17 = vld [vmem:[#allocation14 + $0x88] sm:$0xff]   ;;  %v3284_v19 = vld [vmem:[#allocation14 + $0x90] sm:$0xff]  }
 0x5e4   : >> { %v3283_v18 = vld [vmem:[#allocation13 + $0x88] sm:$0xff]  }
 0x5e5   : >> { %v1006_v22 = vrot.slane %v1005_v20, 1  ;;  %v1010_v23 = vrot.slane %v1009_v21, 2 }
 0x5e7   : >> { %v1007_v34 = vadd.f32 %v1006_v22, %v1005_v20  ;;  %v1011_v36 = vadd.f32 %v1010_v23, %v1009_v21  ;;  %v3285_v20 = vld [vmem:[#allocation13 + $0x90] sm:$0xff]   ;;  %v3286_v21 = vld [vmem:[#allocation14 + $0x98] sm:$0xff]   ;;  %v3288_v23 = vld [vmem:[#allocation14 + $0xa0] sm:$0xff]  }
 0x5e8   : >> { %v3287_v22 = vld [vmem:[#allocation13 + $0x98] sm:$0xff]  }
 0x5e9   : >> { %v1012_v37 = vrot.slane %v1011_v36, 1  ;;  %v1015_v38 = vpack.c.bf16 %v1007_v34, %v1007_v34  ;;  %v3289_v34 = vld [vmem:[#allocation13 + $0xa0] sm:$0xff]  }
 0x5eb   : >> { %v1013_v39 = vadd.f32 %v1012_v37, %v1011_v36  ;;  %v1051_v41 = vunpack.c.l.b16 %v1015_v38  ;;  %v3290_v36 = vld [vmem:[#allocation14 + $0xa8] sm:$0xff]   ;;  %v3292_v38 = vld [vmem:[#allocation14 + $0xb0] sm:$0xff]  }
 0x5ec   : >> { %v3291_v37 = vld [vmem:[#allocation13 + $0xa8] sm:$0xff]  }
 0x5ed   : >> { %v1016_v40 = vpack.c.bf16 %v1013_v39, %v1013_v39  ;;  %v3293_v39 = vld [vmem:[#allocation13 + $0xb0] sm:$0xff]  }
 0x5ef   : >> { %v1052_v42 = vunpack.c.l.b16 %v1016_v40  ;;  %v3294_v40 = vld [vmem:[#allocation14 + $0xb8] sm:$0xff]  }
 0x5f1   : >> { %v1053_v44 = vsel %vm927_vm2, %v1052_v42, %v1051_v41  ;;  %v3295_v41 = vld [vmem:[#allocation13 + $0xb8] sm:$0xff]   ;;  %v3296_v42 = vld [vmem:[#allocation16 + $0x80] sm:$0xff]  }
 0x5f2   : >> { %v4238_v47 = vpack.c.b16 %v1053_v44, %v1053_v44  ;;  %v3297_v44 = vld [vmem:[#allocation16 + $0x88] sm:$0xff]  }
 0x5f4   : >> { %2812 = vmatmul.mubr.bf16.vlgmr.msra.gmra.mrb[0].mxu1 %v4238_v47  ;;  %2872 = vmatmul.mubr.bf16.vlgmr.msra.gmra.mrb[4].mxu0 %v4238_v47 }
 0x5f5   : >> { %2816 = vmatpush3.bf16.msra.mxu1 %v3248_v45  ;;  %2876 = vmatpush3.bf16.msra.mxu0 %v3249_v46  ;;  %v3298_v45 = vld [vmem:[#allocation16 + $0x90] sm:$0xff]   ;;  %v3299_v46 = vld [vmem:[#allocation16 + $0x98] sm:$0xff]  }
 0x5f6   : >> { %2817 = vmatprep.subr.bf16.mxu1 %v3734_v35  ;;  %2877 = vmatprep.subr.bf16.mxu0 %v3734_v35 }
 0x5f7   : >> { %2831 = vmatprep.mubr.msk.bf16.mxu1 %vm3735_vm1, %v3734_v35  ;;  %2891 = vmatprep.mubr.msk.bf16.mxu0 %vm3735_vm1, %v3734_v35 }
 0x5f9   : >> { %2818 = vmatpush3.bf16.msra.mxu1 %v3250_v48  ;;  %2878 = vmatpush3.bf16.msra.mxu0 %v3251_v49  ;;  %v3301_v48 = vld [vmem:[#allocation16 + $0xa8] sm:$0xff]   ;;  %v3302_v49 = vld [vmem:[#allocation16 + $0xb0] sm:$0xff]  }
 0x5fa   : >> { %2819 = vmatprep.subr.bf16.mxu1 %v3734_v35  ;;  %2879 = vmatprep.subr.bf16.mxu0 %v3734_v35 }
 0x5fd   : >> { %2820 = vmatpush3.bf16.msra.mxu1 %v3252_v50  ;;  %2880 = vmatpush3.bf16.msra.mxu0 %v3253_v51  ;;  %v3303_v50 = vld [vmem:[#allocation16 + $0xb8] sm:$0xff]   ;;  %v3304_v51 = vld [vmem:[#allocation17] sm:$0xff]  }
 0x5fe   : >> { %2821 = vmatprep.subr.bf16.mxu1 %v3734_v35  ;;  %2881 = vmatprep.subr.bf16.mxu0 %v3734_v35 }
 0x601   : >> { %2822 = vmatpush3.bf16.msra.mxu1 %v3254_v52  ;;  %2882 = vmatpush3.bf16.msra.mxu0 %v3255_v53  ;;  %v3305_v52 = vld [vmem:[#allocation17 + $0x8] sm:$0xff]   ;;  %v3306_v53 = vld [vmem:[#allocation17 + $0x10] sm:$0xff]  }
 0x602   : >> { %2823 = vmatprep.subr.bf16.mxu1 %v3734_v35  ;;  %2883 = vmatprep.subr.bf16.mxu0 %v3734_v35 }
 0x605   : >> { %2824 = vmatpush3.bf16.msra.mxu1 %v3256_v54  ;;  %2884 = vmatpush3.bf16.msra.mxu0 %v3257_v55  ;;  %v3307_v54 = vld [vmem:[#allocation17 + $0x18] sm:$0xff]   ;;  %v3309_v55 = vld [vmem:[#allocation17 + $0x28] sm:$0xff]  }
 0x606   : >> { %2825 = vmatprep.subr.bf16.mxu1 %v3734_v35  ;;  %2885 = vmatprep.subr.bf16.mxu0 %v3734_v35 }
 0x609   : >> { %2826 = vmatpush3.bf16.msra.mxu1 %v3258_v56  ;;  %2886 = vmatpush3.bf16.msra.mxu0 %v3259_v58  ;;  %v3310_v56 = vld [vmem:[#allocation17 + $0x30] sm:$0xff]   ;;  %v3311_v58 = vld [vmem:[#allocation17 + $0x38] sm:$0xff]  }
 0x60a   : >> { %2827 = vmatprep.subr.bf16.mxu1 %v3734_v35  ;;  %2887 = vmatprep.subr.bf16.mxu0 %v3734_v35 }
 0x60d   : >> { %2828 = vmatpush3.bf16.msra.mxu1 %v3260_v59  ;;  %2888 = vmatpush3.bf16.msra.mxu0 %v3261_v60 }
 0x60e   : >> { %2829 = vmatprep.subr.bf16.mxu1 %v3734_v35  ;;  %2889 = vmatprep.subr.bf16.mxu0 %v3734_v35 }
 0x611   : >> { %2830 = vmatpush3.bf16.msra.mxu1 %v3262_v61  ;;  %2890 = vmatpush3.bf16.msra.mxu0 %v3263_v62 }
 0x612   : >> { %2835 = vmatprep.subr.bf16.mxu1 %v3734_v35  ;;  %2895 = vmatprep.subr.bf16.mxu0 %v3734_v35 }
 0x614   : >> { %2832 = vmatmul.mubr.bf16.vlgmr.msra.gmra.mrb[0].mxu1 %v4262_v63  ;;  %2892 = vmatmul.mubr.bf16.vlgmr.msra.gmra.mrb[4].mxu0 %v4262_v63 }
 0x615   : >> { %2836 = vmatpush3.bf16.msra.mxu1 %v3264_v0  ;;  %2896 = vmatpush3.bf16.msra.mxu0 %v3265_v57 }
 0x616   : >> { %2837 = vmatprep.subr.bf16.mxu1 %v3734_v35  ;;  %2897 = vmatprep.subr.bf16.mxu0 %v3734_v35 }
 0x617   : >> { %2851 = vmatprep.mubr.msk.bf16.mxu1 %vm3735_vm1, %v3734_v35  ;;  %2911 = vmatprep.mubr.msk.bf16.mxu0 %vm3735_vm1, %v3734_v35 }
 0x619   : >> { %2838 = vmatpush3.bf16.msra.mxu1 %v3266_v1  ;;  %2898 = vmatpush3.bf16.msra.mxu0 %v3267_v2  ;;  %v3015_v2 = vadd.f32 %v4145_v28, %v4130_v25 }
 0x61a   : >> { %2839 = vmatprep.subr.bf16.mxu1 %v3734_v35  ;;  %2899 = vmatprep.subr.bf16.mxu0 %v3734_v35 }
 0x61d   : >> { %2840 = vmatpush3.bf16.msra.mxu1 %v3268_v33  ;;  %2900 = vmatpush3.bf16.msra.mxu0 %v3269_v3 }
 0x61e   : >> { %2841 = vmatprep.subr.bf16.mxu1 %v3734_v35  ;;  %2901 = vmatprep.subr.bf16.mxu0 %v3734_v35 }
 0x621   : >> { %2842 = vmatpush3.bf16.msra.mxu1 %v3270_v4  ;;  %2902 = vmatpush3.bf16.msra.mxu0 %v3271_v5 }
 0x622   : >> { %2843 = vmatprep.subr.bf16.mxu1 %v3734_v35  ;;  %2903 = vmatprep.subr.bf16.mxu0 %v3734_v35 }
 0x625   : >> { %2844 = vmatpush3.bf16.msra.mxu1 %v3272_v6  ;;  %2904 = vmatpush3.bf16.msra.mxu0 %v3273_v7 }
 0x626   : >> { %2845 = vmatprep.subr.bf16.mxu1 %v3734_v35  ;;  %2905 = vmatprep.subr.bf16.mxu0 %v3734_v35 }
 0x629   : >> { %2846 = vmatpush3.bf16.msra.mxu1 %v3274_v8  ;;  %2906 = vmatpush3.bf16.msra.mxu0 %v3275_v9 }
 0x62a   : >> { %2847 = vmatprep.subr.bf16.mxu1 %v3734_v35  ;;  %2907 = vmatprep.subr.bf16.mxu0 %v3734_v35 }
 0x62d   : >> { %2848 = vmatpush3.bf16.msra.mxu1 %v3276_v10  ;;  %2908 = vmatpush3.bf16.msra.mxu0 %v3277_v11 }
 0x62e   : >> { %2849 = vmatprep.subr.bf16.mxu1 %v3734_v35  ;;  %2909 = vmatprep.subr.bf16.mxu0 %v3734_v35 }
 0x631   : >> { %2850 = vmatpush3.bf16.msra.mxu1 %v3278_v12  ;;  %2910 = vmatpush3.bf16.msra.mxu0 %v3279_v14  ;;  %v3017_v14 = vadd.f32 %v4150_v29, %v4135_v26 }
 0x632   : >> { %2915 = vmatprep.subr.bf16.mxu1 %v3734_v35  ;;  %2935 = vmatprep.subr.bf16.mxu0 %v3734_v35 }
 0x634   : >> { %2852 = vmatmul.mubr.bf16.vlgmr.msra.gmra.mrb[0].mxu1 %v4192_v43  ;;  %2912 = vmatmul.mubr.bf16.vlgmr.msra.gmra.mrb[4].mxu0 %v4192_v43 }
 0x635   : >> { %2916 = vmatpush3.bf16.msra.mxu1 %v3280_v15  ;;  %2936 = vmatpush3.bf16.msra.mxu0 %v3281_v16 }
 0x636   : >> { %2917 = vmatprep.subr.bf16.mxu1 %v3734_v35  ;;  %2937 = vmatprep.subr.bf16.mxu0 %v3734_v35 }
 0x637   : >> { %2931 = vmatprep.mubr.msk.bf16.mxu1 %vm3735_vm1, %v3734_v35  ;;  %2951 = vmatprep.mubr.msk.bf16.mxu0 %vm3735_vm1, %v3734_v35 }
 0x639   : >> { %2918 = vmatpush3.bf16.msra.mxu1 %v3282_v17  ;;  %2938 = vmatpush3.bf16.msra.mxu0 %v3283_v18 }
 0x63a   : >> { %2919 = vmatprep.subr.bf16.mxu1 %v3734_v35  ;;  %2939 = vmatprep.subr.bf16.mxu0 %v3734_v35 }
 0x63d   : >> { %2920 = vmatpush3.bf16.msra.mxu1 %v3284_v19  ;;  %2940 = vmatpush3.bf16.msra.mxu0 %v3285_v20 }
 0x63e   : >> { %2921 = vmatprep.subr.bf16.mxu1 %v3734_v35  ;;  %2941 = vmatprep.subr.bf16.mxu0 %v3734_v35 }
 0x641   : >> { %2922 = vmatpush3.bf16.msra.mxu1 %v3286_v21  ;;  %2942 = vmatpush3.bf16.msra.mxu0 %v3287_v22 }
 0x642   : >> { %2923 = vmatprep.subr.bf16.mxu1 %v3734_v35  ;;  %2943 = vmatprep.subr.bf16.mxu0 %v3734_v35 }
 0x645   : >> { %2924 = vmatpush3.bf16.msra.mxu1 %v3288_v23  ;;  %2944 = vmatpush3.bf16.msra.mxu0 %v3289_v34 }
 0x646   : >> { %2925 = vmatprep.subr.bf16.mxu1 %v3734_v35  ;;  %2945 = vmatprep.subr.bf16.mxu0 %v3734_v35 }
 0x649   : >> { %2926 = vmatpush3.bf16.msra.mxu1 %v3290_v36  ;;  %2946 = vmatpush3.bf16.msra.mxu0 %v3291_v37 }
 0x64a   : >> { %2927 = vmatprep.subr.bf16.mxu1 %v3734_v35  ;;  %2947 = vmatprep.subr.bf16.mxu0 %v3734_v35 }
 0x64d   : >> { %2928 = vmatpush3.bf16.msra.mxu1 %v3292_v38  ;;  %2948 = vmatpush3.bf16.msra.mxu0 %v3293_v39 }
 0x64e   : >> { %2929 = vmatprep.subr.bf16.mxu1 %v3734_v35  ;;  %2949 = vmatprep.subr.bf16.mxu0 %v3734_v35 }
 0x651   : >> { %2930 = vmatpush3.bf16.msra.mxu1 %v3294_v40  ;;  %2950 = vmatpush3.bf16.msra.mxu0 %v3295_v41 }
 0x652   : >> { %2955 = vmatprep.subr.bf16.mxu1 %v3734_v35  ;;  %2975 = vmatprep.subr.bf16.mxu0 %v3734_v35 }
 0x654   : >> { %2932 = vmatmul.mubr.bf16.vlgmr.msra.gmra.mrb[4].mxu1 %v4238_v47  ;;  %2952 = vmatmul.mubr.bf16.vlgmr.msra.gmra.mrb[8].mxu0 %v4262_v63  ;;  %v3300_v47 = vld [vmem:[#allocation16 + $0xa0] sm:$0xff]  }
 0x655   : >> { %2956 = vmatpush3.bf16.msra.mxu1 %v3296_v42  ;;  %2971 = vmatprep.mubr.msk.bf16.mxu1 %vm3735_vm1, %v3734_v35 }
 0x656   : >> { %2957 = vmatprep.subr.bf16.mxu1 %v3734_v35  ;;  %2991 = vmatprep.mubr.msk.bf16.mxu0 %vm3735_vm1, %v3734_v35 }
 0x657   : >> { %2976 = vmatpush3.bf16.msra.mxu0 %v3304_v51 }
 0x658   : >> { %2977 = vmatprep.subr.bf16.mxu0 %v3734_v35 }
 0x659   : >> { %2958 = vmatpush3.bf16.msra.mxu1 %v3297_v44 }
 0x65a   : >> { %2959 = vmatprep.subr.bf16.mxu1 %v3734_v35 }
 0x65b   : >> { %2978 = vmatpush3.bf16.msra.mxu0 %v3305_v52 }
 0x65c   : >> { %2979 = vmatprep.subr.bf16.mxu0 %v3734_v35 }
 0x65d   : >> { %2960 = vmatpush3.bf16.msra.mxu1 %v3298_v45 }
 0x65e   : >> { %2961 = vmatprep.subr.bf16.mxu1 %v3734_v35 }
 0x65f   : >> { %2980 = vmatpush3.bf16.msra.mxu0 %v3306_v53 }
 0x660   : >> { %2981 = vmatprep.subr.bf16.mxu0 %v3734_v35 }
 0x661   : >> { %2962 = vmatpush3.bf16.msra.mxu1 %v3299_v46 }
 0x662   : >> { %2963 = vmatprep.subr.bf16.mxu1 %v3734_v35 }
 0x663   : >> { %2982 = vmatpush3.bf16.msra.mxu0 %v3307_v54 }
 0x664   : >> { %2983 = vmatprep.subr.bf16.mxu0 %v3734_v35 }
 0x665   : >> { %2964 = vmatpush3.bf16.msra.mxu1 %v3300_v47 }
 0x666   : >> { %2965 = vmatprep.subr.bf16.mxu1 %v3734_v35 }
 0x669   : >> { %2966 = vmatpush3.bf16.msra.mxu1 %v3301_v48 }
 0x66a   : >> { %2967 = vmatprep.subr.bf16.mxu1 %v3734_v35 }
 0x66d   : >> { %2968 = vmatpush3.bf16.msra.mxu1 %v3302_v49 }
 0x66e   : >> { %2969 = vmatprep.subr.bf16.mxu1 %v3734_v35 }
 0x671   : >> { %2970 = vmatpush3.bf16.msra.mxu1 %v3303_v50 }
 0x672   : >> { %2995 = vmatprep.subr.bf16.mxu1 %v3734_v35 }
 0x674   : >> { %2972 = vmatmul.mubr.bf16.vlgmr.msra.gmra.mrb[8].mxu1 %v4192_v43  ;;  %v3308_v43 = vld [vmem:[#allocation17 + $0x20] sm:$0xff]  }
 0x675   : >> { %3011 = vmatprep.mubr.msk.bf16.mxu1 %vm3735_vm1, %v3734_v35  ;;  %2984 = vmatpush3.bf16.msra.mxu0 %v3308_v43 }
 0x676   : >> { %2985 = vmatprep.subr.bf16.mxu0 %v3734_v35 }
 0x679   : >> { %2986 = vmatpush3.bf16.msra.mxu0 %v3309_v55 }
 0x67a   : >> { %2987 = vmatprep.subr.bf16.mxu0 %v3734_v35 }
 0x67d   : >> { %2988 = vmatpush3.bf16.msra.mxu0 %v3310_v56 }
 0x67e   : >> { %2989 = vmatprep.subr.bf16.mxu0 %v3734_v35 }
 0x681   : >> { %2990 = vmatpush3.bf16.msra.mxu0 %v3311_v58 }
 0x707   : >> { %v1343_v59 = vpop.f32.mrb[0].mxu1  ;;  %v1671_v60 = vpop.f32.mrb[4].mxu0 }
 0x708   : >> { %v2853_v61 = vpop.f32.mrb[1].mxu1  ;;  %v2913_v62 = vpop.f32.mrb[5].mxu0  ;;  %v3016_v33 = vadd.f32 %v3015_v2, %v1343_v59  ;;  %v3018_v15 = vadd.f32 %v3017_v14, %v1671_v60 }
 0x709   : >> { %v1346_v63 = vpop.f32.mrb[2].mxu1  ;;  %v1674_v0 = vpop.f32.mrb[6].mxu0 }
 0x70a   : >> { %v2854_v57 = vpop.f32.mrb[3].mxu1  ;;  %v2914_v1 = vpop.f32.mrb[7].mxu0  ;;  %v2598_v10 = vmul.f32 -1.442695, %v3016_v33  ;;  %v2599_v16 = vmul.f32 -1.442695, %v3018_v15 }
 0x70b   : >> { %v3319_v15 = vld [vmem:[#allocation8 + $0x38] sm:$0xff]  }
 0x70c   : >> { %3330 = vpow2.f32 %v2598_v10 }
 0x70d   : >> { %3332 = vpow2.f32 %v2599_v16 }
 0x716   : >> { %v3331_v17 = vpop.eup %3330 }
 0x717   : >> { %v2009_v18 = vadd.f32 1.0, %v3331_v17  ;;  %v3333_v19 = vpop.eup %3332 }
 0x718   : >> { %v2016_v20 = vadd.f32 1.0, %v3333_v19 }
 0x719   : >> { %3334 = vrcp.f32 %v2009_v18 }
 0x71a   : >> { %3336 = vrcp.f32 %v2016_v20 }
 0x723   : >> { %v3335_v34 = vpop.eup %3334 }
 0x724   : >> { %v3337_v41 = vpop.eup %3336 }
 0x725   : >> { %v2022_v42 = vsub.f32 1.0, %v3337_v41  ;;  %v2024_v46 = vmul.f32 %v3716_v32, %v3337_v41 }
 0x727   : >> { %v1793_v3 = vpop.f32.mrb[4].mxu1  ;;  %v1881_v4 = vpop.f32.mrb[8].mxu0 }
 0x728   : >> { %v1882_v5 = vadd.f32 %v1881_v4, %v1793_v3  ;;  %v2933_v6 = vpop.f32.mrb[5].mxu1  ;;  %v2953_v7 = vpop.f32.mrb[9].mxu0  ;;  %v3312_v3 = vld [vmem:[#allocation8] sm:$0xff]   ;;  %v3313_v4 = vld [vmem:[#allocation8 + $0x8] sm:$0xff]  }
 0x729   : >> { %v1796_v8 = vpop.f32.mrb[6].mxu1  ;;  %v1884_v9 = vpop.f32.mrb[10].mxu0  ;;  %2996 = vmatpush3.bf16.msra.mxu1 %v3312_v3  ;;  %v3315_v6 = vld [vmem:[#allocation8 + $0x18] sm:$0xff]   ;;  %v3316_v7 = vld [vmem:[#allocation8 + $0x20] sm:$0xff]  }
 0x72a   : >> { %v2934_v11 = vpop.f32.mrb[7].mxu1  ;;  %v2954_v12 = vpop.f32.mrb[11].mxu0  ;;  %v1893_v37 = vadd.f32 %v4140_v27, %v1882_v5  ;;  %2997 = vmatprep.subr.bf16.mxu1 %v3734_v35  ;;  %v3314_v5 = vld [vmem:[#allocation8 + $0x10] sm:$0xff]   ;;  %v3317_v8 = vld [vmem:[#allocation8 + $0x28] sm:$0xff]  }
 0x72b   : >> { %v3318_v9 = vld [vmem:[#allocation8 + $0x30] sm:$0xff]  }
 0x72d   : >> { %2998 = vmatpush3.bf16.msra.mxu1 %v3313_v4 }
 0x72e   : >> { %2999 = vmatprep.subr.bf16.mxu1 %v3734_v35 }
 0x731   : >> { %3000 = vmatpush3.bf16.msra.mxu1 %v3314_v5 }
 0x732   : >> { %3001 = vmatprep.subr.bf16.mxu1 %v3734_v35 }
 0x735   : >> { %3002 = vmatpush3.bf16.msra.mxu1 %v3315_v6 }
 0x736   : >> { %3003 = vmatprep.subr.bf16.mxu1 %v3734_v35 }
 0x739   : >> { %3004 = vmatpush3.bf16.msra.mxu1 %v3316_v7 }
 0x73a   : >> { %3005 = vmatprep.subr.bf16.mxu1 %v3734_v35 }
 0x73d   : >> { %3006 = vmatpush3.bf16.msra.mxu1 %v3317_v8 }
 0x73e   : >> { %3007 = vmatprep.subr.bf16.mxu1 %v3734_v35 }
 0x741   : >> { %3008 = vmatpush3.bf16.msra.mxu1 %v3318_v9 }
 0x742   : >> { %3009 = vmatprep.subr.bf16.mxu1 %v3734_v35 }
 0x745   : >> { %3010 = vmatpush3.bf16.msra.mxu1 %v3319_v15 }
 0x747   : >> { %v1999_v21 = vpop.f32.mrb[8].mxu1 }
 0x748   : >> { %v2000_v22 = vadd.f32 %v4155_v30, %v1999_v21  ;;  %v2973_v23 = vpop.f32.mrb[9].mxu1  ;;  %v3738_v21 = vmov 1.0|1.0  }
 0x749   : >> { %v2002_v36 = vpop.f32.mrb[10].mxu1 }
 0x74a   : >> { %v2019_v38 = vmul.f32 %v3335_v34, %v2000_v22  ;;  %v2974_v39 = vpop.f32.mrb[11].mxu1 }
 0x74c   : >> { %v2020_v40 = vadd.f32 %v2019_v38, %v1893_v37 }
 0x74e   : >> { %3338 = vtanh.f32 %v2020_v40 }
 0x758   : >> { %v3339_v44 = vpop.eup %3338 }
 0x759   : >> { %v2023_v45 = vmul.f32 %v3339_v44, %v2022_v42 }
 0x75b   : >> { %v4341_v32 = vadd.f32 %v2024_v46, %v2023_v45  }
 0x75d   : >> { %v4509_v47 = vmov %v4341_v32 }
 0x75e   : >> { %v2026_v48 = vpack.c.bf16 %v4509_v47, %v4509_v47  ;;  %2282 = vst [vmem:[#allocation20] sm:$0x3] (%p742_p4), %v4509_v47  ;;  %2280 = vst [vmem:[#allocation3] sm:$0x3] (%p742_p4), %v4509_v47 }
 0x760   : >> { %2992 = vmatmul.mubr.bf16.vlgmr.msra.gmra.mrb[12].mxu0 %v2026_v48 }
 0x833   : >> { %v2131_v49 = vpop.f32.mrb[12].mxu0 }
 0x834   : >> { %v2132_v50 = vadd.f32 %v4160_v31, %v2131_v49  ;;  %v2993_v51 = vpop.f32.mrb[13].mxu0 }
 0x835   : >> { %v2134_v52 = vpop.f32.mrb[14].mxu0 }
 0x836   : >> { %v2994_v53 = vpop.f32.mrb[15].mxu0  ;;  %v2138_v54 = vsel %vm2137_vm4, %v2132_v50, -inf }
 0x837   : >> { %2139 = vmax.xlane.f32.xlu1 %v2138_v54 }
 0x8c4   : >> { %v2140_v43 = vpop.xlane.xlu1 %2139 }
 0x8c5   : >> { %v2141_v55 = vsub.f32 %v2132_v50, %v2140_v43 }
 0x8c7   : >> { %v2142_v56 = vmul.f32 1.442695, %v2141_v55 }
 0x8c9   : >> { %3340 = vpow2.f32 %v2142_v56 }
 0x8d3   : >> { %v3341_v32 = vpop.eup %3340 }
 0x8d4   : >> { %v2144_v58 = vsel %vm2137_vm4, %v3341_v32, 0.0  ;;  %v4511_v32 = vmov %v4509_v47 }
 0x8d5   : >> { %2145 = vadd.xlane.f32.xlu0 %v2144_v58 }
 0x962   : >> { %v2146_v59 = vpop.xlane.xlu0 %2145 }
 0x963   : >> { %3342 = vlog2.f32 %v2146_v59 }
 0x96d   : >> { %v3343_v60 = vpop.eup %3342 }
 0x96e   : >> { %v2148_v61 = vmul.f32 0.6931472, %v3343_v60 }
 0x970   : >> { %v2149_v62 = vadd.f32 %v2148_v61, %v2140_v43 }
 0x972   : >> { %v2150_v63 = vsub.f32 %v2132_v50, %v2149_v62  ;;  %v2154_v0 = vsub.f32 %v2140_v43, %v2149_v62 }
 0x974   : >> { %2153 = vst [vmem:[%s2152_s1] sm:$0x3] %v2150_v63  ;;  %vm2155_vm5 = vcmp.eq.f32.partialorder %v2150_v63, %v2154_v0 }
 0x975   : >> { %v2156_v57 = vsel %vm2155_vm5, %v4210_v13, 128 }
 0x976   : >> { %v2157_v1 = vsel %vm2137_vm4, %v2156_v57, 2147483647 }
 0x977   : >> { %v2159_v2 = vshra.s32 %v2157_v1, 16  ;;  %v2158_v10 = vand.u32 65535, %v2157_v1 }
 0x979   : >> { %v2161_v33 = vcvt.s32.f32 %v2159_v2  ;;  %v2160_v12 = vcvt.s32.f32 %v2158_v10 }
 0x97b   : >> { %2162 = vmin.xlane.f32.xlu1 %v2161_v33 }
 0xa08   : >> { %v2163_v11 = vpop.xlane.xlu1 %2162 }
 0xa09   : >> { %vm2164_vm6 = vcmp.eq.f32.partialorder %v2161_v33, %v2163_v11  ;;  %v2169_v16 = vcvt.f32.s32 %v2163_v11 }
 0xa0a   : >> { %v2165_v14 = vsel %vm2164_vm6, %v2160_v12, inf }
 0xa0b   : >> { %2166 = vmin.xlane.f32.xlu1 %v2165_v14  ;;  %v2170_v18 = vshll.u32 %v2169_v16, 16 }
 0xa98   : >> { %v2167_v17 = vpop.xlane.xlu1 %2166 }
 0xa99   : >> { %v2168_v19 = vcvt.f32.s32 %v2167_v17 }
 0xa9b   : >> { %v2171_v20 = vadd.s32 %v2170_v18, %v2168_v19 }
 0xa9d   : >> { %vm2172_vm7 = vcmp.eq.s32.totalorder %v4210_v13, %v2171_v20 }
 0xa9e   : >> { %vm2619_vm8 = vmpackc.low %vm2172_vm7, %vm2172_vm7 }
 0xa9f   : >> { %3012 = vmatmul.mubr.msk.bf16.vlgmr.msra.gmra.mrb[12].mxu1 %vm2619_vm8, %v3738_v21 }
 0xb6f   : > { %744 = sbr.rel (!%p742_p4) target bundleno = 495 (0x1ef), region = 165 }
 0xb72   : >> { %v2274_v22 = vpop.f32.mrb[12].mxu1  }
 0xb73   : >> { %v3013_v35 = vpop.f32.mrb[13].mxu1  ;;  %v4510_v33 = vmov %v2274_v22  ;;  %2281 = vst [vmem:[#allocation4] sm:$0x3] (%p742_p4), %v2274_v22 }
 0xb74   : >> { %v2277_v23 = vpop.f32.mrb[14].mxu1 }
 0xb75   : >> { %v3014_v34 = vpop.f32.mrb[15].mxu1 }
 0xb76   : > { %3581 = shalt.err (!%p3578_p7)
}
 0xb77   : > { %s3582_s21 = scalar_lea.hbm %s4375_s27, 64  ;;  %s3586_s22 = scalar_lea.hbm %s4513_s19, 192 }
 0xb78   : > { %p3583_p9 = scmp.ne.s32.totalorder %s4375_s27, %s3582_s21  ;;  %p3587_p1 = scmp.lt.u32.totalorder %s4375_s27, %s4513_s19 }
 0xb79   : > { %p3588_p13 = scmp.lt.u32.totalorder %s3586_s22, %s3582_s21  ;;  %p3590_p8 = scmp.lt.u32.totalorder %s3582_s21, %s4375_s27 }
 0xb7a   : > { %p3584_p12 = pnand %p3583_p9, %p4514_p10 }
 0xb7b   : > { %p3589_p4 = por %p3588_p13, %p3587_p1 }
 0xb7c   : > { %p3585_p2 = pneg %p3584_p12 }
 0xb7d   : > { %p3591_p11 = por %p3590_p8, %p3589_p4 }
 0xb7f   : > { %p3592_p0 = pnand %p3591_p11, %p3585_p2 }
 0xb81   : > { %3595 = shalt.err (!%p3592_p0)
}
 0xb82   : > { %s3740_s1 = smov 32   ;;  %s4515_s23 = sld [smem:[#allocation33_spill]] }
 0xb83   : > { %s3741_s12 = smov 2   ;;  %s3742_s15 = smov [#allocation20]  }
 0xb84   : > { %3067 = dma.vmem_to_hbm [thread:$0]  (%p4514_p10), %s4379_s13, 64, %s4375_s27, %s4383_s14, %s3740_s1, %s3740_s1, %s3741_s12  }
 0xb85   : > { %s2314_s29 = sshll.u32 %s3742_s15, 4  ;;  %s2315_s29 = int_to_ptr.vmem [resolvable:$true] %s2314_s29 }
 0xb86   : > { %s3596_s16 = scalar_lea.vmem %s2315_s29, 32  ;;  %p3603_p9 = scmp.lt.s32.totalorder %s2315_s29, %s2315_s29 }
 0xb87   : > { %p3597_p3 = scmp.ne.s32.totalorder %s2315_s29, %s3596_s16  ;;  %p3604_p12 = scmp.lt.s32.totalorder %s3596_s16, %s3596_s16 }
 0xb88   : > { %p4516_p5 = scmp.ne.s32.totalorder %s4515_s23, 0 }
 0xb89   : > { %p3605_p2 = por %p3604_p12, %p3603_p9 }
 0xb8a   : > { %p3598_p6 = pnand %p3597_p3, %p4516_p5 }
 0xb8c   : > { %p3599_p7 = pneg %p3598_p6 }
 0xb8e   : > { %p3606_p1 = pnand %p3605_p2, %p3599_p7 }
 0xb90   : > { %3609 = shalt.err (!%p3606_p1)
}
 0xb91   : > { %s4517_s21 = sld [smem:[#allocation41_spill]] }
 0xb97   : > { %s3610_s28 = scalar_lea.hbm %s4517_s21, 32 }
 0xb98   : > { %p3611_p10 = scmp.ne.s32.totalorder %s4517_s21, %s3610_s28  ;;  %p3616_p8 = scmp.lt.u32.totalorder %s3610_s28, %s4517_s21 }
 0xb9a   : > { %p3612_p13 = pnand %p3611_p10, %p4516_p5 }
 0xb9c   : > { %p3613_p4 = pneg %p3612_p13 }
 0xb9e   : > { %p3618_p11 = pnand %p3616_p8, %p3613_p4 }
 0xba0   : > { %3621 = shalt.err (!%p3618_p11)
}
 0xba1   : > { %3069 = dma.vmem_to_hbm [thread:$0]  (%p4516_p5), %s2315_s29, 32, %s4517_s21, [#allocation21]  }
 0xba2   : > { %3679 = dma.done.wait (%p4516_p5), [#allocation21], 32  }
 0xba3   : > { %3681 = vsyncadd (%p4516_p5), [#allocation21], 4294967264 }
 0xba4 PF: > { %s4518_s25 = sld [smem:[#allocation32_spill]]  ;;  %s4519_s17 = sld [smem:[#allocation29_spill]] }
 0xba5   : > { %s4520_s1 = sld [smem:[#allocation36_spill]] }
 0xbaa   : > { %p3120_p0 = scmp.ge.s32.totalorder %s4518_s25, 2  ;;  %s2330_s12 = sand.u32 1, %s4519_s17  }
 0xbab   : > { %p4521_p3 = scmp.ne.s32.totalorder %s4520_s1, 0  ;;  %s2331_s15 = scalar_lea.sflag [#allocation7], %s2330_s12 }
 0xbad   : > { %p3099_p6 = pnand %p3120_p0, %p4521_p3 }
 0xbaf   : > { %3683 = dma.done.wait (!%p3099_p6), %s2331_s15, 64  }
 0xbb0   : > { %3685 = vsyncadd (!%p3099_p6), %s2331_s15, 4294967232  ;;  %s34_s18 = sadd.s32 1, %s4518_s25   ;;  %s4522_s16 = sld [smem:[#allocation30_spill]] }
 0xbb1   : > { %p31_p7 = scmp.ge.s32.totalorder %s34_s18, 5   ;;  %s4523_s15 = sld [smem:[#allocation37_spill]] }
 0xbb2   : > { %s4524_s26 = sld [smem:[#allocation31_spill]]  ;;  %s4525_s17 = sld [smem:[#allocation34_spill]] }
 0xbb3   : > { %s4526_s29 = smov %s3692_s30  ;;  %33 = sbr.rel (!%p31_p7) target bundleno = 15 (0xf), region = 176 }
 0xbb6   : > { %s4527_s30 = smov %s4522_s16 }
 0xbb8   : > { %s4528_s16 = smov %s4524_s26 }
 0xbba   :  { %2336 = vsyncpa [#allocation6], 1 }
 0xbbb   :  { %2338 = vsyncpa [#allocation6 + $0x1], 1 }
 0xbbc   :  { %2339 = vsyncpa [#allocation9], 1 }
 0xbbd   :  { %2340 = vsyncpa [#allocation12], 1 }
 0xbbe   :  { %2341 = vsyncpa [#allocation15], 1 }
 0xbbf   :  { %2342 = vsyncpa [#allocation18], 1 }
 0xbc0   :  { %2343 = vsyncpa [#allocation7], 1 }
 0xbc1   :  { %2345 = vsyncpa [#allocation7 + $0x1], 1 }
 0xbc2   :  { %2346 = vsyncpa [#allocation21], 1 }

</bundles_post_ra>
